<compile_context>
chip_gen: v7x
topology: tpu7x:2x2x1
jax: 0.10.0
libtpu: 0.0.40
codegen_flags: <defaults>
</compile_context>

<pallas_src>
import numpy as np

import jax
import jax.numpy as jnp
from jax import lax
from jax.experimental import pallas as pl
from jax.experimental.pallas import tpu as pltpu


# ---------------------------------------------------------------------------
# Layer configuration (matches EncoderModel.__init__ exactly)
#   (kind, weight key, bias key, kernel, stride, padding, output_padding)
# ---------------------------------------------------------------------------
_LAYERS = (
    ("conv",  "conv1_w",  "conv1_b",  3, 2, 1, 0),
    ("conv",  "conv2_w",  "conv2_b",  3, 2, 1, 0),
    ("conv",  "conv3_w",  "conv3_b",  5, 2, 0, 0),
    ("convt", "convt3_w", "convt3_b", 5, 2, 0, 0),
    ("convt", "convt2_w", "convt2_b", 3, 2, 1, 1),
    ("convt", "convt1_w", "convt1_b", 3, 2, 1, 1),
)


# ---------------------------------------------------------------------------
# Host-side (one-time) weight preparation: fold im2col + stride + padding of
# every (transposed) conv into static structured operands.
# ---------------------------------------------------------------------------
def prepare_params(params, h_in=28, w_in=28):
    plans = []
    h, w = h_in, w_in
    for kind, wk, bk, k, s, p, op in _LAYERS:
        wgt = np.asarray(params[wk], dtype=np.float32)
        bias = np.asarray(params[bk], dtype=np.float32)

        if kind == "conv":
            c_out, c_in, kh, kw = wgt.shape
            h_out = (h + 2 * p - kh) // s + 1
            w_out = (w + 2 * p - kw) // s + 1
            # row-gather selectors: out row ho, tap i -> input row s*ho + i - p
            sel = np.zeros((kh, h_out, h), np.float32)
            for i in range(kh):
                for ho in range(h_out):
                    r = s * ho + i - p
                    if 0 <= r < h:
                        sel[i, ho, r] = 1.0
            # column/channel contraction: G[i, wi, ci, wo, co] = W[co, ci, i, j]
            # with j = wi - s*wo + p (zero outside kernel -> padding folded in)
            g = np.zeros((kh, w, c_in, w_out, c_out), np.float32)
            for i in range(kh):
                for wi in range(w):
                    for wo in range(w_out):
                        j = wi - s * wo + p
                        if 0 <= j < kw:
                            g[i, wi, :, wo, :] = wgt[:, :, i, j].T
        else:  # transposed conv (PyTorch weight layout [Cin, Cout, kh, kw])
            c_in, c_out, kh, kw = wgt.shape
            h_out = (h - 1) * s - 2 * p + kh + op
            w_out = (w - 1) * s - 2 * p + kw + op
            # out row oh, kernel row ki -> input row ih = (oh + p - ki)/s
            sel = np.zeros((kh, h_out, h), np.float32)
            for ki in range(kh):
                for oh in range(h_out):
                    num = oh + p - ki
                    if num % s == 0 and 0 <= num // s < h:
                        sel[ki, oh, num // s] = 1.0
            # G[ki, wi, ci, wo, co] = Wt[ci, co, ki, kj] with kj = wo + p - s*wi
            g = np.zeros((kh, w, c_in, w_out, c_out), np.float32)
            for ki in range(kh):
                for wi in range(w):
                    for wo in range(w_out):
                        kj = wo + p - s * wi
                        if 0 <= kj < kw:
                            g[ki, wi, :, wo, :] = wgt[:, :, ki, kj]

        plans.append(dict(
            sel=jnp.asarray(sel),                                     # [k, Hout, Hin]
            g=jnp.asarray(g.reshape(kh, w * c_in, w_out * c_out)),    # [k, Win*Cin, Wout*Cout]
            bias=jnp.asarray(np.tile(bias, w_out)[None, :]),          # [1, Wout*Cout]
            k=int(kh),
            down=bool(h_out <= h),     # static: choose matmul association order
        ))
        h, w = h_out, w_out
    return plans


# ---------------------------------------------------------------------------
# The fused Pallas kernel: one image per grid step, all 6 layers in VMEM.
# refs = (x_ref, [sel_ref, g_ref, bias_ref] * 6, out_ref)
# ---------------------------------------------------------------------------
def _build_kernel(metas):
    def kernel(*refs):
        x_ref, out_ref = refs[0], refs[-1]
        act = x_ref[0]                                 # [H, W*C] (C == 1 for input)
        for li, (k, down) in enumerate(metas):
            sel_ref = refs[1 + 3 * li]                 # [k, Hout, Hin]
            g_ref = refs[2 + 3 * li]                   # [k, Win*Cin, Wout*Cout]
            b_ref = refs[3 + 3 * li]                   # [1, Wout*Cout]

            acc = None
            for i in range(k):
                if down:
                    # downsampling layer: gather rows first (small M everywhere)
                    t = jnp.dot(sel_ref[i], act, preferred_element_type=jnp.float32)
                    term = jnp.dot(t, g_ref[i], preferred_element_type=jnp.float32)
                else:
                    # upsampling layer: contract channels first, then scatter rows
                    t = jnp.dot(act, g_ref[i], preferred_element_type=jnp.float32)
                    term = jnp.dot(sel_ref[i], t, preferred_element_type=jnp.float32)
                acc = term if acc is None else acc + term

            # bias + ReLU (ReLU follows every layer in the reference module)
            act = jnp.maximum(acc + b_ref[...], 0.0)

        out_ref[0] = act.astype(out_ref.dtype)
    return kernel


# ---------------------------------------------------------------------------
# Wrapper: single pallas_call over a batch grid.
# ---------------------------------------------------------------------------
def encoder_model_forward(x_nchw, plans):
    b, c, h, w = x_nchw.shape
    assert c == 1, "EncoderModel takes single-channel input"
    x2d = x_nchw.reshape(b, h, w).astype(jnp.float32)        # [B, H, W*C], C == 1

    inputs = [x2d]
    in_specs = [pl.BlockSpec((1, h, w), lambda i: (i, 0, 0))]
    metas = []
    for plan in plans:
        metas.append((plan["k"], plan["down"]))
        for name in ("sel", "g", "bias"):
            arr = plan[name]
            inputs.append(arr)
            in_specs.append(
                pl.BlockSpec(arr.shape, lambda i, nd=arr.ndim: (0,) * nd))

    h_out = plans[-1]["sel"].shape[1]        # 28
    n_out = plans[-1]["g"].shape[2]          # Wout * Cout = 28 * 1

    out = pl.pallas_call(
        _build_kernel(tuple(metas)),
        out_shape=jax.ShapeDtypeStruct((b, h_out, n_out), jnp.float32),
        grid=(b,),
        in_specs=in_specs,
        out_specs=pl.BlockSpec((1, h_out, n_out), lambda i: (i, 0, 0)),
        compiler_params=pltpu.CompilerParams(
            # batch axis is independent -> shard across a 2-TC chip's cores
            dimension_semantics=("parallel",),
        ),
    )(*inputs)

    # channel dim is 1, so this is a free view back to NCHW
    return out.reshape(b, 1, h_out, n_out)
    # TODO(synk): the training-mode loss branch (self.loss_function) is host-side
    # glue, not part of the kernel; only the eval forward pass is implemented.


# ---------------------------------------------------------------------------
# Independent pure-JAX reference (exact PyTorch Conv2d / ConvTranspose2d
# semantics via lax.conv_general_dilated) to validate the fused kernel.
# ---------------------------------------------------------------------------
def _ref_conv2d(x, w, b, stride, pad):
    out = lax.conv_general_dilated(
        x, w, window_strides=(stride, stride),
        padding=[(pad, pad), (pad, pad)],
        dimension_numbers=("NCHW", "OIHW", "NCHW"),
        precision=lax.Precision.HIGHEST)
    return out + b[None, :, None, None]


def _ref_convt2d(x, w, b, stride, pad, opad):
    k = w.shape[2]
    w_conv = jnp.flip(w, (2, 3)).transpose(1, 0, 2, 3)       # [Cout, Cin, kh, kw]
    out = lax.conv_general_dilated(
        x, w_conv, window_strides=(1, 1),
        padding=[(k - 1 - pad, k - 1 - pad + opad)] * 2,
        lhs_dilation=(stride, stride),
        dimension_numbers=("NCHW", "OIHW", "NCHW"),
        precision=lax.Precision.HIGHEST)
    return out + b[None, :, None, None]


def reference_forward(x, p):
    y = jnp.maximum(_ref_conv2d(x, p["conv1_w"], p["conv1_b"], 2, 1), 0.0)
    y = jnp.maximum(_ref_conv2d(y, p["conv2_w"], p["conv2_b"], 2, 1), 0.0)
    y = jnp.maximum(_ref_conv2d(y, p["conv3_w"], p["conv3_b"], 2, 0), 0.0)
    z = jnp.maximum(_ref_convt2d(y, p["convt3_w"], p["convt3_b"], 2, 0, 0), 0.0)
    z = jnp.maximum(_ref_convt2d(z, p["convt2_w"], p["convt2_b"], 2, 1, 1), 0.0)
    z = jnp.maximum(_ref_convt2d(z, p["convt1_w"], p["convt1_b"], 2, 1, 1), 0.0)
    return z


# ---------------------------------------------------------------------------
# Deterministic parameter init (shapes from the PyTorch module's __init__)
# ---------------------------------------------------------------------------
def init_params(key):
    shapes = {
        "conv1_w": (16, 1, 3, 3),   "conv1_b": (16,),
        "conv2_w": (32, 16, 3, 3),  "conv2_b": (32,),
        "conv3_w": (64, 32, 5, 5),  "conv3_b": (64,),
        "convt3_w": (64, 32, 5, 5), "convt3_b": (32,),   # [Cin, Cout, k, k]
        "convt2_w": (32, 16, 3, 3), "convt2_b": (16,),
        "convt1_w": (16, 1, 3, 3),  "convt1_b": (1,),
    }
    params = {}
    for name, shape in shapes.items():
        key, sub = jax.random.split(key)
        scale = 0.1 if name.endswith("_w") else 0.05
        params[name] = scale * jax.random.normal(sub, shape, dtype=jnp.float32)
    return params


if __name__ == "__main__":
    key = jax.random.PRNGKey(0)
    k_params, k_x = jax.random.split(key)
    params = init_params(k_params)

    # MNIST-like input: the conv stack round-trips 28x28 -> 28x28.
    x = jax.random.normal(k_x, (2, 1, 28, 28), dtype=jnp.float32)

    plans = prepare_params(params)                     # host-side, one time
    fwd = jax.jit(lambda xx: encoder_model_forward(xx, plans))
    out = jax.block_until_ready(fwd(x))
    assert out.shape == (2, 1, 28, 28), out.shape

    ref = jax.block_until_ready(reference_forward(x, params))
    err = float(jnp.max(jnp.abs(out - ref)))
    assert jnp.allclose(out, ref, atol=1e-3, rtol=1e-3), f"max |err| = {err}"

    print("KERNEL_OK")
</pallas_src>

<mosaic_0001>
module attributes {stable_mosaic.version = 11 : i64} {
  func.func @kernel(%arg0: i32, %arg1: memref<1x28x28xf32, #tpu.memory_space<vmem>>, %arg2: memref<3x14x28xf32, #tpu.memory_space<vmem>>, %arg3: memref<3x28x224xf32, #tpu.memory_space<vmem>>, %arg4: memref<1x224xf32, #tpu.memory_space<vmem>>, %arg5: memref<3x7x14xf32, #tpu.memory_space<vmem>>, %arg6: memref<3x224x224xf32, #tpu.memory_space<vmem>>, %arg7: memref<1x224xf32, #tpu.memory_space<vmem>>, %arg8: memref<5x2x7xf32, #tpu.memory_space<vmem>>, %arg9: memref<5x224x128xf32, #tpu.memory_space<vmem>>, %arg10: memref<1x128xf32, #tpu.memory_space<vmem>>, %arg11: memref<5x7x2xf32, #tpu.memory_space<vmem>>, %arg12: memref<5x128x224xf32, #tpu.memory_space<vmem>>, %arg13: memref<1x224xf32, #tpu.memory_space<vmem>>, %arg14: memref<3x14x7xf32, #tpu.memory_space<vmem>>, %arg15: memref<3x224x224xf32, #tpu.memory_space<vmem>>, %arg16: memref<1x224xf32, #tpu.memory_space<vmem>>, %arg17: memref<3x28x14xf32, #tpu.memory_space<vmem>>, %arg18: memref<3x224x28xf32, #tpu.memory_space<vmem>>, %arg19: memref<1x28xf32, #tpu.memory_space<vmem>>, %arg20: memref<1x28x28xf32, #tpu.memory_space<vmem>>) attributes {dimension_semantics = [#tpu.dimension_semantics<parallel>], iteration_bounds = array<i64: 2>, scalar_prefetch = 0 : i64, scratch_operands = 0 : i64, tpu.core_type = #tpu.core_type<tc>, window_params = [{transform_indices = @transform_0, window_bounds = array<i64: 1, 28, 28>}, {pipeline_mode = #tpu.pipeline_mode<synchronous>, transform_indices = @transform_1, window_bounds = array<i64: 3, 14, 28>}, {pipeline_mode = #tpu.pipeline_mode<synchronous>, transform_indices = @transform_2, window_bounds = array<i64: 3, 28, 224>}, {pipeline_mode = #tpu.pipeline_mode<synchronous>, transform_indices = @transform_3, window_bounds = array<i64: 1, 224>}, {pipeline_mode = #tpu.pipeline_mode<synchronous>, transform_indices = @transform_4, window_bounds = array<i64: 3, 7, 14>}, {pipeline_mode = #tpu.pipeline_mode<synchronous>, transform_indices = @transform_5, window_bounds = array<i64: 3, 224, 224>}, {pipeline_mode = #tpu.pipeline_mode<synchronous>, transform_indices = @transform_6, window_bounds = array<i64: 1, 224>}, {pipeline_mode = #tpu.pipeline_mode<synchronous>, transform_indices = @transform_7, window_bounds = array<i64: 5, 2, 7>}, {pipeline_mode = #tpu.pipeline_mode<synchronous>, transform_indices = @transform_8, window_bounds = array<i64: 5, 224, 128>}, {pipeline_mode = #tpu.pipeline_mode<synchronous>, transform_indices = @transform_9, window_bounds = array<i64: 1, 128>}, {pipeline_mode = #tpu.pipeline_mode<synchronous>, transform_indices = @transform_10, window_bounds = array<i64: 5, 7, 2>}, {pipeline_mode = #tpu.pipeline_mode<synchronous>, transform_indices = @transform_11, window_bounds = array<i64: 5, 128, 224>}, {pipeline_mode = #tpu.pipeline_mode<synchronous>, transform_indices = @transform_12, window_bounds = array<i64: 1, 224>}, {pipeline_mode = #tpu.pipeline_mode<synchronous>, transform_indices = @transform_13, window_bounds = array<i64: 3, 14, 7>}, {pipeline_mode = #tpu.pipeline_mode<synchronous>, transform_indices = @transform_14, window_bounds = array<i64: 3, 224, 224>}, {pipeline_mode = #tpu.pipeline_mode<synchronous>, transform_indices = @transform_15, window_bounds = array<i64: 1, 224>}, {pipeline_mode = #tpu.pipeline_mode<synchronous>, transform_indices = @transform_16, window_bounds = array<i64: 3, 28, 14>}, {pipeline_mode = #tpu.pipeline_mode<synchronous>, transform_indices = @transform_17, window_bounds = array<i64: 3, 224, 28>}, {pipeline_mode = #tpu.pipeline_mode<synchronous>, transform_indices = @transform_18, window_bounds = array<i64: 1, 28>}, {transform_indices = @transform_19, window_bounds = array<i64: 1, 28, 28>}]} {
    %c0 = arith.constant 0 : index
    %c0_0 = arith.constant 0 : index
    %c0_1 = arith.constant 0 : index
    %0 = vector.load %arg1[%c0, %c0_0, %c0_1] : memref<1x28x28xf32, #tpu.memory_space<vmem>>, vector<1x28x28xf32>
    %1 = vector.shape_cast %0 : vector<1x28x28xf32> to vector<28x28xf32>
    %c0_2 = arith.constant 0 : index
    %c0_3 = arith.constant 0 : index
    %c0_4 = arith.constant 0 : index
    %2 = vector.load %arg2[%c0_2, %c0_3, %c0_4] : memref<3x14x28xf32, #tpu.memory_space<vmem>>, vector<1x14x28xf32>
    %3 = vector.shape_cast %2 : vector<1x14x28xf32> to vector<14x28xf32>
    %cst = arith.constant dense<0.000000e+00> : vector<14x28xf32>
    %4 = tpu.matmul %3, %1, %cst {dimension_numbers = #tpu.dot_dimension_numbers<[1], [0], [0], [1], [0, 0, 1, 1], [], []>} : vector<14x28xf32>, vector<28x28xf32>, vector<14x28xf32> -> vector<14x28xf32>
    %c0_5 = arith.constant 0 : index
    %c0_6 = arith.constant 0 : index
    %c0_7 = arith.constant 0 : index
    %5 = vector.load %arg3[%c0_5, %c0_6, %c0_7] : memref<3x28x224xf32, #tpu.memory_space<vmem>>, vector<1x28x224xf32>
    %6 = vector.shape_cast %5 : vector<1x28x224xf32> to vector<28x224xf32>
    %cst_8 = arith.constant dense<0.000000e+00> : vector<14x224xf32>
    %7 = tpu.matmul %4, %6, %cst_8 {dimension_numbers = #tpu.dot_dimension_numbers<[1], [0], [0], [1], [0, 0, 1, 1], [], []>} : vector<14x28xf32>, vector<28x224xf32>, vector<14x224xf32> -> vector<14x224xf32>
    %c1 = arith.constant 1 : index
    %c0_9 = arith.constant 0 : index
    %c0_10 = arith.constant 0 : index
    %8 = vector.load %arg2[%c1, %c0_9, %c0_10] : memref<3x14x28xf32, #tpu.memory_space<vmem>>, vector<1x14x28xf32>
    %9 = vector.shape_cast %8 : vector<1x14x28xf32> to vector<14x28xf32>
    %cst_11 = arith.constant dense<0.000000e+00> : vector<14x28xf32>
    %10 = tpu.matmul %9, %1, %cst_11 {dimension_numbers = #tpu.dot_dimension_numbers<[1], [0], [0], [1], [0, 0, 1, 1], [], []>} : vector<14x28xf32>, vector<28x28xf32>, vector<14x28xf32> -> vector<14x28xf32>
    %c1_12 = arith.constant 1 : index
    %c0_13 = arith.constant 0 : index
    %c0_14 = arith.constant 0 : index
    %11 = vector.load %arg3[%c1_12, %c0_13, %c0_14] : memref<3x28x224xf32, #tpu.memory_space<vmem>>, vector<1x28x224xf32>
    %12 = vector.shape_cast %11 : vector<1x28x224xf32> to vector<28x224xf32>
    %cst_15 = arith.constant dense<0.000000e+00> : vector<14x224xf32>
    %13 = tpu.matmul %10, %12, %cst_15 {dimension_numbers = #tpu.dot_dimension_numbers<[1], [0], [0], [1], [0, 0, 1, 1], [], []>} : vector<14x28xf32>, vector<28x224xf32>, vector<14x224xf32> -> vector<14x224xf32>
    %14 = arith.addf %7, %13 : vector<14x224xf32>
    %c2 = arith.constant 2 : index
    %c0_16 = arith.constant 0 : index
    %c0_17 = arith.constant 0 : index
    %15 = vector.load %arg2[%c2, %c0_16, %c0_17] : memref<3x14x28xf32, #tpu.memory_space<vmem>>, vector<1x14x28xf32>
    %16 = vector.shape_cast %15 : vector<1x14x28xf32> to vector<14x28xf32>
    %cst_18 = arith.constant dense<0.000000e+00> : vector<14x28xf32>
    %17 = tpu.matmul %16, %1, %cst_18 {dimension_numbers = #tpu.dot_dimension_numbers<[1], [0], [0], [1], [0, 0, 1, 1], [], []>} : vector<14x28xf32>, vector<28x28xf32>, vector<14x28xf32> -> vector<14x28xf32>
    %c2_19 = arith.constant 2 : index
    %c0_20 = arith.constant 0 : index
    %c0_21 = arith.constant 0 : index
    %18 = vector.load %arg3[%c2_19, %c0_20, %c0_21] : memref<3x28x224xf32, #tpu.memory_space<vmem>>, vector<1x28x224xf32>
    %19 = vector.shape_cast %18 : vector<1x28x224xf32> to vector<28x224xf32>
    %cst_22 = arith.constant dense<0.000000e+00> : vector<14x224xf32>
    %20 = tpu.matmul %17, %19, %cst_22 {dimension_numbers = #tpu.dot_dimension_numbers<[1], [0], [0], [1], [0, 0, 1, 1], [], []>} : vector<14x28xf32>, vector<28x224xf32>, vector<14x224xf32> -> vector<14x224xf32>
    %21 = arith.addf %14, %20 : vector<14x224xf32>
    %c0_23 = arith.constant 0 : index
    %c0_24 = arith.constant 0 : index
    %22 = vector.load %arg4[%c0_23, %c0_24] : memref<1x224xf32, #tpu.memory_space<vmem>>, vector<1x224xf32>
    %23 = vector.broadcast %22 : vector<1x224xf32> to vector<14x224xf32>
    %24 = arith.addf %21, %23 : vector<14x224xf32>
    %cst_25 = arith.constant 0.000000e+00 : f32
    %25 = vector.broadcast %cst_25 : f32 to vector<14x224xf32>
    %26 = arith.maximumf %24, %25 : vector<14x224xf32>
    %c0_26 = arith.constant 0 : index
    %c0_27 = arith.constant 0 : index
    %c0_28 = arith.constant 0 : index
    %27 = vector.load %arg5[%c0_26, %c0_27, %c0_28] : memref<3x7x14xf32, #tpu.memory_space<vmem>>, vector<1x7x14xf32>
    %28 = vector.shape_cast %27 : vector<1x7x14xf32> to vector<7x14xf32>
    %cst_29 = arith.constant dense<0.000000e+00> : vector<7x224xf32>
    %29 = tpu.matmul %28, %26, %cst_29 {dimension_numbers = #tpu.dot_dimension_numbers<[1], [0], [0], [1], [0, 0, 1, 1], [], []>} : vector<7x14xf32>, vector<14x224xf32>, vector<7x224xf32> -> vector<7x224xf32>
    %c0_30 = arith.constant 0 : index
    %c0_31 = arith.constant 0 : index
    %c0_32 = arith.constant 0 : index
    %30 = vector.load %arg6[%c0_30, %c0_31, %c0_32] : memref<3x224x224xf32, #tpu.memory_space<vmem>>, vector<1x224x224xf32>
    %31 = vector.shape_cast %30 : vector<1x224x224xf32> to vector<224x224xf32>
    %cst_33 = arith.constant dense<0.000000e+00> : vector<7x224xf32>
    %32 = tpu.matmul %29, %31, %cst_33 {dimension_numbers = #tpu.dot_dimension_numbers<[1], [0], [0], [1], [0, 0, 1, 1], [], []>} : vector<7x224xf32>, vector<224x224xf32>, vector<7x224xf32> -> vector<7x224xf32>
    %c1_34 = arith.constant 1 : index
    %c0_35 = arith.constant 0 : index
    %c0_36 = arith.constant 0 : index
    %33 = vector.load %arg5[%c1_34, %c0_35, %c0_36] : memref<3x7x14xf32, #tpu.memory_space<vmem>>, vector<1x7x14xf32>
    %34 = vector.shape_cast %33 : vector<1x7x14xf32> to vector<7x14xf32>
    %cst_37 = arith.constant dense<0.000000e+00> : vector<7x224xf32>
    %35 = tpu.matmul %34, %26, %cst_37 {dimension_numbers = #tpu.dot_dimension_numbers<[1], [0], [0], [1], [0, 0, 1, 1], [], []>} : vector<7x14xf32>, vector<14x224xf32>, vector<7x224xf32> -> vector<7x224xf32>
    %c1_38 = arith.constant 1 : index
    %c0_39 = arith.constant 0 : index
    %c0_40 = arith.constant 0 : index
    %36 = vector.load %arg6[%c1_38, %c0_39, %c0_40] : memref<3x224x224xf32, #tpu.memory_space<vmem>>, vector<1x224x224xf32>
    %37 = vector.shape_cast %36 : vector<1x224x224xf32> to vector<224x224xf32>
    %cst_41 = arith.constant dense<0.000000e+00> : vector<7x224xf32>
    %38 = tpu.matmul %35, %37, %cst_41 {dimension_numbers = #tpu.dot_dimension_numbers<[1], [0], [0], [1], [0, 0, 1, 1], [], []>} : vector<7x224xf32>, vector<224x224xf32>, vector<7x224xf32> -> vector<7x224xf32>
    %39 = arith.addf %32, %38 : vector<7x224xf32>
    %c2_42 = arith.constant 2 : index
    %c0_43 = arith.constant 0 : index
    %c0_44 = arith.constant 0 : index
    %40 = vector.load %arg5[%c2_42, %c0_43, %c0_44] : memref<3x7x14xf32, #tpu.memory_space<vmem>>, vector<1x7x14xf32>
    %41 = vector.shape_cast %40 : vector<1x7x14xf32> to vector<7x14xf32>
    %cst_45 = arith.constant dense<0.000000e+00> : vector<7x224xf32>
    %42 = tpu.matmul %41, %26, %cst_45 {dimension_numbers = #tpu.dot_dimension_numbers<[1], [0], [0], [1], [0, 0, 1, 1], [], []>} : vector<7x14xf32>, vector<14x224xf32>, vector<7x224xf32> -> vector<7x224xf32>
    %c2_46 = arith.constant 2 : index
    %c0_47 = arith.constant 0 : index
    %c0_48 = arith.constant 0 : index
    %43 = vector.load %arg6[%c2_46, %c0_47, %c0_48] : memref<3x224x224xf32, #tpu.memory_space<vmem>>, vector<1x224x224xf32>
    %44 = vector.shape_cast %43 : vector<1x224x224xf32> to vector<224x224xf32>
    %cst_49 = arith.constant dense<0.000000e+00> : vector<7x224xf32>
    %45 = tpu.matmul %42, %44, %cst_49 {dimension_numbers = #tpu.dot_dimension_numbers<[1], [0], [0], [1], [0, 0, 1, 1], [], []>} : vector<7x224xf32>, vector<224x224xf32>, vector<7x224xf32> -> vector<7x224xf32>
    %46 = arith.addf %39, %45 : vector<7x224xf32>
    %c0_50 = arith.constant 0 : index
    %c0_51 = arith.constant 0 : index
    %47 = vector.load %arg7[%c0_50, %c0_51] : memref<1x224xf32, #tpu.memory_space<vmem>>, vector<1x224xf32>
    %48 = vector.broadcast %47 : vector<1x224xf32> to vector<7x224xf32>
    %49 = arith.addf %46, %48 : vector<7x224xf32>
    %cst_52 = arith.constant 0.000000e+00 : f32
    %50 = vector.broadcast %cst_52 : f32 to vector<7x224xf32>
    %51 = arith.maximumf %49, %50 : vector<7x224xf32>
    %c0_53 = arith.constant 0 : index
    %c0_54 = arith.constant 0 : index
    %c0_55 = arith.constant 0 : index
    %52 = vector.load %arg8[%c0_53, %c0_54, %c0_55] : memref<5x2x7xf32, #tpu.memory_space<vmem>>, vector<1x2x7xf32>
    %53 = vector.shape_cast %52 : vector<1x2x7xf32> to vector<2x7xf32>
    %cst_56 = arith.constant dense<0.000000e+00> : vector<2x224xf32>
    %54 = tpu.matmul %53, %51, %cst_56 {dimension_numbers = #tpu.dot_dimension_numbers<[1], [0], [0], [1], [0, 0, 1, 1], [], []>} : vector<2x7xf32>, vector<7x224xf32>, vector<2x224xf32> -> vector<2x224xf32>
    %c0_57 = arith.constant 0 : index
    %c0_58 = arith.constant 0 : index
    %c0_59 = arith.constant 0 : index
    %55 = vector.load %arg9[%c0_57, %c0_58, %c0_59] : memref<5x224x128xf32, #tpu.memory_space<vmem>>, vector<1x224x128xf32>
    %56 = vector.shape_cast %55 : vector<1x224x128xf32> to vector<224x128xf32>
    %cst_60 = arith.constant dense<0.000000e+00> : vector<2x128xf32>
    %57 = tpu.matmul %54, %56, %cst_60 {dimension_numbers = #tpu.dot_dimension_numbers<[1], [0], [0], [1], [0, 0, 1, 1], [], []>} : vector<2x224xf32>, vector<224x128xf32>, vector<2x128xf32> -> vector<2x128xf32>
    %c1_61 = arith.constant 1 : index
    %c0_62 = arith.constant 0 : index
    %c0_63 = arith.constant 0 : index
    %58 = vector.load %arg8[%c1_61, %c0_62, %c0_63] : memref<5x2x7xf32, #tpu.memory_space<vmem>>, vector<1x2x7xf32>
    %59 = vector.shape_cast %58 : vector<1x2x7xf32> to vector<2x7xf32>
    %cst_64 = arith.constant dense<0.000000e+00> : vector<2x224xf32>
    %60 = tpu.matmul %59, %51, %cst_64 {dimension_numbers = #tpu.dot_dimension_numbers<[1], [0], [0], [1], [0, 0, 1, 1], [], []>} : vector<2x7xf32>, vector<7x224xf32>, vector<2x224xf32> -> vector<2x224xf32>
    %c1_65 = arith.constant 1 : index
    %c0_66 = arith.constant 0 : index
    %c0_67 = arith.constant 0 : index
    %61 = vector.load %arg9[%c1_65, %c0_66, %c0_67] : memref<5x224x128xf32, #tpu.memory_space<vmem>>, vector<1x224x128xf32>
    %62 = vector.shape_cast %61 : vector<1x224x128xf32> to vector<224x128xf32>
    %cst_68 = arith.constant dense<0.000000e+00> : vector<2x128xf32>
    %63 = tpu.matmul %60, %62, %cst_68 {dimension_numbers = #tpu.dot_dimension_numbers<[1], [0], [0], [1], [0, 0, 1, 1], [], []>} : vector<2x224xf32>, vector<224x128xf32>, vector<2x128xf32> -> vector<2x128xf32>
    %64 = arith.addf %57, %63 : vector<2x128xf32>
    %c2_69 = arith.constant 2 : index
    %c0_70 = arith.constant 0 : index
    %c0_71 = arith.constant 0 : index
    %65 = vector.load %arg8[%c2_69, %c0_70, %c0_71] : memref<5x2x7xf32, #tpu.memory_space<vmem>>, vector<1x2x7xf32>
    %66 = vector.shape_cast %65 : vector<1x2x7xf32> to vector<2x7xf32>
    %cst_72 = arith.constant dense<0.000000e+00> : vector<2x224xf32>
    %67 = tpu.matmul %66, %51, %cst_72 {dimension_numbers = #tpu.dot_dimension_numbers<[1], [0], [0], [1], [0, 0, 1, 1], [], []>} : vector<2x7xf32>, vector<7x224xf32>, vector<2x224xf32> -> vector<2x224xf32>
    %c2_73 = arith.constant 2 : index
    %c0_74 = arith.constant 0 : index
    %c0_75 = arith.constant 0 : index
    %68 = vector.load %arg9[%c2_73, %c0_74, %c0_75] : memref<5x224x128xf32, #tpu.memory_space<vmem>>, vector<1x224x128xf32>
    %69 = vector.shape_cast %68 : vector<1x224x128xf32> to vector<224x128xf32>
    %cst_76 = arith.constant dense<0.000000e+00> : vector<2x128xf32>
    %70 = tpu.matmul %67, %69, %cst_76 {dimension_numbers = #tpu.dot_dimension_numbers<[1], [0], [0], [1], [0, 0, 1, 1], [], []>} : vector<2x224xf32>, vector<224x128xf32>, vector<2x128xf32> -> vector<2x128xf32>
    %71 = arith.addf %64, %70 : vector<2x128xf32>
    %c3 = arith.constant 3 : index
    %c0_77 = arith.constant 0 : index
    %c0_78 = arith.constant 0 : index
    %72 = vector.load %arg8[%c3, %c0_77, %c0_78] : memref<5x2x7xf32, #tpu.memory_space<vmem>>, vector<1x2x7xf32>
    %73 = vector.shape_cast %72 : vector<1x2x7xf32> to vector<2x7xf32>
    %cst_79 = arith.constant dense<0.000000e+00> : vector<2x224xf32>
    %74 = tpu.matmul %73, %51, %cst_79 {dimension_numbers = #tpu.dot_dimension_numbers<[1], [0], [0], [1], [0, 0, 1, 1], [], []>} : vector<2x7xf32>, vector<7x224xf32>, vector<2x224xf32> -> vector<2x224xf32>
    %c3_80 = arith.constant 3 : index
    %c0_81 = arith.constant 0 : index
    %c0_82 = arith.constant 0 : index
    %75 = vector.load %arg9[%c3_80, %c0_81, %c0_82] : memref<5x224x128xf32, #tpu.memory_space<vmem>>, vector<1x224x128xf32>
    %76 = vector.shape_cast %75 : vector<1x224x128xf32> to vector<224x128xf32>
    %cst_83 = arith.constant dense<0.000000e+00> : vector<2x128xf32>
    %77 = tpu.matmul %74, %76, %cst_83 {dimension_numbers = #tpu.dot_dimension_numbers<[1], [0], [0], [1], [0, 0, 1, 1], [], []>} : vector<2x224xf32>, vector<224x128xf32>, vector<2x128xf32> -> vector<2x128xf32>
    %78 = arith.addf %71, %77 : vector<2x128xf32>
    %c4 = arith.constant 4 : index
    %c0_84 = arith.constant 0 : index
    %c0_85 = arith.constant 0 : index
    %79 = vector.load %arg8[%c4, %c0_84, %c0_85] : memref<5x2x7xf32, #tpu.memory_space<vmem>>, vector<1x2x7xf32>
    %80 = vector.shape_cast %79 : vector<1x2x7xf32> to vector<2x7xf32>
    %cst_86 = arith.constant dense<0.000000e+00> : vector<2x224xf32>
    %81 = tpu.matmul %80, %51, %cst_86 {dimension_numbers = #tpu.dot_dimension_numbers<[1], [0], [0], [1], [0, 0, 1, 1], [], []>} : vector<2x7xf32>, vector<7x224xf32>, vector<2x224xf32> -> vector<2x224xf32>
    %c4_87 = arith.constant 4 : index
    %c0_88 = arith.constant 0 : index
    %c0_89 = arith.constant 0 : index
    %82 = vector.load %arg9[%c4_87, %c0_88, %c0_89] : memref<5x224x128xf32, #tpu.memory_space<vmem>>, vector<1x224x128xf32>
    %83 = vector.shape_cast %82 : vector<1x224x128xf32> to vector<224x128xf32>
    %cst_90 = arith.constant dense<0.000000e+00> : vector<2x128xf32>
    %84 = tpu.matmul %81, %83, %cst_90 {dimension_numbers = #tpu.dot_dimension_numbers<[1], [0], [0], [1], [0, 0, 1, 1], [], []>} : vector<2x224xf32>, vector<224x128xf32>, vector<2x128xf32> -> vector<2x128xf32>
    %85 = arith.addf %78, %84 : vector<2x128xf32>
    %c0_91 = arith.constant 0 : index
    %c0_92 = arith.constant 0 : index
    %86 = vector.load %arg10[%c0_91, %c0_92] : memref<1x128xf32, #tpu.memory_space<vmem>>, vector<1x128xf32>
    %87 = vector.broadcast %86 : vector<1x128xf32> to vector<2x128xf32>
    %88 = arith.addf %85, %87 : vector<2x128xf32>
    %cst_93 = arith.constant 0.000000e+00 : f32
    %89 = vector.broadcast %cst_93 : f32 to vector<2x128xf32>
    %90 = arith.maximumf %88, %89 : vector<2x128xf32>
    %c0_94 = arith.constant 0 : index
    %c0_95 = arith.constant 0 : index
    %c0_96 = arith.constant 0 : index
    %91 = vector.load %arg12[%c0_94, %c0_95, %c0_96] : memref<5x128x224xf32, #tpu.memory_space<vmem>>, vector<1x128x224xf32>
    %92 = vector.shape_cast %91 : vector<1x128x224xf32> to vector<128x224xf32>
    %cst_97 = arith.constant dense<0.000000e+00> : vector<2x224xf32>
    %93 = tpu.matmul %90, %92, %cst_97 {dimension_numbers = #tpu.dot_dimension_numbers<[1], [0], [0], [1], [0, 0, 1, 1], [], []>} : vector<2x128xf32>, vector<128x224xf32>, vector<2x224xf32> -> vector<2x224xf32>
    %c0_98 = arith.constant 0 : index
    %c0_99 = arith.constant 0 : index
    %c0_100 = arith.constant 0 : index
    %94 = vector.load %arg11[%c0_98, %c0_99, %c0_100] : memref<5x7x2xf32, #tpu.memory_space<vmem>>, vector<1x7x2xf32>
    %95 = vector.shape_cast %94 : vector<1x7x2xf32> to vector<7x2xf32>
    %cst_101 = arith.constant dense<0.000000e+00> : vector<7x224xf32>
    %96 = tpu.matmul %95, %93, %cst_101 {dimension_numbers = #tpu.dot_dimension_numbers<[1], [0], [0], [1], [0, 0, 1, 1], [], []>} : vector<7x2xf32>, vector<2x224xf32>, vector<7x224xf32> -> vector<7x224xf32>
    %c1_102 = arith.constant 1 : index
    %c0_103 = arith.constant 0 : index
    %c0_104 = arith.constant 0 : index
    %97 = vector.load %arg12[%c1_102, %c0_103, %c0_104] : memref<5x128x224xf32, #tpu.memory_space<vmem>>, vector<1x128x224xf32>
    %98 = vector.shape_cast %97 : vector<1x128x224xf32> to vector<128x224xf32>
    %cst_105 = arith.constant dense<0.000000e+00> : vector<2x224xf32>
    %99 = tpu.matmul %90, %98, %cst_105 {dimension_numbers = #tpu.dot_dimension_numbers<[1], [0], [0], [1], [0, 0, 1, 1], [], []>} : vector<2x128xf32>, vector<128x224xf32>, vector<2x224xf32> -> vector<2x224xf32>
    %c1_106 = arith.constant 1 : index
    %c0_107 = arith.constant 0 : index
    %c0_108 = arith.constant 0 : index
    %100 = vector.load %arg11[%c1_106, %c0_107, %c0_108] : memref<5x7x2xf32, #tpu.memory_space<vmem>>, vector<1x7x2xf32>
    %101 = vector.shape_cast %100 : vector<1x7x2xf32> to vector<7x2xf32>
    %cst_109 = arith.constant dense<0.000000e+00> : vector<7x224xf32>
    %102 = tpu.matmul %101, %99, %cst_109 {dimension_numbers = #tpu.dot_dimension_numbers<[1], [0], [0], [1], [0, 0, 1, 1], [], []>} : vector<7x2xf32>, vector<2x224xf32>, vector<7x224xf32> -> vector<7x224xf32>
    %103 = arith.addf %96, %102 : vector<7x224xf32>
    %c2_110 = arith.constant 2 : index
    %c0_111 = arith.constant 0 : index
    %c0_112 = arith.constant 0 : index
    %104 = vector.load %arg12[%c2_110, %c0_111, %c0_112] : memref<5x128x224xf32, #tpu.memory_space<vmem>>, vector<1x128x224xf32>
    %105 = vector.shape_cast %104 : vector<1x128x224xf32> to vector<128x224xf32>
    %cst_113 = arith.constant dense<0.000000e+00> : vector<2x224xf32>
    %106 = tpu.matmul %90, %105, %cst_113 {dimension_numbers = #tpu.dot_dimension_numbers<[1], [0], [0], [1], [0, 0, 1, 1], [], []>} : vector<2x128xf32>, vector<128x224xf32>, vector<2x224xf32> -> vector<2x224xf32>
    %c2_114 = arith.constant 2 : index
    %c0_115 = arith.constant 0 : index
    %c0_116 = arith.constant 0 : index
    %107 = vector.load %arg11[%c2_114, %c0_115, %c0_116] : memref<5x7x2xf32, #tpu.memory_space<vmem>>, vector<1x7x2xf32>
    %108 = vector.shape_cast %107 : vector<1x7x2xf32> to vector<7x2xf32>
    %cst_117 = arith.constant dense<0.000000e+00> : vector<7x224xf32>
    %109 = tpu.matmul %108, %106, %cst_117 {dimension_numbers = #tpu.dot_dimension_numbers<[1], [0], [0], [1], [0, 0, 1, 1], [], []>} : vector<7x2xf32>, vector<2x224xf32>, vector<7x224xf32> -> vector<7x224xf32>
    %110 = arith.addf %103, %109 : vector<7x224xf32>
    %c3_118 = arith.constant 3 : index
    %c0_119 = arith.constant 0 : index
    %c0_120 = arith.constant 0 : index
    %111 = vector.load %arg12[%c3_118, %c0_119, %c0_120] : memref<5x128x224xf32, #tpu.memory_space<vmem>>, vector<1x128x224xf32>
    %112 = vector.shape_cast %111 : vector<1x128x224xf32> to vector<128x224xf32>
    %cst_121 = arith.constant dense<0.000000e+00> : vector<2x224xf32>
    %113 = tpu.matmul %90, %112, %cst_121 {dimension_numbers = #tpu.dot_dimension_numbers<[1], [0], [0], [1], [0, 0, 1, 1], [], []>} : vector<2x128xf32>, vector<128x224xf32>, vector<2x224xf32> -> vector<2x224xf32>
    %c3_122 = arith.constant 3 : index
    %c0_123 = arith.constant 0 : index
    %c0_124 = arith.constant 0 : index
    %114 = vector.load %arg11[%c3_122, %c0_123, %c0_124] : memref<5x7x2xf32, #tpu.memory_space<vmem>>, vector<1x7x2xf32>
    %115 = vector.shape_cast %114 : vector<1x7x2xf32> to vector<7x2xf32>
    %cst_125 = arith.constant dense<0.000000e+00> : vector<7x224xf32>
    %116 = tpu.matmul %115, %113, %cst_125 {dimension_numbers = #tpu.dot_dimension_numbers<[1], [0], [0], [1], [0, 0, 1, 1], [], []>} : vector<7x2xf32>, vector<2x224xf32>, vector<7x224xf32> -> vector<7x224xf32>
    %117 = arith.addf %110, %116 : vector<7x224xf32>
    %c4_126 = arith.constant 4 : index
    %c0_127 = arith.constant 0 : index
    %c0_128 = arith.constant 0 : index
    %118 = vector.load %arg12[%c4_126, %c0_127, %c0_128] : memref<5x128x224xf32, #tpu.memory_space<vmem>>, vector<1x128x224xf32>
    %119 = vector.shape_cast %118 : vector<1x128x224xf32> to vector<128x224xf32>
    %cst_129 = arith.constant dense<0.000000e+00> : vector<2x224xf32>
    %120 = tpu.matmul %90, %119, %cst_129 {dimension_numbers = #tpu.dot_dimension_numbers<[1], [0], [0], [1], [0, 0, 1, 1], [], []>} : vector<2x128xf32>, vector<128x224xf32>, vector<2x224xf32> -> vector<2x224xf32>
    %c4_130 = arith.constant 4 : index
    %c0_131 = arith.constant 0 : index
    %c0_132 = arith.constant 0 : index
    %121 = vector.load %arg11[%c4_130, %c0_131, %c0_132] : memref<5x7x2xf32, #tpu.memory_space<vmem>>, vector<1x7x2xf32>
    %122 = vector.shape_cast %121 : vector<1x7x2xf32> to vector<7x2xf32>
    %cst_133 = arith.constant dense<0.000000e+00> : vector<7x224xf32>
    %123 = tpu.matmul %122, %120, %cst_133 {dimension_numbers = #tpu.dot_dimension_numbers<[1], [0], [0], [1], [0, 0, 1, 1], [], []>} : vector<7x2xf32>, vector<2x224xf32>, vector<7x224xf32> -> vector<7x224xf32>
    %124 = arith.addf %117, %123 : vector<7x224xf32>
    %c0_134 = arith.constant 0 : index
    %c0_135 = arith.constant 0 : index
    %125 = vector.load %arg13[%c0_134, %c0_135] : memref<1x224xf32, #tpu.memory_space<vmem>>, vector<1x224xf32>
    %126 = vector.broadcast %125 : vector<1x224xf32> to vector<7x224xf32>
    %127 = arith.addf %124, %126 : vector<7x224xf32>
    %cst_136 = arith.constant 0.000000e+00 : f32
    %128 = vector.broadcast %cst_136 : f32 to vector<7x224xf32>
    %129 = arith.maximumf %127, %128 : vector<7x224xf32>
    %c0_137 = arith.constant 0 : index
    %c0_138 = arith.constant 0 : index
    %c0_139 = arith.constant 0 : index
    %130 = vector.load %arg15[%c0_137, %c0_138, %c0_139] : memref<3x224x224xf32, #tpu.memory_space<vmem>>, vector<1x224x224xf32>
    %131 = vector.shape_cast %130 : vector<1x224x224xf32> to vector<224x224xf32>
    %cst_140 = arith.constant dense<0.000000e+00> : vector<7x224xf32>
    %132 = tpu.matmul %129, %131, %cst_140 {dimension_numbers = #tpu.dot_dimension_numbers<[1], [0], [0], [1], [0, 0, 1, 1], [], []>} : vector<7x224xf32>, vector<224x224xf32>, vector<7x224xf32> -> vector<7x224xf32>
    %c0_141 = arith.constant 0 : index
    %c0_142 = arith.constant 0 : index
    %c0_143 = arith.constant 0 : index
    %133 = vector.load %arg14[%c0_141, %c0_142, %c0_143] : memref<3x14x7xf32, #tpu.memory_space<vmem>>, vector<1x14x7xf32>
    %134 = vector.shape_cast %133 : vector<1x14x7xf32> to vector<14x7xf32>
    %cst_144 = arith.constant dense<0.000000e+00> : vector<14x224xf32>
    %135 = tpu.matmul %134, %132, %cst_144 {dimension_numbers = #tpu.dot_dimension_numbers<[1], [0], [0], [1], [0, 0, 1, 1], [], []>} : vector<14x7xf32>, vector<7x224xf32>, vector<14x224xf32> -> vector<14x224xf32>
    %c1_145 = arith.constant 1 : index
    %c0_146 = arith.constant 0 : index
    %c0_147 = arith.constant 0 : index
    %136 = vector.load %arg15[%c1_145, %c0_146, %c0_147] : memref<3x224x224xf32, #tpu.memory_space<vmem>>, vector<1x224x224xf32>
    %137 = vector.shape_cast %136 : vector<1x224x224xf32> to vector<224x224xf32>
    %cst_148 = arith.constant dense<0.000000e+00> : vector<7x224xf32>
    %138 = tpu.matmul %129, %137, %cst_148 {dimension_numbers = #tpu.dot_dimension_numbers<[1], [0], [0], [1], [0, 0, 1, 1], [], []>} : vector<7x224xf32>, vector<224x224xf32>, vector<7x224xf32> -> vector<7x224xf32>
    %c1_149 = arith.constant 1 : index
    %c0_150 = arith.constant 0 : index
    %c0_151 = arith.constant 0 : index
    %139 = vector.load %arg14[%c1_149, %c0_150, %c0_151] : memref<3x14x7xf32, #tpu.memory_space<vmem>>, vector<1x14x7xf32>
    %140 = vector.shape_cast %139 : vector<1x14x7xf32> to vector<14x7xf32>
    %cst_152 = arith.constant dense<0.000000e+00> : vector<14x224xf32>
    %141 = tpu.matmul %140, %138, %cst_152 {dimension_numbers = #tpu.dot_dimension_numbers<[1], [0], [0], [1], [0, 0, 1, 1], [], []>} : vector<14x7xf32>, vector<7x224xf32>, vector<14x224xf32> -> vector<14x224xf32>
    %142 = arith.addf %135, %141 : vector<14x224xf32>
    %c2_153 = arith.constant 2 : index
    %c0_154 = arith.constant 0 : index
    %c0_155 = arith.constant 0 : index
    %143 = vector.load %arg15[%c2_153, %c0_154, %c0_155] : memref<3x224x224xf32, #tpu.memory_space<vmem>>, vector<1x224x224xf32>
    %144 = vector.shape_cast %143 : vector<1x224x224xf32> to vector<224x224xf32>
    %cst_156 = arith.constant dense<0.000000e+00> : vector<7x224xf32>
    %145 = tpu.matmul %129, %144, %cst_156 {dimension_numbers = #tpu.dot_dimension_numbers<[1], [0], [0], [1], [0, 0, 1, 1], [], []>} : vector<7x224xf32>, vector<224x224xf32>, vector<7x224xf32> -> vector<7x224xf32>
    %c2_157 = arith.constant 2 : index
    %c0_158 = arith.constant 0 : index
    %c0_159 = arith.constant 0 : index
    %146 = vector.load %arg14[%c2_157, %c0_158, %c0_159] : memref<3x14x7xf32, #tpu.memory_space<vmem>>, vector<1x14x7xf32>
    %147 = vector.shape_cast %146 : vector<1x14x7xf32> to vector<14x7xf32>
    %cst_160 = arith.constant dense<0.000000e+00> : vector<14x224xf32>
    %148 = tpu.matmul %147, %145, %cst_160 {dimension_numbers = #tpu.dot_dimension_numbers<[1], [0], [0], [1], [0, 0, 1, 1], [], []>} : vector<14x7xf32>, vector<7x224xf32>, vector<14x224xf32> -> vector<14x224xf32>
    %149 = arith.addf %142, %148 : vector<14x224xf32>
    %c0_161 = arith.constant 0 : index
    %c0_162 = arith.constant 0 : index
    %150 = vector.load %arg16[%c0_161, %c0_162] : memref<1x224xf32, #tpu.memory_space<vmem>>, vector<1x224xf32>
    %151 = vector.broadcast %150 : vector<1x224xf32> to vector<14x224xf32>
    %152 = arith.addf %149, %151 : vector<14x224xf32>
    %cst_163 = arith.constant 0.000000e+00 : f32
    %153 = vector.broadcast %cst_163 : f32 to vector<14x224xf32>
    %154 = arith.maximumf %152, %153 : vector<14x224xf32>
    %c0_164 = arith.constant 0 : index
    %c0_165 = arith.constant 0 : index
    %c0_166 = arith.constant 0 : index
    %155 = vector.load %arg18[%c0_164, %c0_165, %c0_166] : memref<3x224x28xf32, #tpu.memory_space<vmem>>, vector<1x224x28xf32>
    %156 = vector.shape_cast %155 : vector<1x224x28xf32> to vector<224x28xf32>
    %cst_167 = arith.constant dense<0.000000e+00> : vector<14x28xf32>
    %157 = tpu.matmul %154, %156, %cst_167 {dimension_numbers = #tpu.dot_dimension_numbers<[1], [0], [0], [1], [0, 0, 1, 1], [], []>} : vector<14x224xf32>, vector<224x28xf32>, vector<14x28xf32> -> vector<14x28xf32>
    %c0_168 = arith.constant 0 : index
    %c0_169 = arith.constant 0 : index
    %c0_170 = arith.constant 0 : index
    %158 = vector.load %arg17[%c0_168, %c0_169, %c0_170] : memref<3x28x14xf32, #tpu.memory_space<vmem>>, vector<1x28x14xf32>
    %159 = vector.shape_cast %158 : vector<1x28x14xf32> to vector<28x14xf32>
    %cst_171 = arith.constant dense<0.000000e+00> : vector<28x28xf32>
    %160 = tpu.matmul %159, %157, %cst_171 {dimension_numbers = #tpu.dot_dimension_numbers<[1], [0], [0], [1], [0, 0, 1, 1], [], []>} : vector<28x14xf32>, vector<14x28xf32>, vector<28x28xf32> -> vector<28x28xf32>
    %c1_172 = arith.constant 1 : index
    %c0_173 = arith.constant 0 : index
    %c0_174 = arith.constant 0 : index
    %161 = vector.load %arg18[%c1_172, %c0_173, %c0_174] : memref<3x224x28xf32, #tpu.memory_space<vmem>>, vector<1x224x28xf32>
    %162 = vector.shape_cast %161 : vector<1x224x28xf32> to vector<224x28xf32>
    %cst_175 = arith.constant dense<0.000000e+00> : vector<14x28xf32>
    %163 = tpu.matmul %154, %162, %cst_175 {dimension_numbers = #tpu.dot_dimension_numbers<[1], [0], [0], [1], [0, 0, 1, 1], [], []>} : vector<14x224xf32>, vector<224x28xf32>, vector<14x28xf32> -> vector<14x28xf32>
    %c1_176 = arith.constant 1 : index
    %c0_177 = arith.constant 0 : index
    %c0_178 = arith.constant 0 : index
    %164 = vector.load %arg17[%c1_176, %c0_177, %c0_178] : memref<3x28x14xf32, #tpu.memory_space<vmem>>, vector<1x28x14xf32>
    %165 = vector.shape_cast %164 : vector<1x28x14xf32> to vector<28x14xf32>
    %cst_179 = arith.constant dense<0.000000e+00> : vector<28x28xf32>
    %166 = tpu.matmul %165, %163, %cst_179 {dimension_numbers = #tpu.dot_dimension_numbers<[1], [0], [0], [1], [0, 0, 1, 1], [], []>} : vector<28x14xf32>, vector<14x28xf32>, vector<28x28xf32> -> vector<28x28xf32>
    %167 = arith.addf %160, %166 : vector<28x28xf32>
    %c2_180 = arith.constant 2 : index
    %c0_181 = arith.constant 0 : index
    %c0_182 = arith.constant 0 : index
    %168 = vector.load %arg18[%c2_180, %c0_181, %c0_182] : memref<3x224x28xf32, #tpu.memory_space<vmem>>, vector<1x224x28xf32>
    %169 = vector.shape_cast %168 : vector<1x224x28xf32> to vector<224x28xf32>
    %cst_183 = arith.constant dense<0.000000e+00> : vector<14x28xf32>
    %170 = tpu.matmul %154, %169, %cst_183 {dimension_numbers = #tpu.dot_dimension_numbers<[1], [0], [0], [1], [0, 0, 1, 1], [], []>} : vector<14x224xf32>, vector<224x28xf32>, vector<14x28xf32> -> vector<14x28xf32>
    %c2_184 = arith.constant 2 : index
    %c0_185 = arith.constant 0 : index
    %c0_186 = arith.constant 0 : index
    %171 = vector.load %arg17[%c2_184, %c0_185, %c0_186] : memref<3x28x14xf32, #tpu.memory_space<vmem>>, vector<1x28x14xf32>
    %172 = vector.shape_cast %171 : vector<1x28x14xf32> to vector<28x14xf32>
    %cst_187 = arith.constant dense<0.000000e+00> : vector<28x28xf32>
    %173 = tpu.matmul %172, %170, %cst_187 {dimension_numbers = #tpu.dot_dimension_numbers<[1], [0], [0], [1], [0, 0, 1, 1], [], []>} : vector<28x14xf32>, vector<14x28xf32>, vector<28x28xf32> -> vector<28x28xf32>
    %174 = arith.addf %167, %173 : vector<28x28xf32>
    %c0_188 = arith.constant 0 : index
    %c0_189 = arith.constant 0 : index
    %175 = vector.load %arg19[%c0_188, %c0_189] : memref<1x28xf32, #tpu.memory_space<vmem>>, vector<1x28xf32>
    %176 = vector.broadcast %175 : vector<1x28xf32> to vector<28x28xf32>
    %177 = arith.addf %174, %176 : vector<28x28xf32>
    %cst_190 = arith.constant 0.000000e+00 : f32
    %178 = vector.broadcast %cst_190 : f32 to vector<28x28xf32>
    %179 = arith.maximumf %177, %178 : vector<28x28xf32>
    %c0_191 = arith.constant 0 : index
    %c0_192 = arith.constant 0 : index
    %c0_193 = arith.constant 0 : index
    %180 = vector.load %arg20[%c0_191, %c0_192, %c0_193] : memref<1x28x28xf32, #tpu.memory_space<vmem>>, vector<1x28x28xf32>
    %181 = vector.shape_cast %180 : vector<1x28x28xf32> to vector<28x28xf32>
    %182 = vector.shape_cast %179 : vector<28x28xf32> to vector<1x28x28xf32>
    tpu.vector_store %arg20[%c0_191, %c0_192, %c0_193], %182 {strides = array<i32>} : memref<1x28x28xf32, #tpu.memory_space<vmem>>, vector<1x28x28xf32>,
    return
  }
  func.func @transform_0(%arg0: i32) -> (i32, i32, i32) {
    %c0_i32 = arith.constant 0 : i32
    %c0_i32_0 = arith.constant 0 : i32
    %c0_i32_1 = arith.constant 0 : i32
    return %arg0, %c0_i32, %c0_i32_0 : i32, i32, i32
  }
  func.func @transform_1(%arg0: i32) -> (i32, i32, i32) {
    %c0_i32 = arith.constant 0 : i32
    %c0_i32_0 = arith.constant 0 : i32
    %c0_i32_1 = arith.constant 0 : i32
    %c0_i32_2 = arith.constant 0 : i32
    return %c0_i32, %c0_i32_0, %c0_i32_1 : i32, i32, i32
  }
  func.func @transform_2(%arg0: i32) -> (i32, i32, i32) {
    %c0_i32 = arith.constant 0 : i32
    %c0_i32_0 = arith.constant 0 : i32
    %c0_i32_1 = arith.constant 0 : i32
    %c0_i32_2 = arith.constant 0 : i32
    return %c0_i32, %c0_i32_0, %c0_i32_1 : i32, i32, i32
  }
  func.func @transform_3(%arg0: i32) -> (i32, i32) {
    %c0_i32 = arith.constant 0 : i32
    %c0_i32_0 = arith.constant 0 : i32
    %c0_i32_1 = arith.constant 0 : i32
    return %c0_i32, %c0_i32_0 : i32, i32
  }
  func.func @transform_4(%arg0: i32) -> (i32, i32, i32) {
    %c0_i32 = arith.constant 0 : i32
    %c0_i32_0 = arith.constant 0 : i32
    %c0_i32_1 = arith.constant 0 : i32
    %c0_i32_2 = arith.constant 0 : i32
    return %c0_i32, %c0_i32_0, %c0_i32_1 : i32, i32, i32
  }
  func.func @transform_5(%arg0: i32) -> (i32, i32, i32) {
    %c0_i32 = arith.constant 0 : i32
    %c0_i32_0 = arith.constant 0 : i32
    %c0_i32_1 = arith.constant 0 : i32
    %c0_i32_2 = arith.constant 0 : i32
    return %c0_i32, %c0_i32_0, %c0_i32_1 : i32, i32, i32
  }
  func.func @transform_6(%arg0: i32) -> (i32, i32) {
    %c0_i32 = arith.constant 0 : i32
    %c0_i32_0 = arith.constant 0 : i32
    %c0_i32_1 = arith.constant 0 : i32
    return %c0_i32, %c0_i32_0 : i32, i32
  }
  func.func @transform_7(%arg0: i32) -> (i32, i32, i32) {
    %c0_i32 = arith.constant 0 : i32
    %c0_i32_0 = arith.constant 0 : i32
    %c0_i32_1 = arith.constant 0 : i32
    %c0_i32_2 = arith.constant 0 : i32
    return %c0_i32, %c0_i32_0, %c0_i32_1 : i32, i32, i32
  }
  func.func @transform_8(%arg0: i32) -> (i32, i32, i32) {
    %c0_i32 = arith.constant 0 : i32
    %c0_i32_0 = arith.constant 0 : i32
    %c0_i32_1 = arith.constant 0 : i32
    %c0_i32_2 = arith.constant 0 : i32
    return %c0_i32, %c0_i32_0, %c0_i32_1 : i32, i32, i32
  }
  func.func @transform_9(%arg0: i32) -> (i32, i32) {
    %c0_i32 = arith.constant 0 : i32
    %c0_i32_0 = arith.constant 0 : i32
    %c0_i32_1 = arith.constant 0 : i32
    return %c0_i32, %c0_i32_0 : i32, i32
  }
  func.func @transform_10(%arg0: i32) -> (i32, i32, i32) {
    %c0_i32 = arith.constant 0 : i32
    %c0_i32_0 = arith.constant 0 : i32
    %c0_i32_1 = arith.constant 0 : i32
    %c0_i32_2 = arith.constant 0 : i32
    return %c0_i32, %c0_i32_0, %c0_i32_1 : i32, i32, i32
  }
  func.func @transform_11(%arg0: i32) -> (i32, i32, i32) {
    %c0_i32 = arith.constant 0 : i32
    %c0_i32_0 = arith.constant 0 : i32
    %c0_i32_1 = arith.constant 0 : i32
    %c0_i32_2 = arith.constant 0 : i32
    return %c0_i32, %c0_i32_0, %c0_i32_1 : i32, i32, i32
  }
  func.func @transform_12(%arg0: i32) -> (i32, i32) {
    %c0_i32 = arith.constant 0 : i32
    %c0_i32_0 = arith.constant 0 : i32
    %c0_i32_1 = arith.constant 0 : i32
    return %c0_i32, %c0_i32_0 : i32, i32
  }
  func.func @transform_13(%arg0: i32) -> (i32, i32, i32) {
    %c0_i32 = arith.constant 0 : i32
    %c0_i32_0 = arith.constant 0 : i32
    %c0_i32_1 = arith.constant 0 : i32
    %c0_i32_2 = arith.constant 0 : i32
    return %c0_i32, %c0_i32_0, %c0_i32_1 : i32, i32, i32
  }
  func.func @transform_14(%arg0: i32) -> (i32, i32, i32) {
    %c0_i32 = arith.constant 0 : i32
    %c0_i32_0 = arith.constant 0 : i32
    %c0_i32_1 = arith.constant 0 : i32
    %c0_i32_2 = arith.constant 0 : i32
    return %c0_i32, %c0_i32_0, %c0_i32_1 : i32, i32, i32
  }
  func.func @transform_15(%arg0: i32) -> (i32, i32) {
    %c0_i32 = arith.constant 0 : i32
    %c0_i32_0 = arith.constant 0 : i32
    %c0_i32_1 = arith.constant 0 : i32
    return %c0_i32, %c0_i32_0 : i32, i32
  }
  func.func @transform_16(%arg0: i32) -> (i32, i32, i32) {
    %c0_i32 = arith.constant 0 : i32
    %c0_i32_0 = arith.constant 0 : i32
    %c0_i32_1 = arith.constant 0 : i32
    %c0_i32_2 = arith.constant 0 : i32
    return %c0_i32, %c0_i32_0, %c0_i32_1 : i32, i32, i32
  }
  func.func @transform_17(%arg0: i32) -> (i32, i32, i32) {
    %c0_i32 = arith.constant 0 : i32
    %c0_i32_0 = arith.constant 0 : i32
    %c0_i32_1 = arith.constant 0 : i32
    %c0_i32_2 = arith.constant 0 : i32
    return %c0_i32, %c0_i32_0, %c0_i32_1 : i32, i32, i32
  }
  func.func @transform_18(%arg0: i32) -> (i32, i32) {
    %c0_i32 = arith.constant 0 : i32
    %c0_i32_0 = arith.constant 0 : i32
    %c0_i32_1 = arith.constant 0 : i32
    return %c0_i32, %c0_i32_0 : i32, i32
  }
  func.func @transform_19(%arg0: i32) -> (i32, i32, i32) {
    %c0_i32 = arith.constant 0 : i32
    %c0_i32_0 = arith.constant 0 : i32
    %c0_i32_1 = arith.constant 0 : i32
    return %arg0, %c0_i32, %c0_i32_0 : i32, i32, i32
  }
}

</mosaic_0001>

<bundles_post_ra>
// kernel: _lambda_.1
= control target key start
LH: loop header
LB: loop body
LE: loop exit
PB: predicated region body
PF: predicated region fallthrough
CT: control target
= control target key end

     0   :  { %s8262_s0 = inlined_call_operand.vmem [shape: f32[2,28,28], index: 0, kind: input, shape index: {}]   ;;  %s8263_s1 = inlined_call_operand.hbm [shape: f32[3,14,28], index: 1, kind: input, shape index: {}]   ;;  %s8264_s2 = inlined_call_operand.vmem [shape: f32[3,28,224], index: 2, kind: input, shape index: {}]   ;;  %s8265_s3 = inlined_call_operand.hbm [shape: f32[1,224], index: 3, kind: input, shape index: {}]   ;;  %s8266_s4 = inlined_call_operand.hbm [shape: f32[3,7,14], index: 4, kind: input, shape index: {}]   ;;  %s8267_s5 = inlined_call_operand.hbm [shape: f32[3,224,224], index: 5, kind: input, shape index: {}]   ;;  %s8268_s6 = inlined_call_operand.hbm [shape: f32[1,224], index: 6, kind: input, shape index: {}]   ;;  %s8269_s7 = inlined_call_operand.hbm [shape: f32[5,2,7], index: 7, kind: input, shape index: {}]   ;;  %s8270_s8 = inlined_call_operand.hbm [shape: f32[5,224,128], index: 8, kind: input, shape index: {}]   ;;  %s8271_s9 = inlined_call_operand.hbm [shape: f32[1,128], index: 9, kind: input, shape index: {}]   ;;  %s8272_s10 = inlined_call_operand.hbm [shape: f32[5,7,2], index: 10, kind: input, shape index: {}]   ;;  %s8273_s11 = inlined_call_operand.hbm [shape: f32[5,128,224], index: 11, kind: input, shape index: {}]   ;;  %s8274_s12 = inlined_call_operand.hbm [shape: f32[1,224], index: 12, kind: input, shape index: {}]   ;;  %s8275_s13 = inlined_call_operand.hbm [shape: f32[3,14,7], index: 13, kind: input, shape index: {}]   ;;  %s8276_s14 = inlined_call_operand.hbm [shape: f32[3,224,224], index: 14, kind: input, shape index: {}]   ;;  %s8277_s15 = inlined_call_operand.vmem [shape: f32[1,224], index: 15, kind: input, shape index: {}]   ;;  %s8278_s16 = inlined_call_operand.vmem [shape: f32[3,28,14], index: 16, kind: input, shape index: {}]   ;;  %s8279_s17 = inlined_call_operand.hbm [shape: f32[3,224,28], index: 17, kind: input, shape index: {}]   ;;  %s8280_s18 = inlined_call_operand.vmem [shape: f32[1,28], index: 18, kind: input, shape index: {}]   ;;  %s8281_s19 = inlined_call_operand.vmem [shape: f32[2,28,28], index: 19, kind: output, shape index: {}]  }
   0x1   :  { %8293 = sst [smem:[#allocation33_spill]] %s8262_s0 }
   0x2   :  { %8294 = sst [smem:[#allocation34_spill]] %s8263_s1 }
   0x3   :  { %8295 = sst [smem:[#allocation35_spill]] %s8264_s2 }
   0x4   :  { %8296 = sst [smem:[#allocation36_spill]] %s8265_s3 }
   0x5   :  { %8297 = sst [smem:[#allocation37_spill]] %s8267_s5 }
   0x6   :  { %8298 = sst [smem:[#allocation38_spill]] %s8269_s7 }
   0x7   :  { %8299 = sst [smem:[#allocation39_spill]] %s8271_s9 }
   0x8   :  { %8300 = sst [smem:[#allocation40_spill]] %s8273_s11 }
   0x9   :  { %8301 = sst [smem:[#allocation41_spill]] %s8280_s18 }
   0xa   :  { %8302 = sst [smem:[#allocation42_spill]] %s8281_s19 }
   0xb   :  { %24 = vsyncpa [#allocation3], 0 }
   0xc   :  { %25 = vsyncpa [#allocation5], 0 }
   0xd   :  { %26 = vsyncpa [#allocation8], 0 }
   0xe   :  { %27 = vsyncpa [#allocation11], 0 }
   0xf   :  { %28 = vsyncpa [#allocation14], 0 }
  0x10   :  { %29 = vsyncpa [#allocation17], 0 }
  0x11   :  { %30 = vsyncpa [#allocation20], 0 }
  0x12   :  { %31 = vsyncpa [#allocation23], 0  ;;  %s7360_s0 = smov 0  }
  0x13 LB: > { %8303 = sst [smem:[#allocation32_spill]] %s7235_s0  ;;  %s7237_s30 = smov [#allocation4]   ;;  %s7235_s0 = sphi %s7360_s0, %s37_s0  }
  0x14   : > { %s501_s20 = sshll.u32 %s7237_s30, 4  ;;  %s7366_s21 = sadd.s32 4294967295, %s7235_s0   ;;  %s502_s20 = int_to_ptr.vmem [resolvable:$true] %s501_s20 }
  0x15   : > { %p5415_p0 = scmp.ge.s32.totalorder %s7235_s0, 1  ;;  %p472_p1 = scmp.lt.s32.totalorder %s7235_s0, 3 }
  0x16   : > { %p8286_p2 = scmp.eq.s32.totalorder %s7366_s21, 0  ;;  %s7238_s22 = smov [#allocation7]  }
  0x17   : > { %p7371_p3 = pnand %p5415_p0, %p472_p1  ;;  %s524_s2 = sshll.u32 %s7238_s22, 4  ;;  %s7377_s2 = int_to_ptr.vmem [resolvable:$true] %s524_s2 }
  0x18   : > { %s7239_s24 = smov [#allocation10]   ;;  %s8306_s27 = sld [smem:[#allocation36_spill]] }
  0x19   : > { %s8304_s1 = scalar_select %p7371_p3, 1, 0 }
  0x1a   : > { %p6703_p4 = pneg %p7371_p3  ;;  %s548_s25 = sshll.u32 %s7239_s24, 4  ;;  %s7385_s25 = int_to_ptr.vmem [resolvable:$true] %s548_s25 }
  0x1c   : > { %p7381_p5 = pnand %p8286_p2, %p6703_p4 }
  0x1e   : > { %s6805_s28 = scalar_lea.hbm %s8306_s27, 32  ;;  %p7395_p7 = pneg %p7381_p5 }
  0x1f   : > { %p6806_p6 = scmp.ne.s32.totalorder %s8306_s27, %s6805_s28  ;;  %p6812_p10 = scmp.lt.u32.totalorder %s6805_s28, %s8306_s27 }
  0x21   : > { %p6808_p8 = pnand %p7395_p7, %p6806_p6 }
  0x23   : > { %p6809_p9 = pneg %p6808_p8 }
  0x25   : > { %p6814_p11 = pnand %p6812_p10, %p6809_p9 }
  0x27   : > { %6817 = shalt.err (!%p6814_p11)
}
  0x28   : > { %s6818_s3 = scalar_lea.vmem %s502_s20, 32  ;;  %p6826_p1 = scmp.lt.s32.totalorder %s502_s20, %s502_s20 }
  0x29   : > { %p6819_p12 = scmp.ne.s32.totalorder %s502_s20, %s6818_s3  ;;  %p6827_p4 = scmp.lt.s32.totalorder %s6818_s3, %s6818_s3 }
  0x2b   : > { %p6821_p13 = pnand %p6819_p12, %p7395_p7  ;;  %p6828_p2 = por %p6827_p4, %p6826_p1 }
  0x2d   : > { %p6822_p0 = pneg %p6821_p13 }
  0x2f   : > { %p6829_p3 = pnand %p6828_p2, %p6822_p0 }
  0x31   : > { %6832 = shalt.err (!%p6829_p3)
}
  0x32   : > { %6709 = dma.hbm_to_vmem [thread:$0]  (!%p7381_p5), %s8306_s27, 32, %s502_s20, [#allocation5]  }
  0x33   : > { %s8308_s5 = sld [smem:[#allocation37_spill]] }
  0x39   : > { %s6833_s30 = scalar_lea.hbm %s8308_s5, 21504 }
  0x3a   : > { %p6834_p6 = scmp.ne.s32.totalorder %s8308_s5, %s6833_s30  ;;  %p6840_p2 = scmp.lt.u32.totalorder %s6833_s30, %s8308_s5 }
  0x3c   : > { %p6836_p8 = pnand %p6834_p6, %p7395_p7 }
  0x3e   : > { %p6837_p9 = pneg %p6836_p8 }
  0x40   : > { %p6842_p3 = pnand %p6840_p2, %p6837_p9 }
  0x42   : > { %6845 = shalt.err (!%p6842_p3)
}
  0x43   : > { %s6846_s20 = scalar_lea.vmem %s7377_s2, 21504  ;;  %p6854_p13 = scmp.lt.s32.totalorder %s7377_s2, %s7377_s2 }
  0x44   : > { %p6847_p10 = scmp.ne.s32.totalorder %s7377_s2, %s6846_s20  ;;  %p6855_p0 = scmp.lt.s32.totalorder %s6846_s20, %s6846_s20 }
  0x46   : > { %p6849_p11 = pnand %p6847_p10, %p7395_p7  ;;  %p6856_p1 = por %p6855_p0, %p6854_p13 }
  0x48   : > { %p6850_p12 = pneg %p6849_p11 }
  0x4a   : > { %p6857_p4 = pnand %p6856_p1, %p6850_p12 }
  0x4c   : > { %6860 = shalt.err (!%p6857_p4)
}
  0x4d   : > { %s8289_s19 = smov 256   ;;  %s8291_s18 = smov 16  }
  0x4e   : > { %6715 = dma.hbm_to_vmem [thread:$0]  (!%p7381_p5), %s8308_s5, 21504, %s7377_s2, [#allocation8], %s8289_s19, %s8289_s19, %s8291_s18  }
  0x4f   : > { %s8309_s7 = sld [smem:[#allocation38_spill]] }
  0x55   : > { %s6861_s30 = scalar_lea.hbm %s8309_s7, 160 }
  0x56   : > { %p6862_p6 = scmp.ne.s32.totalorder %s8309_s7, %s6861_s30  ;;  %p6868_p2 = scmp.lt.u32.totalorder %s6861_s30, %s8309_s7 }
  0x58   : > { %p6864_p8 = pnand %p6862_p6, %p7395_p7 }
  0x5a   : > { %p6865_p9 = pneg %p6864_p8 }
  0x5c   : > { %p6870_p3 = pnand %p6868_p2, %p6865_p9 }
  0x5e   : > { %6873 = shalt.err (!%p6870_p3)
}
  0x5f   : > { %s6874_s2 = scalar_lea.vmem %s7385_s25, 160  ;;  %p6882_p13 = scmp.lt.s32.totalorder %s7385_s25, %s7385_s25 }
  0x60   : > { %p6875_p10 = scmp.ne.s32.totalorder %s7385_s25, %s6874_s2  ;;  %p6883_p0 = scmp.lt.s32.totalorder %s6874_s2, %s6874_s2 }
  0x62   : > { %p6877_p11 = pnand %p6875_p10, %p7395_p7  ;;  %p6884_p1 = por %p6883_p0, %p6882_p13 }
  0x64   : > { %p6878_p12 = pneg %p6877_p11 }
  0x66   : > { %p6885_p4 = pnand %p6884_p1, %p6878_p12 }
  0x68   : > { %6888 = shalt.err (!%p6885_p4)
}
  0x69   : > { %s7242_s26 = smov 32   ;;  %s7243_s27 = smov 2  }
  0x6a   : > { %6721 = dma.hbm_to_vmem [thread:$0]  (!%p7381_p5), %s8309_s7, 160, %s7385_s25, [#allocation11], %s7242_s26, %s7242_s26, %s7243_s27  }
  0x6b   : > { %s7244_s28 = smov [#allocation13]   ;;  %s7245_s24 = smov [#allocation16]  }
  0x6c   : > { %s575_s30 = sshll.u32 %s7244_s28, 4  ;;  %s598_s3 = sshll.u32 %s7245_s24, 4  ;;  %s576_s30 = int_to_ptr.vmem [resolvable:$true] %s575_s30  ;;  %s7460_s3 = int_to_ptr.vmem [resolvable:$true] %s598_s3 }
  0x6d   : > { %s8310_s9 = sld [smem:[#allocation39_spill]] }
  0x73   : > { %s6889_s19 = scalar_lea.hbm %s8310_s9, 16 }
  0x74   : > { %p6890_p6 = scmp.ne.s32.totalorder %s8310_s9, %s6889_s19  ;;  %p6896_p2 = scmp.lt.u32.totalorder %s6889_s19, %s8310_s9 }
  0x76   : > { %p6892_p8 = pnand %p6890_p6, %p7395_p7 }
  0x78   : > { %p6893_p9 = pneg %p6892_p8 }
  0x7a   : > { %p6898_p3 = pnand %p6896_p2, %p6893_p9 }
  0x7c   : > { %6901 = shalt.err (!%p6898_p3)
}
  0x7d   : > { %s6902_s26 = scalar_lea.vmem %s576_s30, 16  ;;  %s6909_s27 = scalar_lea.vmem %s576_s30, 32 }
  0x7e   : > { %p6903_p10 = scmp.ne.s32.totalorder %s576_s30, %s6902_s26  ;;  %p6910_p13 = scmp.lt.s32.totalorder %s576_s30, %s576_s30 }
  0x7f   : > { %p6911_p0 = scmp.lt.s32.totalorder %s6909_s27, %s6902_s26 }
  0x80   : > { %p6905_p11 = pnand %p6903_p10, %p7395_p7 }
  0x81   : > { %p6912_p1 = por %p6911_p0, %p6910_p13 }
  0x82   : > { %p6906_p12 = pneg %p6905_p11 }
  0x84   : > { %p6913_p4 = pnand %p6912_p1, %p6906_p12 }
  0x86   : > { %6916 = shalt.err (!%p6913_p4)
}
  0x87   : > { %6727 = dma.hbm_to_vmem [thread:$0]  (!%p7381_p5), %s8310_s9, 16, %s576_s30, [#allocation14]  }
  0x88   : > { %s8311_s11 = sld [smem:[#allocation40_spill]] }
  0x8e   : > { %s6917_s28 = scalar_lea.hbm %s8311_s11, 20480 }
  0x8f   : > { %p6918_p6 = scmp.ne.s32.totalorder %s8311_s11, %s6917_s28  ;;  %p6924_p2 = scmp.lt.u32.totalorder %s6917_s28, %s8311_s11 }
  0x91   : > { %p6920_p8 = pnand %p6918_p6, %p7395_p7 }
  0x93   : > { %p6921_p9 = pneg %p6920_p8 }
  0x95   : > { %p6926_p3 = pnand %p6924_p2, %p6921_p9 }
  0x97   : > { %6929 = shalt.err (!%p6926_p3)
}
  0x98   : > { %s6930_s30 = scalar_lea.vmem %s7460_s3, 20480  ;;  %p6938_p13 = scmp.lt.s32.totalorder %s7460_s3, %s7460_s3 }
  0x99   : > { %p6931_p10 = scmp.ne.s32.totalorder %s7460_s3, %s6930_s30  ;;  %p6939_p0 = scmp.lt.s32.totalorder %s6930_s30, %s6930_s30 }
  0x9b   : > { %p6933_p11 = pnand %p6931_p10, %p7395_p7  ;;  %p6940_p1 = por %p6939_p0, %p6938_p13 }
  0x9d   : > { %p6934_p12 = pneg %p6933_p11 }
  0x9f   : > { %p6941_p4 = pnand %p6940_p1, %p6934_p12 }
  0xa1   : > { %6944 = shalt.err (!%p6941_p4)
}
  0xa2   : > { %s8312_s25 = smov 16   ;;  %s8313_s26 = smov 256  }
  0xa3   : > { %6733 = dma.hbm_to_vmem [thread:$0]  (!%p7381_p5), %s8311_s11, 20480, %s7460_s3, [#allocation17], %s8313_s26, %s8313_s26, %s8312_s25  }
  0xa4   : > { %s7246_s18 = smov [#allocation19]   ;;  %s7247_s0 = smov [#allocation2]  }
  0xa5   : > { %s622_s19 = sshll.u32 %s7246_s18, 4  ;;  %s484_s28 = sshll.u32 %s7247_s0, 4  ;;  %s623_s19 = int_to_ptr.vmem [resolvable:$true] %s622_s19  ;;  %s7506_s28 = int_to_ptr.vmem [resolvable:$true] %s484_s28 }
  0xa6   : > { %s6945_s2 = scalar_lea.hbm %s8275_s13, 768 }
  0xa7   : > { %p6946_p6 = scmp.ne.s32.totalorder %s8275_s13, %s6945_s2  ;;  %p6952_p2 = scmp.lt.u32.totalorder %s6945_s2, %s8275_s13 }
  0xa9   : > { %p6948_p8 = pnand %p6946_p6, %p7395_p7 }
  0xab   : > { %p6949_p9 = pneg %p6948_p8 }
  0xad   : > { %p6954_p3 = pnand %p6952_p2, %p6949_p9 }
  0xaf   : > { %6957 = shalt.err (!%p6954_p3)
}
  0xb0   : > { %s6958_s5 = scalar_lea.vmem %s623_s19, 768  ;;  %p6966_p13 = scmp.lt.s32.totalorder %s623_s19, %s623_s19 }
  0xb1   : > { %p6959_p10 = scmp.ne.s32.totalorder %s623_s19, %s6958_s5  ;;  %p6967_p0 = scmp.lt.s32.totalorder %s6958_s5, %s6958_s5 }
  0xb3   : > { %p6961_p11 = pnand %p6959_p10, %p7395_p7  ;;  %p6968_p1 = por %p6967_p0, %p6966_p13 }
  0xb5   : > { %p6962_p12 = pneg %p6961_p11 }
  0xb7   : > { %p6969_p4 = pnand %p6968_p1, %p6962_p12 }
  0xb9   : > { %6972 = shalt.err (!%p6969_p4)
}
  0xba   : > { %s7248_s18 = smov 128   ;;  %s7249_s0 = smov 8  }
  0xbb   : > { %6739 = dma.hbm_to_vmem [thread:$0]  (!%p7381_p5), %s8275_s13, 768, %s623_s19, [#allocation20], %s7248_s18, %s7248_s18, %s7249_s0  }
  0xbc   : > { %s8314_s30 = sld [smem:[#allocation34_spill]] }
  0xc2   : > { %s6973_s27 = scalar_lea.hbm %s8314_s30, 768 }
  0xc3   : > { %p6974_p6 = scmp.ne.s32.totalorder %s8314_s30, %s6973_s27  ;;  %p6980_p2 = scmp.lt.u32.totalorder %s6973_s27, %s8314_s30 }
  0xc5   : > { %p6976_p8 = pnand %p6974_p6, %p7395_p7 }
  0xc7   : > { %p6977_p9 = pneg %p6976_p8 }
  0xc9   : > { %p6982_p3 = pnand %p6980_p2, %p6977_p9 }
  0xcb   : > { %6985 = shalt.err (!%p6982_p3)
}
  0xcc   : > { %s6986_s19 = scalar_lea.vmem %s7506_s28, 768  ;;  %p6994_p13 = scmp.lt.s32.totalorder %s7506_s28, %s7506_s28 }
  0xcd   : > { %p6987_p10 = scmp.ne.s32.totalorder %s7506_s28, %s6986_s19  ;;  %p6995_p0 = scmp.lt.s32.totalorder %s6986_s19, %s6986_s19 }
  0xcf   : > { %p6989_p11 = pnand %p6987_p10, %p7395_p7  ;;  %p6996_p1 = por %p6995_p0, %p6994_p13 }
  0xd1   : > { %p6990_p12 = pneg %p6989_p11 }
  0xd3   : > { %p6997_p4 = pnand %p6996_p1, %p6990_p12 }
  0xd5   : > { %7000 = shalt.err (!%p6997_p4)
}
  0xd6   : > { %6706 = dma.hbm_to_vmem [thread:$0]  (!%p7381_p5), %s8314_s30, 768, %s7506_s28, [#allocation3], %s7248_s18, %s7248_s18, %s7249_s0  }
  0xd7   : > { %s7250_s24 = smov [#allocation6]   ;;  %s7251_s2 = smov [#allocation9]  }
  0xd8   : > { %s511_s20 = sshll.u32 %s7250_s24, 4  ;;  %s538_s29 = sshll.u32 %s7251_s2, 4  ;;  %s512_s20 = int_to_ptr.vmem [resolvable:$true] %s511_s20  ;;  %s7555_s29 = int_to_ptr.vmem [resolvable:$true] %s538_s29 }
  0xd9   : > { %s7001_s5 = scalar_lea.hbm %s8266_s4, 384 }
  0xda   : > { %p7002_p6 = scmp.ne.s32.totalorder %s8266_s4, %s7001_s5  ;;  %p7008_p2 = scmp.lt.u32.totalorder %s7001_s5, %s8266_s4 }
  0xdc   : > { %p7004_p8 = pnand %p7002_p6, %p7395_p7 }
  0xde   : > { %p7005_p9 = pneg %p7004_p8 }
  0xe0   : > { %p7010_p3 = pnand %p7008_p2, %p7005_p9 }
  0xe2   : > { %7013 = shalt.err (!%p7010_p3)
}
  0xe3   : > { %s7014_s9 = scalar_lea.vmem %s512_s20, 384  ;;  %p7022_p13 = scmp.lt.s32.totalorder %s512_s20, %s512_s20 }
  0xe4   : > { %p7015_p10 = scmp.ne.s32.totalorder %s512_s20, %s7014_s9  ;;  %p7023_p0 = scmp.lt.s32.totalorder %s7014_s9, %s7014_s9 }
  0xe6   : > { %p7017_p11 = pnand %p7015_p10, %p7395_p7  ;;  %p7024_p1 = por %p7023_p0, %p7022_p13 }
  0xe8   : > { %p7018_p12 = pneg %p7017_p11 }
  0xea   : > { %p7025_p4 = pnand %p7024_p1, %p7018_p12 }
  0xec   : > { %7028 = shalt.err (!%p7025_p4)
}
  0xed   : > { %6712 = dma.hbm_to_vmem [thread:$0]  (!%p7381_p5), %s8266_s4, 384, %s512_s20, [#allocation5], %s7248_s18, %s7248_s18, %s7249_s0  }
  0xee   : > { %s7029_s3 = scalar_lea.hbm %s8268_s6, 32 }
  0xef   : > { %p7030_p6 = scmp.ne.s32.totalorder %s8268_s6, %s7029_s3  ;;  %p7036_p2 = scmp.lt.u32.totalorder %s7029_s3, %s8268_s6 }
  0xf1   : > { %p7032_p8 = pnand %p7030_p6, %p7395_p7 }
  0xf3   : > { %p7033_p9 = pneg %p7032_p8 }
  0xf5   : > { %p7038_p3 = pnand %p7036_p2, %p7033_p9 }
  0xf7   : > { %7041 = shalt.err (!%p7038_p3)
}
  0xf8   : > { %s7042_s20 = scalar_lea.vmem %s7555_s29, 32  ;;  %p7050_p13 = scmp.lt.s32.totalorder %s7555_s29, %s7555_s29 }
  0xf9   : > { %p7043_p10 = scmp.ne.s32.totalorder %s7555_s29, %s7042_s20  ;;  %p7051_p0 = scmp.lt.s32.totalorder %s7042_s20, %s7042_s20 }
  0xfb   : > { %p7045_p11 = pnand %p7043_p10, %p7395_p7  ;;  %p7052_p1 = por %p7051_p0, %p7050_p13 }
  0xfd   : > { %p7046_p12 = pneg %p7045_p11 }
  0xff   : > { %p7053_p4 = pnand %p7052_p1, %p7046_p12 }
 0x101   : > { %7056 = shalt.err (!%p7053_p4)
}
 0x102   : > { %6718 = dma.hbm_to_vmem [thread:$0]  (!%p7381_p5), %s8268_s6, 32, %s7555_s29, [#allocation8]  }
 0x103   : > { %s7252_s24 = smov [#allocation12]   ;;  %s7253_s27 = smov [#allocation15]  }
 0x104   : > { %s561_s2 = sshll.u32 %s7252_s24, 4  ;;  %s585_s3 = sshll.u32 %s7253_s27, 4  ;;  %s562_s2 = int_to_ptr.vmem [resolvable:$true] %s561_s2  ;;  %s7601_s3 = int_to_ptr.vmem [resolvable:$true] %s585_s3 }
 0x105   : > { %s7057_s7 = scalar_lea.hbm %s8270_s8, 17920 }
 0x106   : > { %p7058_p6 = scmp.ne.s32.totalorder %s8270_s8, %s7057_s7  ;;  %p7064_p2 = scmp.lt.u32.totalorder %s7057_s7, %s8270_s8 }
 0x108   : > { %p7060_p8 = pnand %p7058_p6, %p7395_p7 }
 0x10a   : > { %p7061_p9 = pneg %p7060_p8 }
 0x10c   : > { %p7066_p3 = pnand %p7064_p2, %p7061_p9 }
 0x10e   : > { %7069 = shalt.err (!%p7066_p3)
}
 0x10f   : > { %s7070_s11 = scalar_lea.vmem %s562_s2, 17920  ;;  %p7078_p13 = scmp.lt.s32.totalorder %s562_s2, %s562_s2 }
 0x110   : > { %p7071_p10 = scmp.ne.s32.totalorder %s562_s2, %s7070_s11  ;;  %p7079_p0 = scmp.lt.s32.totalorder %s7070_s11, %s7070_s11 }
 0x112   : > { %p7073_p11 = pnand %p7071_p10, %p7395_p7  ;;  %p7080_p1 = por %p7079_p0, %p7078_p13 }
 0x114   : > { %p7074_p12 = pneg %p7073_p11 }
 0x116   : > { %p7081_p4 = pnand %p7080_p1, %p7074_p12 }
 0x118   : > { %7084 = shalt.err (!%p7081_p4)
}
 0x119   : > { %6724 = dma.hbm_to_vmem [thread:$0]  (!%p7381_p5), %s8270_s8, 17920, %s562_s2, [#allocation11], %s7248_s18, %s7248_s18, %s7249_s0  }
 0x11a   : > { %s7085_s7 = scalar_lea.hbm %s8272_s10, 640 }
 0x11b   : > { %p7086_p6 = scmp.ne.s32.totalorder %s8272_s10, %s7085_s7  ;;  %p7092_p2 = scmp.lt.u32.totalorder %s7085_s7, %s8272_s10 }
 0x11d   : > { %p7088_p8 = pnand %p7086_p6, %p7395_p7 }
 0x11f   : > { %p7089_p9 = pneg %p7088_p8 }
 0x121   : > { %p7094_p3 = pnand %p7092_p2, %p7089_p9 }
 0x123   : > { %7097 = shalt.err (!%p7094_p3)
}
 0x124   : > { %s7098_s2 = scalar_lea.vmem %s7601_s3, 640  ;;  %p7106_p13 = scmp.lt.s32.totalorder %s7601_s3, %s7601_s3 }
 0x125   : > { %p7099_p10 = scmp.ne.s32.totalorder %s7601_s3, %s7098_s2  ;;  %p7107_p0 = scmp.lt.s32.totalorder %s7098_s2, %s7098_s2 }
 0x127   : > { %p7101_p11 = pnand %p7099_p10, %p7395_p7  ;;  %p7108_p1 = por %p7107_p0, %p7106_p13 }
 0x129   : > { %p7102_p12 = pneg %p7101_p11 }
 0x12b   : > { %p7109_p4 = pnand %p7108_p1, %p7102_p12 }
 0x12d   : > { %7112 = shalt.err (!%p7109_p4)
}
 0x12e   : > { %6730 = dma.hbm_to_vmem [thread:$0]  (!%p7381_p5), %s8272_s10, 640, %s7601_s3, [#allocation14], %s7248_s18, %s7248_s18, %s7249_s0  }
 0x12f   : > { %s7254_s27 = smov [#allocation18]   ;;  %s7255_s19 = smov [#allocation21]  }
 0x130   : > { %s612_s5 = sshll.u32 %s7254_s27, 4  ;;  %s635_s7 = sshll.u32 %s7255_s19, 4  ;;  %s613_s5 = int_to_ptr.vmem [resolvable:$true] %s612_s5  ;;  %s7650_s7 = int_to_ptr.vmem [resolvable:$true] %s635_s7 }
 0x131   : > { %s7113_s9 = scalar_lea.hbm %s8274_s12, 32 }
 0x132   : > { %p7114_p6 = scmp.ne.s32.totalorder %s8274_s12, %s7113_s9  ;;  %p7120_p2 = scmp.lt.u32.totalorder %s7113_s9, %s8274_s12 }
 0x134   : > { %p7116_p8 = pnand %p7114_p6, %p7395_p7 }
 0x136   : > { %p7117_p9 = pneg %p7116_p8 }
 0x138   : > { %p7122_p3 = pnand %p7120_p2, %p7117_p9 }
 0x13a   : > { %7125 = shalt.err (!%p7122_p3)
}
 0x13b   : > { %s7126_s24 = scalar_lea.vmem %s613_s5, 32  ;;  %p7134_p13 = scmp.lt.s32.totalorder %s613_s5, %s613_s5 }
 0x13c   : > { %p7127_p10 = scmp.ne.s32.totalorder %s613_s5, %s7126_s24  ;;  %p7135_p0 = scmp.lt.s32.totalorder %s7126_s24, %s7126_s24 }
 0x13e   : > { %p7129_p11 = pnand %p7127_p10, %p7395_p7  ;;  %p7136_p1 = por %p7135_p0, %p7134_p13 }
 0x140   : > { %p7130_p12 = pneg %p7129_p11 }
 0x142   : > { %p7137_p4 = pnand %p7136_p1, %p7130_p12 }
 0x144   : > { %7140 = shalt.err (!%p7137_p4)
}
 0x145   : > { %6736 = dma.hbm_to_vmem [thread:$0]  (!%p7381_p5), %s8274_s12, 32, %s613_s5, [#allocation17]  }
 0x146   : > { %s7141_s9 = scalar_lea.hbm %s8276_s14, 21504 }
 0x147   : > { %p7142_p6 = scmp.ne.s32.totalorder %s8276_s14, %s7141_s9  ;;  %p7148_p2 = scmp.lt.u32.totalorder %s7141_s9, %s8276_s14 }
 0x149   : > { %p7144_p8 = pnand %p7142_p6, %p7395_p7 }
 0x14b   : > { %p7145_p9 = pneg %p7144_p8 }
 0x14d   : > { %p7150_p3 = pnand %p7148_p2, %p7145_p9 }
 0x14f   : > { %7153 = shalt.err (!%p7150_p3)
}
 0x150   : > { %s7154_s5 = scalar_lea.vmem %s7650_s7, 21504  ;;  %p7162_p13 = scmp.lt.s32.totalorder %s7650_s7, %s7650_s7 }
 0x151   : > { %p7155_p10 = scmp.ne.s32.totalorder %s7650_s7, %s7154_s5  ;;  %p7163_p0 = scmp.lt.s32.totalorder %s7154_s5, %s7154_s5 }
 0x153   : > { %p7157_p11 = pnand %p7155_p10, %p7395_p7  ;;  %p7164_p1 = por %p7163_p0, %p7162_p13 }
 0x155   : > { %p7158_p12 = pneg %p7157_p11 }
 0x157   : > { %p7165_p4 = pnand %p7164_p1, %p7158_p12 }
 0x159   : > { %7168 = shalt.err (!%p7165_p4)
}
 0x15a   : > { %6742 = dma.hbm_to_vmem [thread:$0]  (!%p7381_p5), %s8276_s14, 21504, %s7650_s7, [#allocation20], %s8313_s26, %s8313_s26, %s8312_s25  }
 0x15b   : > { %s7256_s19 = smov [#allocation22]   ;;  %s7169_s29 = scalar_lea.hbm %s8279_s17, 10752 }
 0x15c   : > { %s654_s28 = sshll.u32 %s7256_s19, 4  ;;  %p7170_p6 = scmp.ne.s32.totalorder %s8279_s17, %s7169_s29  ;;  %s655_s28 = int_to_ptr.vmem [resolvable:$true] %s654_s28 }
 0x15d   : > { %p7176_p2 = scmp.lt.u32.totalorder %s7169_s29, %s8279_s17 }
 0x15e   : > { %p7172_p8 = pnand %p7170_p6, %p7395_p7 }
 0x160   : > { %p7173_p9 = pneg %p7172_p8 }
 0x162   : > { %p7178_p3 = pnand %p7176_p2, %p7173_p9 }
 0x164   : > { %7181 = shalt.err (!%p7178_p3)
}
 0x165   : > { %s7182_s25 = scalar_lea.vmem %s655_s28, 10752  ;;  %p7190_p13 = scmp.lt.s32.totalorder %s655_s28, %s655_s28 }
 0x166   : > { %p7183_p10 = scmp.ne.s32.totalorder %s655_s28, %s7182_s25  ;;  %p7191_p0 = scmp.lt.s32.totalorder %s7182_s25, %s7182_s25 }
 0x168   : > { %p7185_p11 = pnand %p7183_p10, %p7395_p7  ;;  %p7192_p1 = por %p7191_p0, %p7190_p13 }
 0x16a   : > { %p7186_p12 = pneg %p7185_p11 }
 0x16c   : > { %p7193_p4 = pnand %p7192_p1, %p7186_p12 }
 0x16e   : > { %7196 = shalt.err (!%p7193_p4)
}
 0x16f   : > { %6745 = dma.hbm_to_vmem [thread:$0]  (!%p7381_p5), %s8279_s17, 10752, %s655_s28, [#allocation23], %s7248_s18, %s7248_s18, %s7249_s0  }
 0x170   : > { %p8315_p6 = scmp.ne.s32.totalorder %s8304_s1, 0 }
 0x171   : > { %p8316_p7 = scmp.eq.s32.totalorder (!%p8315_p6), %s7366_s21, 0 }
 0x172   : > { %681 = sbr.rel (%p8315_p6) target bundleno = 4957 (0x135d), region = 96 }
 0x179   : > { %7202 = dma.done.wait (%p8316_p7), [#allocation3], 768   ;;  %p8317_p8 = pmov %p8316_p7 }
 0x17a   : > { %p8318_p9 = pmov %p8316_p7 }
 0x17b   : > { %7204 = vsyncadd (%p8317_p8), [#allocation3], 4294966528 }
 0x17c   : > { %7206 = dma.done.wait (%p8318_p9), [#allocation5], 416   ;;  %p8319_p2 = pmov %p8316_p7 }
 0x17e   : > { %7208 = vsyncadd (%p8319_p2), [#allocation5], 4294966880  ;;  %p8320_p3 = pmov %p8319_p2 }
 0x17f   : > { %p8321_p5 = pmov %p8319_p2 }
 0x180   : > { %7210 = dma.done.wait (%p8320_p3), [#allocation8], 21536  }
 0x181   : > { %7212 = vsyncadd (%p8321_p5), [#allocation8], 4294945760  ;;  %p8322_p10 = pmov %p8319_p2 }
 0x182   : > { %p8323_p11 = pmov %p8319_p2 }
 0x183   : > { %7214 = dma.done.wait (%p8322_p10), [#allocation11], 18080  }
 0x184   : > { %7216 = vsyncadd (%p8323_p11), [#allocation11], 4294949216  ;;  %p8324_p12 = pmov %p8319_p2 }
 0x185   : > { %p8325_p13 = pmov %p8319_p2 }
 0x186   : > { %7218 = dma.done.wait (%p8324_p12), [#allocation14], 656  }
 0x187   : > { %7220 = vsyncadd (%p8325_p13), [#allocation14], 4294966640  ;;  %p8326_p0 = pmov %p8319_p2 }
 0x189   : > { %7222 = dma.done.wait (%p8326_p0), [#allocation17], 20512   ;;  %p8327_p1 = pmov %p8326_p0 }
 0x18a   : > { %p8328_p4 = pmov %p8326_p0 }
 0x18b   : > { %7224 = vsyncadd (%p8327_p1), [#allocation17], 4294946784 }
 0x18c   : > { %7226 = dma.done.wait (%p8328_p4), [#allocation20], 22272   ;;  %p8329_p6 = pmov %p8326_p0 }
 0x18d   : > { %p8330_p7 = pmov %p8326_p0 }
 0x18e   : > { %7228 = vsyncadd (%p8329_p6), [#allocation20], 4294945024 }
 0x18f   : > { %7230 = dma.done.wait (%p8330_p7), [#allocation23], 10752   ;;  %p8331_p8 = pmov %p8326_p0 }
 0x190   : > { %p789_p9 = scmp.lt.s32.totalorder %s7366_s21, 1  ;;  %s8332_s18 = sld [smem:[#allocation33_spill]]  ;;  %vm812_vm0 = vcmask 1043456   ;;  %vm805_vm1 = vcmask 228352   ;;  %v803_v5 = vld [vmem:[#allocation2] sm:$0xff]  ;;  %vm7257_vm2 = vmmov 1   ;;  %v1358_v56 = vlaneseq }
 0x191   : > { %7232 = vsyncadd (%p8331_p8), [#allocation23], 4294956544  ;;  %5628 = vmatprep.mubr.msk.f32.mxu0 %vm805_vm1, %v803_v5  ;;  %v804_v8 = vld [vmem:[#allocation2 + $0x8] sm:$0x3f]  ;;  %v900_v9 = vld [vmem:[#allocation2 + $0x10] sm:$0xff]  ;;  %s8335_s19 = sld [smem:[#allocation35_spill]] }
 0x192   : > { %s8342_s21 = smov (!%p789_p9, %s7366_s21), 1  ;;  %vm7766_vm3 = vmpackc.low %vm812_vm0, %vm7257_vm2  ;;  %v901_v10 = vld [vmem:[#allocation2 + $0x18] sm:$0x3f]  ;;  %v7258_v26 = vmov 0.0   ;;  %v1171_v42 = vld [vmem:[#allocation2 + $0x20] sm:$0xff]  ;;  %v1359_v57 = vshrl.u32 %v1358_v56, 7 }
 0x193   : > { %s5582_s1 = sshll.u32 %s8342_s21, 5  ;;  %1452 = vmatprep.mubr.f32.mxu1 %v7258_v26  ;;  %v1172_v48 = vld [vmem:[#allocation2 + $0x28] sm:$0x3f]  ;;  %v1356_v59 = vld [vmem:[#allocation4] sm:$0x3]  ;;  %vm1381_vm4 = vcmask 1045504  }
 0x194   : > { %v7898_v58 = vsub.s32 0, %v1359_v57  ;;  %v7900_v60 = vsub.s32 1, %v1359_v57  ;;  %vm7905_vm5 = vmpackc.low %vm1381_vm4, %vm7257_vm2  ;;  %vm1377_vm6 = vcmask 113664   ;;  %v1616_v57 = vld [vmem:[#allocation7 + $0x280] sm:$0xff]  ;;  %vm1648_vm7 = vcmask 785408   ;;  %s8338_s3 = sld [smem:[#allocation41_spill]] }
 0x195   : > { %vm2027_vm8 = vcmask 1046528   ;;  %vm2023_vm9 = vcmask 56320   ;;  %vm3144_vm10 = vcmask 1041408   ;;  %vm3140_vm11 = vcmask 15360   ;;  %s8339_s26 = sld [smem:[#allocation42_spill]] }
 0x196   : > { %s793_s0 = scalar_lea.vmem %s8332_s18, %s5582_s1  ;;  %v1361_v61 = vrot.slane %v1356_v59, %v7898_v58  ;;  %v1365_v63 = vrot.slane %v1356_v59, %v7900_v60  ;;  %v1618_v59 = vld [vmem:[#allocation7 + $0x290] sm:$0xff]  ;;  %vm5220_vm12 = vcmask 224256  }
 0x197   : > { %v799_v0 = vld [vmem:[%s793_s0] sm:$0xff]  ;;  %v800_v1 = vld [vmem:[%s793_s0 + $0x8] sm:$0xff]  ;;  %v801_v2 = vld [vmem:[%s793_s0 + $0x10] sm:$0xff] }
 0x198   : > { %v7761_v3 = vpack.c.bf16 %v800_v1, %v799_v0  ;;  %v802_v4 = vld [vmem:[%s793_s0 + $0x18] sm:$0xf]  ;;  %v5457_v11 = vld [vmem:[%s8335_s19 + $0x48] sm:$0xff]  ;;  %v5456_v14 = vld [vmem:[%s8335_s19 + $0x40] sm:$0xff] }
 0x199   : > { %v7763_v6 = vpack.c.bf16 %v802_v4, %v801_v2  ;;  %v5459_v12 = vld [vmem:[%s8335_s19 + $0x58] sm:$0xff]  ;;  %v5458_v15 = vld [vmem:[%s8335_s19 + $0x50] sm:$0xff]  ;;  %v5461_v17 = vld [vmem:[%s8335_s19 + $0x68] sm:$0xff] }
 0x19a   : > { %5684 = vmatprep.subr.bf16.mxu0 %v7761_v3  ;;  %v5703_v13 = vpack.c.bf16 %v5459_v12, %v5457_v11  ;;  %v5705_v16 = vpack.c.bf16 %v5458_v15, %v5456_v14  ;;  %v5463_v18 = vld [vmem:[%s8335_s19 + $0x78] sm:$0xf]  ;;  %v5460_v19 = vld [vmem:[%s8335_s19 + $0x60] sm:$0xff]  ;;  %v5462_v21 = vld [vmem:[%s8335_s19 + $0x70] sm:$0xf] }
 0x19b   : > { %5686 = vmatpush3.bf16.msra.mxu0 %v7761_v3  ;;  %v5707_v20 = vpack.c.bf16 %v5463_v18, %v5461_v17  ;;  %v5710_v22 = vpack.c.bf16 %v5462_v21, %v5460_v19  ;;  %v892_v23 = vld [vmem:[%s8335_s19 + $0x8] sm:$0xff]  ;;  %v894_v24 = vld [vmem:[%s8335_s19 + $0x18] sm:$0xff]  ;;  %v891_v29 = vld [vmem:[%s8335_s19] sm:$0xff]  ;;  %s798_s7 = scalar_lea.vmem %s8339_s26, %s5582_s1 }
 0x19c   : > { %5689 = vmatprep.subr.msk.bf16.mxu0 %vm7766_vm3, %v7763_v6  ;;  %v5713_v25 = vpack.c.bf16 %v894_v24, %v892_v23  ;;  %v893_v30 = vld [vmem:[%s8335_s19 + $0x10] sm:$0xff]  ;;  %v896_v31 = vld [vmem:[%s8335_s19 + $0x28] sm:$0xff]  ;;  %v898_v32 = vld [vmem:[%s8335_s19 + $0x38] sm:$0xf] }
 0x19d   : > { %v5715_v33 = vpack.c.bf16 %v893_v30, %v891_v29  ;;  %v5717_v35 = vpack.c.bf16 %v898_v32, %v896_v31  ;;  %v895_v36 = vld [vmem:[%s8335_s19 + $0x20] sm:$0xff]  ;;  %v897_v37 = vld [vmem:[%s8335_s19 + $0x30] sm:$0xf]  ;;  %v5476_v40 = vld [vmem:[%s8335_s19 + $0x88] sm:$0xff] }
 0x19e   : > { %v5720_v39 = vpack.c.bf16 %v897_v37, %v895_v36  ;;  %v5478_v41 = vld [vmem:[%s8335_s19 + $0x98] sm:$0xff]  ;;  %v5475_v44 = vld [vmem:[%s8335_s19 + $0x80] sm:$0xff]  ;;  %v5477_v45 = vld [vmem:[%s8335_s19 + $0x90] sm:$0xff] }
 0x19f   : > { %5692 = vmatpush3.bf16.msk.msra.mxu0 %vm7766_vm3, %v7763_v6  ;;  %v5733_v43 = vpack.c.bf16 %v5478_v41, %v5476_v40  ;;  %v5480_v46 = vld [vmem:[%s8335_s19 + $0xa8] sm:$0xff]  ;;  %v5482_v47 = vld [vmem:[%s8335_s19 + $0xb8] sm:$0xf]  ;;  %v5735_v49 = vpack.c.bf16 %v5477_v45, %v5475_v44  ;;  %v5479_v51 = vld [vmem:[%s8335_s19 + $0xa0] sm:$0xff] }
 0x1a0   : > { %5694 = vmatprep.subr.bf16.mxu0 %v7761_v3  ;;  %v5737_v50 = vpack.c.bf16 %v5482_v47, %v5480_v46  ;;  %v5481_v52 = vld [vmem:[%s8335_s19 + $0xb0] sm:$0xf]  ;;  %v1595_v15 = vld [vmem:[#allocation7 + $0x1d8] sm:$0xff]  ;;  %v1516_v23 = vld [vmem:[#allocation6 + $0x8] sm:$0x7f] }
 0x1a1   : > { %v5740_v53 = vpack.c.bf16 %v5481_v52, %v5479_v51  ;;  %v1593_v14 = vld [vmem:[#allocation7 + $0x1c8] sm:$0xff]  ;;  %v1798_v17 = vld [vmem:[#allocation6 + $0x10] sm:$0x7f]  ;;  %v1592_v19 = vld [vmem:[#allocation7 + $0x1c0] sm:$0xff] }
 0x1a2   : > { %5629 = vmatmul.mubr.msk.f32.vlgmr.msra.gmra.mrb[0].mxu0 %vm805_vm1, %v804_v8  ;;  %v5755_v18 = vpack.c.bf16 %v1595_v15, %v1593_v14  ;;  %v1597_v21 = vld [vmem:[#allocation7 + $0x1e8] sm:$0xff]  ;;  %v1603_v30 = vld [vmem:[#allocation7 + $0x218] sm:$0xff]  ;;  %v1606_v40 = vld [vmem:[#allocation7 + $0x230] sm:$0xff] }
 0x1a3   : > { %5696 = vmatpush3.bf16.msra.mxu0 %v7761_v3  ;;  %5639 = vmatprep.mubr.msk.f32.mxu0 %vm805_vm1, %v900_v9  ;;  %v1601_v29 = vld [vmem:[#allocation7 + $0x208] sm:$0xff]  ;;  %v1607_v36 = vld [vmem:[#allocation7 + $0x238] sm:$0xff]  ;;  %v1608_v45 = vld [vmem:[#allocation7 + $0x240] sm:$0xff] }
 0x1a4   : > { %5699 = vmatprep.subr.msk.bf16.mxu0 %vm7766_vm3, %v7763_v6  ;;  %v5763_v32 = vpack.c.bf16 %v1603_v30, %v1601_v29  ;;  %v1609_v41 = vld [vmem:[#allocation7 + $0x248] sm:$0xff]  ;;  %v1610_v46 = vld [vmem:[#allocation7 + $0x250] sm:$0xff]  ;;  %v1612_v51 = vld [vmem:[#allocation7 + $0x260] sm:$0xff] }
 0x1a5   : > { %v1613_v47 = vld [vmem:[#allocation7 + $0x268] sm:$0xff]  ;;  %v1614_v52 = vld [vmem:[#allocation7 + $0x270] sm:$0xff]  ;;  %v1628_v14 = vld [vmem:[#allocation7 + $0x2e0] sm:$0xff] }
 0x1a6   : > { %v1630_v15 = vld [vmem:[#allocation7 + $0x2f0] sm:$0xff]  ;;  %v1641_v29 = vld [vmem:[#allocation7 + $0x348] sm:$0xff]  ;;  %v1643_v30 = vld [vmem:[#allocation7 + $0x358] sm:$0xff] }
 0x1a7   : > { %5702 = vmatpush3.bf16.msk.msra.mxu0 %vm7766_vm3, %v7763_v6  ;;  %v5579_v12 = vld [vmem:[%s8338_s3] ss:$0 sm:$0xff] }
 0x1a8   : > { %5704 = vmatprep.subr.bf16.mxu0 %v5703_v13 }
 0x1aa   : > { %5640 = vmatmul.mubr.msk.f32.vlgmr.msra.gmra.mrb[2].mxu0 %vm805_vm1, %v901_v10 }
 0x1ab   : > { %5706 = vmatpush1.bf16.msra.mxu0 %v5705_v16  ;;  %1068 = vmatprep.mubr.f32.mxu0 %v7258_v26  ;;  %v1376_v16 = vld [vmem:[#allocation6] sm:$0x7f] }
 0x1ac   : > { %5709 = vmatprep.subr.msk.bf16.mxu0 %vm7766_vm3, %v5707_v20  ;;  %v1594_v20 = vld [vmem:[#allocation7 + $0x1d0] sm:$0xff] }
 0x1ad   : > { %v5757_v24 = vpack.c.bf16 %v1594_v20, %v1592_v19  ;;  %v1632_v20 = vld [vmem:[#allocation7 + $0x300] sm:$0xff] }
 0x1af   : > { %5712 = vmatpush1.bf16.msk.msra.mxu0 %vm7766_vm3, %v5710_v22  ;;  %v1599_v22 = vld [vmem:[#allocation7 + $0x1f8] sm:$0xff] }
 0x1b0   : > { %5714 = vmatprep.subr.bf16.mxu0 %v5713_v25  ;;  %v5759_v25 = vpack.c.bf16 %v1599_v22, %v1597_v21  ;;  %v1634_v21 = vld [vmem:[#allocation7 + $0x310] sm:$0xff]  ;;  %v1637_v22 = vld [vmem:[#allocation7 + $0x328] sm:$0xff] }
 0x275   : > { %v5630_v27 = vpop.f32.mrb[0].mxu0 }
 0x276   : > { %v882_v28 = vpop.f32.mrb[1].mxu0 }
 0x27d   : > { %v5641_v34 = vpop.f32.mrb[2].mxu0 }
 0x27e   : > { %v974_v38 = vpop.f32.mrb[3].mxu0 }
 0x27f   : > { %5466 = vmatmul.mubr.msk.f32.vlgmr.msra.gmra.mrb[4].mxu0 %vm805_vm1, %v974_v38 }
 0x280   : > { %5716 = vmatpush1.bf16.msra.mxu0 %v5715_v33  ;;  %1074 = vmatprep.mubr.f32.mxu0 %v7258_v26  ;;  %v1600_v33 = vld [vmem:[#allocation7 + $0x200] sm:$0xff] }
 0x281   : > { %5719 = vmatprep.subr.msk.bf16.mxu0 %vm7766_vm3, %v5717_v35  ;;  %v1605_v35 = vld [vmem:[#allocation7 + $0x228] sm:$0xff] }
 0x282   : > { %v5767_v38 = vpack.c.bf16 %v1607_v36, %v1605_v35  ;;  %v1645_v36 = vld [vmem:[#allocation7 + $0x368] sm:$0xff] }
 0x283   : > { %5467 = vmatmul.mubr.msk.f32.gmra.mrb[6].mxu0 %vm805_vm1, %v5641_v34  ;;  %v1602_v34 = vld [vmem:[#allocation7 + $0x210] sm:$0xff] }
 0x284   : > { %5722 = vmatpush1.bf16.msk.msra.mxu0 %vm7766_vm3, %v5720_v39  ;;  %1157 = vmatprep.mubr.f32.mxu0 %v7258_v26  ;;  %v5765_v37 = vpack.c.bf16 %v1602_v34, %v1600_v33  ;;  %v1604_v39 = vld [vmem:[#allocation7 + $0x220] sm:$0xff]  ;;  %v1642_v34 = vld [vmem:[#allocation7 + $0x350] sm:$0xff] }
 0x285   : > { %5724 = vmatprep.subr.bf16.mxu0 %v7761_v3  ;;  %v1640_v33 = vld [vmem:[#allocation7 + $0x340] sm:$0xff] }
 0x286   : > { %v5805_v35 = vpack.c.bf16 %v1642_v34, %v1640_v33  ;;  %v1487_v33 = vld [vmem:[#allocation7 + $0xe0] sm:$0xff]  ;;  %v1489_v34 = vld [vmem:[#allocation7 + $0xf0] sm:$0xff] }
 0x287   : > { %5470 = vmatmul.mubr.msk.f32.vlgmr.msra.gmra.mrb[4].mxu0 %vm805_vm1, %v882_v28  ;;  %v1598_v28 = vld [vmem:[#allocation7 + $0x1f0] sm:$0xff] }
 0x288   : > { %5726 = vmatpush3.bf16.msra.mxu0 %v7761_v3  ;;  %1163 = vmatprep.mubr.f32.mxu0 %v7258_v26 }
 0x289   : > { %5729 = vmatprep.subr.msk.bf16.mxu0 %vm7766_vm3, %v7763_v6 }
 0x28b   : > { %5471 = vmatmul.mubr.msk.f32.gmra.mrb[6].mxu0 %vm805_vm1, %v5630_v27  ;;  %v1596_v27 = vld [vmem:[#allocation7 + $0x1e0] sm:$0xff] }
 0x28c   : > { %5732 = vmatpush3.bf16.msk.msra.mxu0 %vm7766_vm3, %v7763_v6  ;;  %5650 = vmatprep.mubr.msk.f32.mxu0 %vm805_vm1, %v1171_v42  ;;  %v5761_v31 = vpack.c.bf16 %v1598_v28, %v1596_v27  ;;  %v1611_v42 = vld [vmem:[#allocation7 + $0x258] sm:$0xff]  ;;  %v1636_v27 = vld [vmem:[#allocation7 + $0x320] sm:$0xff]  ;;  %v1638_v28 = vld [vmem:[#allocation7 + $0x330] sm:$0xff] }
 0x28d   : > { %5734 = vmatprep.subr.bf16.mxu0 %v5733_v43  ;;  %v5769_v43 = vpack.c.bf16 %v1606_v40, %v1604_v39  ;;  %v5771_v44 = vpack.c.bf16 %v1611_v42, %v1609_v41  ;;  %v1644_v39 = vld [vmem:[#allocation7 + $0x360] sm:$0xff]  ;;  %v1646_v40 = vld [vmem:[#allocation7 + $0x370] sm:$0xff]  ;;  %v1460_v42 = vld [vmem:[#allocation7 + $0x8] sm:$0xff] }
 0x28e   : > { %v5809_v41 = vpack.c.bf16 %v1646_v40, %v1644_v39  ;;  %v1491_v39 = vld [vmem:[#allocation7 + $0x100] sm:$0xff]  ;;  %v1493_v40 = vld [vmem:[#allocation7 + $0x110] sm:$0xff] }
 0x28f   : > { %5651 = vmatmul.mubr.msk.f32.vlgmr.msra.gmra.mrb[8].mxu0 %vm805_vm1, %v1172_v48  ;;  %v1615_v48 = vld [vmem:[#allocation7 + $0x278] sm:$0xff] }
 0x290   : > { %5736 = vmatpush1.bf16.msra.mxu0 %v5735_v49  ;;  %1339 = vmatprep.mubr.f32.mxu0 %v7258_v26  ;;  %v5773_v49 = vpack.c.bf16 %v1610_v46, %v1608_v45 }
 0x291   : > { %5739 = vmatprep.subr.msk.bf16.mxu0 %vm7766_vm3, %v5737_v50  ;;  %v5775_v50 = vpack.c.bf16 %v1615_v48, %v1613_v47  ;;  %v1459_v48 = vld [vmem:[#allocation7] sm:$0xff] }
 0x294   : > { %5742 = vmatpush1.bf16.msk.msra.mxu0 %vm7766_vm3, %v5740_v53  ;;  %v1617_v53 = vld [vmem:[#allocation7 + $0x288] sm:$0xff] }
 0x362   : > { %v5652_v54 = vpop.f32.mrb[8].mxu0 }
 0x363   : > { %v1245_v55 = vpop.f32.mrb[9].mxu0 }
 0x364   : > { %5485 = vmatmul.mubr.msk.f32.vlgmr.msra.gmra.mrb[4].mxu0 %vm805_vm1, %v1245_v55  ;;  %v5777_v55 = vpack.c.bf16 %v1614_v52, %v1612_v51  ;;  %v1464_v51 = vld [vmem:[#allocation7 + $0x28] sm:$0xff]  ;;  %v1466_v52 = vld [vmem:[#allocation7 + $0x38] sm:$0xff] }
 0x365   : > { %1345 = vmatprep.mubr.f32.mxu0 %v7258_v26 }
 0x368   : > { %5486 = vmatmul.mubr.msk.f32.gmra.mrb[6].mxu0 %vm805_vm1, %v5652_v54  ;;  %v1619_v54 = vld [vmem:[#allocation7 + $0x298] sm:$0xff] }
 0x369   : > { %1866 = vmatprep.mubr.f32.mxu0 %v7258_v26  ;;  %v5779_v56 = vpack.c.bf16 %v1619_v54, %v1617_v53 }
 0x437   : > { %v1341_v62 = vpop.f32.mrb[4].mxu0 }
 0x438   : > { %v1343_v0 = vpop.f32.mrb[5].mxu0  ;;  %v1368_v1 = vadd.f32 %v1361_v61, %v1341_v62  ;;  %v1623_v62 = vld [vmem:[#allocation7 + $0x2b8] sm:$0xff] }
 0x439   : > { %v1369_v2 = vadd.f32 %v1365_v63, %v1343_v0 }
 0x43a   : > { %v1372_v7 = vmax.f32 %v1368_v1, 0.0  ;;  %v1620_v1 = vld [vmem:[#allocation7 + $0x2a0] sm:$0xff] }
 0x43b   : > { %v1347_v3 = vpop.f32.mrb[6].mxu0  ;;  %v1373_v9 = vmax.f32 %v1369_v2, 0.0  ;;  %v1622_v2 = vld [vmem:[#allocation7 + $0x2b0] sm:$0xff] }
 0x43c   : > { %v1370_v4 = vadd.f32 %v1361_v61, %v1347_v3  ;;  %v1349_v5 = vpop.f32.mrb[7].mxu0  ;;  %v1621_v61 = vld [vmem:[#allocation7 + $0x2a8] sm:$0xff] }
 0x43d   : > { %v1371_v6 = vadd.f32 %v1365_v63, %v1349_v5  ;;  %v5781_v63 = vpack.c.bf16 %v1618_v59, %v1616_v57  ;;  %v5783_v0 = vpack.c.bf16 %v1623_v62, %v1621_v61  ;;  %v1625_v3 = vld [vmem:[#allocation7 + $0x2c8] sm:$0xff]  ;;  %v5785_v5 = vpack.c.bf16 %v1622_v2, %v1620_v1  ;;  %v1463_v57 = vld [vmem:[#allocation7 + $0x20] sm:$0xff]  ;;  %v1465_v59 = vld [vmem:[#allocation7 + $0x30] sm:$0xff] }
 0x43e   : > { %v1374_v8 = vmax.f32 %v1370_v4, 0.0  ;;  %v1627_v4 = vld [vmem:[#allocation7 + $0x2d8] sm:$0xff]  ;;  %v1468_v61 = vld [vmem:[#allocation7 + $0x48] sm:$0xff]  ;;  %v1467_v1 = vld [vmem:[#allocation7 + $0x40] sm:$0xff] }
 0x43f   : > { %v1375_v10 = vmax.f32 %v1371_v6, 0.0  ;;  %v5787_v6 = vpack.c.bf16 %v1627_v4, %v1625_v3  ;;  %v1470_v62 = vld [vmem:[#allocation7 + $0x58] sm:$0xff]  ;;  %v1469_v2 = vld [vmem:[#allocation7 + $0x50] sm:$0xff]  ;;  %v1472_v3 = vld [vmem:[#allocation7 + $0x68] sm:$0xff] }
 0x440   : > { %v5746_v11 = vpack.c.bf16 %v1374_v8, %v1372_v7  ;;  %v1624_v7 = vld [vmem:[#allocation7 + $0x2c0] sm:$0xff]  ;;  %v1626_v8 = vld [vmem:[#allocation7 + $0x2d0] sm:$0xff]  ;;  %v1474_v4 = vld [vmem:[#allocation7 + $0x78] sm:$0xff] }
 0x441   : > { %v5743_v13 = vpack.c.bf16 %v1375_v10, %v1373_v9  ;;  %v1629_v9 = vld [vmem:[#allocation7 + $0x2e8] sm:$0xff]  ;;  %v1631_v10 = vld [vmem:[#allocation7 + $0x2f8] sm:$0xff] }
 0x443   : > { %5745 = vmatprep.subr.msk.bf16.mxu1 %vm7905_vm5, %v5743_v13  ;;  %5869 = vmatprep.subr.msk.bf16.mxu0 %vm7905_vm5, %v5743_v13 }
 0x444   : > { %5748 = vmatpush1.bf16.msk.msra.mxu1 %vm7905_vm5, %v5746_v11  ;;  %5872 = vmatpush1.bf16.msk.msra.mxu0 %vm7905_vm5, %v5746_v11 }
 0x445   : > { %5751 = vmatprep.subr.msk.bf16.mxu1 %vm7905_vm5, %v5743_v13  ;;  %v5791_v13 = vpack.c.bf16 %v1631_v10, %v1629_v9  ;;  %v1476_v9 = vld [vmem:[#allocation7 + $0x88] sm:$0xff]  ;;  %v1478_v10 = vld [vmem:[#allocation7 + $0x98] sm:$0xff] }
 0x447   : > { %5489 = vmatmul.mubr.msk.f32.vlgmr.msra.gmra.mrb[0].mxu1 %vm1377_vm6, %v1376_v16  ;;  %5497 = vmatmul.mubr.msk.f32.vlgmr.msra.gmra.mrb[10].mxu0 %vm1377_vm6, %v1798_v17  ;;  %v1633_v16 = vld [vmem:[#allocation7 + $0x308] sm:$0xff]  ;;  %v1635_v17 = vld [vmem:[#allocation7 + $0x318] sm:$0xff] }
 0x448   : > { %5754 = vmatpush1.bf16.msk.msra.mxu1 %vm7905_vm5, %v5746_v11  ;;  %1584 = vmatprep.mubr.f32.mxu1 %v7258_v26  ;;  %v5789_v11 = vpack.c.bf16 %v1626_v8, %v1624_v7  ;;  %v5795_v19 = vpack.c.bf16 %v1635_v17, %v1633_v16  ;;  %v1471_v7 = vld [vmem:[#allocation7 + $0x60] sm:$0xff]  ;;  %v1473_v8 = vld [vmem:[#allocation7 + $0x70] sm:$0xff]  ;;  %v1480_v16 = vld [vmem:[#allocation7 + $0xa8] sm:$0xff] }
 0x449   : > { %5756 = vmatprep.subr.bf16.mxu1 %v5755_v18  ;;  %2098 = vmatprep.mubr.f32.mxu0 %v7258_v26  ;;  %v5793_v18 = vpack.c.bf16 %v1630_v15, %v1628_v14  ;;  %v1475_v14 = vld [vmem:[#allocation7 + $0x80] sm:$0xff]  ;;  %v1477_v15 = vld [vmem:[#allocation7 + $0x90] sm:$0xff]  ;;  %v1482_v17 = vld [vmem:[#allocation7 + $0xb8] sm:$0xff] }
 0x44b   : > { %5492 = vmatmul.mubr.msk.f32.vlgmr.msra.gmra.mrb[2].mxu1 %vm1377_vm6, %v1516_v23  ;;  %v1639_v23 = vld [vmem:[#allocation7 + $0x338] sm:$0xff] }
 0x44c   : > { %5758 = vmatpush1.bf16.msra.mxu1 %v5757_v24  ;;  %v5797_v24 = vpack.c.bf16 %v1634_v21, %v1632_v20  ;;  %v1479_v20 = vld [vmem:[#allocation7 + $0xa0] sm:$0xff]  ;;  %v1481_v21 = vld [vmem:[#allocation7 + $0xb0] sm:$0xff] }
 0x44d   : > { %5760 = vmatprep.subr.bf16.mxu1 %v5759_v25  ;;  %v5799_v25 = vpack.c.bf16 %v1639_v23, %v1637_v22  ;;  %v1484_v22 = vld [vmem:[#allocation7 + $0xc8] sm:$0xff]  ;;  %v1486_v23 = vld [vmem:[#allocation7 + $0xd8] sm:$0xff] }
 0x450   : > { %5762 = vmatpush1.bf16.msra.mxu1 %v5761_v31  ;;  %v5801_v31 = vpack.c.bf16 %v1638_v28, %v1636_v27  ;;  %v1483_v27 = vld [vmem:[#allocation7 + $0xc0] sm:$0xff]  ;;  %v1485_v28 = vld [vmem:[#allocation7 + $0xd0] sm:$0xff] }
 0x451   : > { %5764 = vmatprep.subr.bf16.mxu1 %v5763_v32  ;;  %v5803_v32 = vpack.c.bf16 %v1643_v30, %v1641_v29  ;;  %v1488_v29 = vld [vmem:[#allocation7 + $0xe8] sm:$0xff]  ;;  %v1490_v30 = vld [vmem:[#allocation7 + $0xf8] sm:$0xff] }
 0x454   : > { %5766 = vmatpush1.bf16.msra.mxu1 %v5765_v37  ;;  %v1647_v37 = vld [vmem:[#allocation7 + $0x378] sm:$0xff] }
 0x455   : > { %5768 = vmatprep.subr.bf16.mxu1 %v5767_v38  ;;  %v5807_v38 = vpack.c.bf16 %v1647_v37, %v1645_v36  ;;  %v1494_v36 = vld [vmem:[#allocation7 + $0x118] sm:$0xff]  ;;  %v5841_v37 = vpack.c.bf16 %v1489_v34, %v1487_v33 }
 0x456   : > { %v1889_v33 = vld [vmem:[#allocation7 + $0x3f8] sm:$0xff] }
 0x458   : > { %5770 = vmatpush1.bf16.msra.mxu1 %v5769_v43  ;;  %v1462_v43 = vld [vmem:[#allocation7 + $0x18] sm:$0xff] }
 0x459   : > { %5772 = vmatprep.subr.bf16.mxu1 %v5771_v44  ;;  %v5811_v44 = vpack.c.bf16 %v1462_v43, %v1460_v42  ;;  %v1498_v42 = vld [vmem:[#allocation7 + $0x138] sm:$0xff]  ;;  %v5845_v43 = vpack.c.bf16 %v1493_v40, %v1491_v39 }
 0x45a   : > { %v1893_v39 = vld [vmem:[#allocation7 + $0x418] sm:$0xff] }
 0x45c   : > { %5774 = vmatpush1.bf16.msra.mxu1 %v5773_v49  ;;  %v1461_v49 = vld [vmem:[#allocation7 + $0x10] sm:$0xff] }
 0x45d   : > { %5776 = vmatprep.subr.bf16.mxu1 %v5775_v50  ;;  %v5813_v54 = vpack.c.bf16 %v1461_v49, %v1459_v48  ;;  %v1497_v48 = vld [vmem:[#allocation7 + $0x130] sm:$0xff]  ;;  %v1500_v49 = vld [vmem:[#allocation7 + $0x148] sm:$0xff] }
 0x460   : > { %5778 = vmatpush1.bf16.msra.mxu1 %v5777_v55 }
 0x461   : > { %5780 = vmatprep.subr.bf16.mxu1 %v5779_v56  ;;  %v5815_v56 = vpack.c.bf16 %v1466_v52, %v1464_v51  ;;  %v1502_v51 = vld [vmem:[#allocation7 + $0x158] sm:$0xff] }
 0x464   : > { %5782 = vmatpush1.bf16.msra.mxu1 %v5781_v63  ;;  %v5817_v63 = vpack.c.bf16 %v1465_v59, %v1463_v57  ;;  %v1506_v57 = vld [vmem:[#allocation7 + $0x178] sm:$0xff] }
 0x465   : > { %5784 = vmatprep.subr.bf16.mxu1 %v5783_v0  ;;  %v5819_v0 = vpack.c.bf16 %v1470_v62, %v1468_v61  ;;  %v1503_v62 = vld [vmem:[#allocation7 + $0x160] sm:$0xff] }
 0x468   : > { %5786 = vmatpush1.bf16.msra.mxu1 %v5785_v5  ;;  %v5821_v5 = vpack.c.bf16 %v1469_v2, %v1467_v1  ;;  %v1510_v1 = vld [vmem:[#allocation7 + $0x198] sm:$0xff] }
 0x469   : > { %5788 = vmatprep.subr.bf16.mxu1 %v5787_v6  ;;  %v5823_v6 = vpack.c.bf16 %v1474_v4, %v1472_v3  ;;  %v1507_v4 = vld [vmem:[#allocation7 + $0x180] sm:$0xff] }
 0x46c   : > { %5790 = vmatpush1.bf16.msra.mxu1 %v5789_v11  ;;  %v5825_v11 = vpack.c.bf16 %v1473_v8, %v1471_v7  ;;  %v1514_v7 = vld [vmem:[#allocation7 + $0x1b8] sm:$0xff] }
 0x46d   : > { %5792 = vmatprep.subr.bf16.mxu1 %v5791_v13  ;;  %v5827_v13 = vpack.c.bf16 %v1478_v10, %v1476_v9  ;;  %v1511_v10 = vld [vmem:[#allocation7 + $0x1a0] sm:$0xff] }
 0x470   : > { %5794 = vmatpush1.bf16.msra.mxu1 %v5793_v18  ;;  %v5829_v18 = vpack.c.bf16 %v1477_v15, %v1475_v14  ;;  %v1877_v14 = vld [vmem:[#allocation7 + $0x398] sm:$0xff] }
 0x471   : > { %5796 = vmatprep.subr.bf16.mxu1 %v5795_v19  ;;  %v5831_v19 = vpack.c.bf16 %v1482_v17, %v1480_v16  ;;  %v1874_v17 = vld [vmem:[#allocation7 + $0x380] sm:$0xff] }
 0x474   : > { %5798 = vmatpush1.bf16.msra.mxu1 %v5797_v24  ;;  %v5833_v24 = vpack.c.bf16 %v1481_v21, %v1479_v20  ;;  %v1881_v20 = vld [vmem:[#allocation7 + $0x3b8] sm:$0xff] }
 0x475   : > { %5800 = vmatprep.subr.bf16.mxu1 %v5799_v25  ;;  %v5835_v25 = vpack.c.bf16 %v1486_v23, %v1484_v22  ;;  %v1878_v23 = vld [vmem:[#allocation7 + $0x3a0] sm:$0xff] }
 0x478   : > { %5802 = vmatpush1.bf16.msra.mxu1 %v5801_v31  ;;  %v5837_v31 = vpack.c.bf16 %v1485_v28, %v1483_v27  ;;  %v1885_v27 = vld [vmem:[#allocation7 + $0x3d8] sm:$0xff] }
 0x479   : > { %5804 = vmatprep.subr.bf16.mxu1 %v5803_v32  ;;  %v5839_v32 = vpack.c.bf16 %v1490_v30, %v1488_v29  ;;  %v1882_v30 = vld [vmem:[#allocation7 + $0x3c0] sm:$0xff] }
 0x47c   : > { %5806 = vmatpush1.bf16.msra.mxu1 %v5805_v35  ;;  %v1492_v35 = vld [vmem:[#allocation7 + $0x108] sm:$0xff] }
 0x47d   : > { %5808 = vmatprep.subr.bf16.mxu1 %v5807_v38  ;;  %v5843_v38 = vpack.c.bf16 %v1494_v36, %v1492_v35  ;;  %v1886_v36 = vld [vmem:[#allocation7 + $0x3e0] sm:$0xff] }
 0x480   : > { %5810 = vmatpush1.bf16.msra.mxu1 %v5809_v41  ;;  %v1496_v41 = vld [vmem:[#allocation7 + $0x128] sm:$0xff] }
 0x481   : > { %5812 = vmatprep.subr.bf16.mxu1 %v5811_v44  ;;  %v5847_v44 = vpack.c.bf16 %v1498_v42, %v1496_v41  ;;  %v1890_v41 = vld [vmem:[#allocation7 + $0x400] sm:$0xff]  ;;  %v1895_v42 = vld [vmem:[#allocation7 + $0x428] sm:$0xff] }
 0x51a   : > { %v7926_v45 = vpop.f32.mrb[0].mxu1  ;;  %v7928_v46 = vpop.f32.mrb[10].mxu0 }
 0x51b   : > { %v1456_v47 = vpop.f32.mrb[1].mxu1  ;;  %v7930_v50 = vpop.f32.mrb[11].mxu0 }
 0x51e   : > { %v1586_v53 = vpop.f32.mrb[2].mxu1 }
 0x51f   : > { %v1588_v55 = vpop.f32.mrb[3].mxu1 }
 0x520   : > { %5493 = vmatprep.mubr.msk.f32.mxu1 %vm1648_vm7, %v1588_v55  ;;  %v1501_v55 = vld [vmem:[#allocation7 + $0x150] sm:$0xff] }
 0x521   : > { %1717 = vmatmul.mubr.f32.vlgmr.msra.gmra.mrb[4].mxu1 %v1586_v53  ;;  %v5851_v53 = vpack.c.bf16 %v1502_v51, %v1500_v49  ;;  %v1896_v49 = vld [vmem:[#allocation7 + $0x430] sm:$0xff]  ;;  %v1899_v51 = vld [vmem:[#allocation7 + $0x448] sm:$0xff] }
 0x522   : > { %5814 = vmatpush1.bf16.msra.mxu1 %v5813_v54  ;;  %5494 = vmatprep.mubr.msk.f32.mxu1 %vm1648_vm7, %v1456_v47  ;;  %v1495_v47 = vld [vmem:[#allocation7 + $0x120] sm:$0xff] }
 0x523   : > { %5816 = vmatprep.subr.bf16.mxu1 %v5815_v56  ;;  %v5849_v52 = vpack.c.bf16 %v1497_v48, %v1495_v47  ;;  %v1499_v54 = vld [vmem:[#allocation7 + $0x140] sm:$0xff]  ;;  %v1504_v56 = vld [vmem:[#allocation7 + $0x168] sm:$0xff] }
 0x524   : > { %v5853_v59 = vpack.c.bf16 %v1501_v55, %v1499_v54  ;;  %v5855_v61 = vpack.c.bf16 %v1506_v57, %v1504_v56  ;;  %v1894_v48 = vld [vmem:[#allocation7 + $0x420] sm:$0xff]  ;;  %v1900_v56 = vld [vmem:[#allocation7 + $0x450] sm:$0xff]  ;;  %v1903_v57 = vld [vmem:[#allocation7 + $0x468] sm:$0xff] }
 0x525   : > { %v1898_v55 = vld [vmem:[#allocation7 + $0x440] sm:$0xff] }
 0x526   : > { %5818 = vmatpush1.bf16.msra.mxu1 %v5817_v63  ;;  %v1505_v63 = vld [vmem:[#allocation7 + $0x170] sm:$0xff] }
 0x527   : > { %5820 = vmatprep.subr.bf16.mxu1 %v5819_v0  ;;  %v1508_v0 = vld [vmem:[#allocation7 + $0x188] sm:$0xff]  ;;  %v5857_v2 = vpack.c.bf16 %v1505_v63, %v1503_v62  ;;  %v1902_v63 = vld [vmem:[#allocation7 + $0x460] sm:$0xff] }
 0x528   : > { %v5859_v3 = vpack.c.bf16 %v1510_v1, %v1508_v0  ;;  %v1904_v0 = vld [vmem:[#allocation7 + $0x470] sm:$0xff]  ;;  %v1907_v1 = vld [vmem:[#allocation7 + $0x488] sm:$0xff] }
 0x52a   : > { %5822 = vmatpush1.bf16.msra.mxu1 %v5821_v5  ;;  %v1509_v5 = vld [vmem:[#allocation7 + $0x190] sm:$0xff] }
 0x52b   : > { %5824 = vmatprep.subr.bf16.mxu1 %v5823_v6  ;;  %v1512_v6 = vld [vmem:[#allocation7 + $0x1a8] sm:$0xff]  ;;  %v5861_v8 = vpack.c.bf16 %v1509_v5, %v1507_v4  ;;  %v1906_v5 = vld [vmem:[#allocation7 + $0x480] sm:$0xff] }
 0x52c   : > { %v5863_v9 = vpack.c.bf16 %v1514_v7, %v1512_v6  ;;  %v1908_v6 = vld [vmem:[#allocation7 + $0x490] sm:$0xff]  ;;  %v1911_v7 = vld [vmem:[#allocation7 + $0x4a8] sm:$0xff] }
 0x52e   : > { %5826 = vmatpush1.bf16.msra.mxu1 %v5825_v11  ;;  %v1513_v11 = vld [vmem:[#allocation7 + $0x1b0] sm:$0xff] }
 0x52f   : > { %5828 = vmatprep.subr.bf16.mxu1 %v5827_v13  ;;  %v1875_v13 = vld [vmem:[#allocation7 + $0x388] sm:$0xff]  ;;  %v5865_v15 = vpack.c.bf16 %v1513_v11, %v1511_v10  ;;  %v1910_v11 = vld [vmem:[#allocation7 + $0x4a0] sm:$0xff] }
 0x530   : > { %v5873_v16 = vpack.c.bf16 %v1877_v14, %v1875_v13  ;;  %v1912_v13 = vld [vmem:[#allocation7 + $0x4b0] sm:$0xff]  ;;  %v1915_v14 = vld [vmem:[#allocation7 + $0x4c8] sm:$0xff] }
 0x532   : > { %5830 = vmatpush1.bf16.msra.mxu1 %v5829_v18  ;;  %v1876_v18 = vld [vmem:[#allocation7 + $0x390] sm:$0xff] }
 0x533   : > { %5832 = vmatprep.subr.bf16.mxu1 %v5831_v19  ;;  %v1879_v19 = vld [vmem:[#allocation7 + $0x3a8] sm:$0xff]  ;;  %v5875_v21 = vpack.c.bf16 %v1876_v18, %v1874_v17  ;;  %v1914_v18 = vld [vmem:[#allocation7 + $0x4c0] sm:$0xff] }
 0x534   : > { %v5877_v22 = vpack.c.bf16 %v1881_v20, %v1879_v19  ;;  %v1916_v19 = vld [vmem:[#allocation7 + $0x4d0] sm:$0xff]  ;;  %v1919_v20 = vld [vmem:[#allocation7 + $0x4e8] sm:$0xff] }
 0x536   : > { %5834 = vmatpush1.bf16.msra.mxu1 %v5833_v24  ;;  %v1880_v24 = vld [vmem:[#allocation7 + $0x3b0] sm:$0xff] }
 0x537   : > { %5836 = vmatprep.subr.bf16.mxu1 %v5835_v25  ;;  %v1883_v25 = vld [vmem:[#allocation7 + $0x3c8] sm:$0xff]  ;;  %v5879_v28 = vpack.c.bf16 %v1880_v24, %v1878_v23  ;;  %v1918_v24 = vld [vmem:[#allocation7 + $0x4e0] sm:$0xff] }
 0x538   : > { %v5881_v29 = vpack.c.bf16 %v1885_v27, %v1883_v25  ;;  %v1920_v25 = vld [vmem:[#allocation7 + $0x4f0] sm:$0xff]  ;;  %v1923_v27 = vld [vmem:[#allocation7 + $0x508] sm:$0xff] }
 0x53a   : > { %5838 = vmatpush1.bf16.msra.mxu1 %v5837_v31  ;;  %v1884_v31 = vld [vmem:[#allocation7 + $0x3d0] sm:$0xff] }
 0x53b   : > { %5840 = vmatprep.subr.bf16.mxu1 %v5839_v32  ;;  %v1887_v32 = vld [vmem:[#allocation7 + $0x3e8] sm:$0xff]  ;;  %v5883_v34 = vpack.c.bf16 %v1884_v31, %v1882_v30  ;;  %v1922_v31 = vld [vmem:[#allocation7 + $0x500] sm:$0xff] }
 0x53c   : > { %v5885_v35 = vpack.c.bf16 %v1889_v33, %v1887_v32  ;;  %v1924_v32 = vld [vmem:[#allocation7 + $0x510] sm:$0xff]  ;;  %v1927_v33 = vld [vmem:[#allocation7 + $0x528] sm:$0xff] }
 0x53e   : > { %5842 = vmatpush1.bf16.msra.mxu1 %v5841_v37  ;;  %v1888_v37 = vld [vmem:[#allocation7 + $0x3f0] sm:$0xff] }
 0x53f   : > { %5844 = vmatprep.subr.bf16.mxu1 %v5843_v38  ;;  %v1891_v38 = vld [vmem:[#allocation7 + $0x408] sm:$0xff] }
 0x540   : > { %v5889_v40 = vpack.c.bf16 %v1893_v39, %v1891_v38  ;;  %v1928_v38 = vld [vmem:[#allocation7 + $0x530] sm:$0xff] }
 0x542   : > { %5846 = vmatpush1.bf16.msra.mxu1 %v5845_v43  ;;  %v1897_v43 = vld [vmem:[#allocation7 + $0x438] sm:$0xff] }
 0x543   : > { %5848 = vmatprep.subr.bf16.mxu1 %v5847_v44  ;;  %v5893_v47 = vpack.c.bf16 %v1897_v43, %v1895_v42 }
 0x546   : > { %5850 = vmatpush1.bf16.msra.mxu1 %v5849_v52  ;;  %v1901_v52 = vld [vmem:[#allocation7 + $0x458] sm:$0xff] }
 0x547   : > { %5852 = vmatprep.subr.bf16.mxu1 %v5851_v53  ;;  %v5895_v53 = vpack.c.bf16 %v1896_v49, %v1894_v48  ;;  %v5897_v54 = vpack.c.bf16 %v1901_v52, %v1899_v51  ;;  %v2022_v49 = vld [vmem:[#allocation10] sm:$0x3]  ;;  %v2211_v51 = vld [vmem:[#allocation12 + $0xe8] sm:$0xff]  ;;  %v2134_v52 = vld [vmem:[#allocation10 + $0x2] sm:$0x3] }
 0x54a   : > { %5854 = vmatpush1.bf16.msra.mxu1 %v5853_v59  ;;  %v1905_v59 = vld [vmem:[#allocation7 + $0x478] sm:$0xff] }
 0x54b   : > { %5856 = vmatprep.subr.bf16.mxu1 %v5855_v61  ;;  %v5899_v61 = vpack.c.bf16 %v1900_v56, %v1898_v55  ;;  %v5901_v62 = vpack.c.bf16 %v1905_v59, %v1903_v57  ;;  %v2212_v55 = vld [vmem:[#allocation12 + $0xf0] sm:$0xff]  ;;  %v2213_v56 = vld [vmem:[#allocation12 + $0xf8] sm:$0xff]  ;;  %v2214_v59 = vld [vmem:[#allocation12 + $0x100] sm:$0xff] }
 0x54c   : > { %v5933_v57 = vpack.c.bf16 %v2213_v56, %v2212_v55  ;;  %v2114_v55 = vld [vmem:[#allocation12 + $0x48] sm:$0xff] }
 0x54e   : > { %5858 = vmatpush1.bf16.msra.mxu1 %v5857_v2  ;;  %v1909_v2 = vld [vmem:[#allocation7 + $0x498] sm:$0xff] }
 0x54f   : > { %5860 = vmatprep.subr.bf16.mxu1 %v5859_v3  ;;  %v5903_v3 = vpack.c.bf16 %v1904_v0, %v1902_v63  ;;  %v5905_v4 = vpack.c.bf16 %v1909_v2, %v1907_v1  ;;  %v2216_v63 = vld [vmem:[#allocation12 + $0x110] sm:$0xff]  ;;  %v2217_v0 = vld [vmem:[#allocation12 + $0x118] sm:$0xff]  ;;  %v2218_v2 = vld [vmem:[#allocation12 + $0x120] sm:$0xff] }
 0x550   : > { %v5939_v1 = vpack.c.bf16 %v2217_v0, %v2216_v63  ;;  %v2118_v63 = vld [vmem:[#allocation12 + $0x68] sm:$0xff] }
 0x552   : > { %5862 = vmatpush1.bf16.msra.mxu1 %v5861_v8  ;;  %v1913_v8 = vld [vmem:[#allocation7 + $0x4b8] sm:$0xff] }
 0x553   : > { %5864 = vmatprep.subr.bf16.mxu1 %v5863_v9  ;;  %v5907_v9 = vpack.c.bf16 %v1908_v6, %v1906_v5  ;;  %v5909_v10 = vpack.c.bf16 %v1913_v8, %v1911_v7  ;;  %v2220_v5 = vld [vmem:[#allocation12 + $0x130] sm:$0xff]  ;;  %v2221_v6 = vld [vmem:[#allocation12 + $0x138] sm:$0xff]  ;;  %v2222_v8 = vld [vmem:[#allocation12 + $0x140] sm:$0xff] }
 0x554   : > { %v5945_v7 = vpack.c.bf16 %v2221_v6, %v2220_v5  ;;  %v2122_v5 = vld [vmem:[#allocation12 + $0x88] sm:$0xff] }
 0x556   : > { %5866 = vmatpush1.bf16.msra.mxu1 %v5865_v15  ;;  %v1917_v15 = vld [vmem:[#allocation7 + $0x4d8] sm:$0xff] }
 0x557   : > { %5874 = vmatprep.subr.bf16.mxu1 %v5873_v16  ;;  %v5911_v16 = vpack.c.bf16 %v1912_v13, %v1910_v11  ;;  %v5913_v17 = vpack.c.bf16 %v1917_v15, %v1915_v14  ;;  %v2224_v11 = vld [vmem:[#allocation12 + $0x150] sm:$0xff]  ;;  %v2225_v13 = vld [vmem:[#allocation12 + $0x158] sm:$0xff]  ;;  %v2226_v15 = vld [vmem:[#allocation12 + $0x160] sm:$0xff] }
 0x558   : > { %v5951_v14 = vpack.c.bf16 %v2225_v13, %v2224_v11  ;;  %v2126_v11 = vld [vmem:[#allocation12 + $0xa8] sm:$0xff] }
 0x559   : > { %1791 = vmatmul.mubr.f32.vlgmr.msra.gmra.mrb[4].mxu1 %v7926_v45  ;;  %v5887_v45 = vpack.c.bf16 %v1888_v37, %v1886_v36  ;;  %v1926_v37 = vld [vmem:[#allocation7 + $0x520] sm:$0xff] }
 0x55a   : > { %5876 = vmatpush1.bf16.msra.mxu1 %v5875_v21  ;;  %5498 = vmatprep.mubr.msk.f32.mxu1 %vm1648_vm7, %v7930_v50  ;;  %v1892_v50 = vld [vmem:[#allocation7 + $0x410] sm:$0xff]  ;;  %v1921_v21 = vld [vmem:[#allocation7 + $0x4f8] sm:$0xff]  ;;  %v5927_v39 = vpack.c.bf16 %v1928_v38, %v1926_v37 }
 0x55b   : > { %5878 = vmatprep.subr.bf16.mxu1 %v5877_v22  ;;  %v5891_v44 = vpack.c.bf16 %v1892_v50, %v1890_v41  ;;  %v5915_v22 = vpack.c.bf16 %v1916_v19, %v1914_v18  ;;  %v5917_v23 = vpack.c.bf16 %v1921_v21, %v1919_v20  ;;  %v2228_v18 = vld [vmem:[#allocation12 + $0x170] sm:$0xff]  ;;  %v2229_v19 = vld [vmem:[#allocation12 + $0x178] sm:$0xff]  ;;  %v2230_v21 = vld [vmem:[#allocation12 + $0x180] sm:$0xff] }
 0x55c   : > { %v5957_v20 = vpack.c.bf16 %v2229_v19, %v2228_v18  ;;  %v2105_v37 = vld [vmem:[#allocation12] sm:$0xff]  ;;  %v2106_v38 = vld [vmem:[#allocation12 + $0x8] sm:$0xff] }
 0x55d   : > { %v2130_v18 = vld [vmem:[#allocation12 + $0xc8] sm:$0xff] }
 0x55e   : > { %5880 = vmatpush1.bf16.msra.mxu1 %v5879_v28  ;;  %v1925_v28 = vld [vmem:[#allocation7 + $0x518] sm:$0xff] }
 0x55f   : > { %5882 = vmatprep.subr.bf16.mxu1 %v5881_v29  ;;  %v5919_v29 = vpack.c.bf16 %v1920_v25, %v1918_v24  ;;  %v5921_v30 = vpack.c.bf16 %v1925_v28, %v1923_v27  ;;  %v2232_v24 = vld [vmem:[#allocation12 + $0x190] sm:$0xff]  ;;  %v2233_v25 = vld [vmem:[#allocation12 + $0x198] sm:$0xff]  ;;  %v2234_v28 = vld [vmem:[#allocation12 + $0x1a0] sm:$0xff] }
 0x560   : > { %v5963_v27 = vpack.c.bf16 %v2233_v25, %v2232_v24  ;;  %v2462_v24 = vld [vmem:[#allocation12 + $0x1c8] sm:$0xff]  ;;  %v2385_v25 = vld [vmem:[#allocation10 + $0x4] sm:$0x3] }
 0x562   : > { %5884 = vmatpush1.bf16.msra.mxu1 %v5883_v34  ;;  %v1929_v34 = vld [vmem:[#allocation7 + $0x538] sm:$0xff] }
 0x563   : > { %5886 = vmatprep.subr.bf16.mxu1 %v5885_v35  ;;  %v5923_v35 = vpack.c.bf16 %v1924_v32, %v1922_v31  ;;  %v5925_v36 = vpack.c.bf16 %v1929_v34, %v1927_v33  ;;  %v2236_v31 = vld [vmem:[#allocation12 + $0x1b0] sm:$0xff]  ;;  %v2237_v32 = vld [vmem:[#allocation12 + $0x1b8] sm:$0xff] }
 0x564   : > { %v5969_v33 = vpack.c.bf16 %v2237_v32, %v2236_v31  ;;  %v2564_v34 = vld [vmem:[#allocation10 + $0x6] sm:$0x3]  ;;  %v2465_v31 = vld [vmem:[#allocation12 + $0x1e0] sm:$0xff]  ;;  %v2466_v32 = vld [vmem:[#allocation12 + $0x1e8] sm:$0xff] }
 0x566   : > { %5888 = vmatpush1.bf16.msra.mxu1 %v5887_v45  ;;  %v2006_v45 = vld [vmem:[#allocation9] sm:$0x3] }
 0x567   : > { %5890 = vmatprep.subr.bf16.mxu1 %v5889_v40  ;;  %v2011_v40 = vrot.slane %v2006_v45, %v7898_v58  ;;  %v2015_v41 = vrot.slane %v2006_v45, %v7900_v60  ;;  %v5972_v45 = vpack.c.bf16 %v2106_v38, %v2105_v37  ;;  %v2469_v37 = vld [vmem:[#allocation12 + $0x200] sm:$0xff]  ;;  %v2470_v38 = vld [vmem:[#allocation12 + $0x208] sm:$0xff] }
 0x56a   : > { %5892 = vmatpush1.bf16.msra.mxu1 %v5891_v44 }
 0x56b   : > { %5894 = vmatprep.subr.bf16.mxu1 %v5893_v47 }
 0x56e   : > { %5896 = vmatpush1.bf16.msra.mxu1 %v5895_v53 }
 0x56f   : > { %5898 = vmatprep.subr.bf16.mxu1 %v5897_v54  ;;  %v7259_v54 = vmov 0.0|0.0  }
 0x572   : > { %5900 = vmatpush1.bf16.msra.mxu1 %v5899_v61  ;;  %v2215_v61 = vld [vmem:[#allocation12 + $0x108] sm:$0xff] }
 0x573   : > { %5902 = vmatprep.subr.bf16.mxu1 %v5901_v62  ;;  %v5936_v62 = vpack.c.bf16 %v2215_v61, %v2214_v59  ;;  %v2116_v59 = vld [vmem:[#allocation12 + $0x58] sm:$0xff] }
 0x576   : > { %5904 = vmatpush1.bf16.msra.mxu1 %v5903_v3  ;;  %v2219_v3 = vld [vmem:[#allocation12 + $0x128] sm:$0xff] }
 0x577   : > { %5906 = vmatprep.subr.bf16.mxu1 %v5905_v4  ;;  %v5942_v4 = vpack.c.bf16 %v2219_v3, %v2218_v2  ;;  %v2120_v2 = vld [vmem:[#allocation12 + $0x78] sm:$0xff] }
 0x57a   : > { %5908 = vmatpush1.bf16.msra.mxu1 %v5907_v9  ;;  %v2223_v9 = vld [vmem:[#allocation12 + $0x148] sm:$0xff] }
 0x57b   : > { %5910 = vmatprep.subr.bf16.mxu1 %v5909_v10  ;;  %v5948_v10 = vpack.c.bf16 %v2223_v9, %v2222_v8  ;;  %v2124_v8 = vld [vmem:[#allocation12 + $0x98] sm:$0xff] }
 0x57e   : > { %5912 = vmatpush1.bf16.msra.mxu1 %v5911_v16  ;;  %v2227_v16 = vld [vmem:[#allocation12 + $0x168] sm:$0xff] }
 0x57f   : > { %5914 = vmatprep.subr.bf16.mxu1 %v5913_v17  ;;  %v5954_v17 = vpack.c.bf16 %v2227_v16, %v2226_v15  ;;  %v2128_v15 = vld [vmem:[#allocation12 + $0xb8] sm:$0xff] }
 0x582   : > { %5916 = vmatpush1.bf16.msra.mxu1 %v5915_v22  ;;  %v2231_v22 = vld [vmem:[#allocation12 + $0x188] sm:$0xff] }
 0x583   : > { %5918 = vmatprep.subr.bf16.mxu1 %v5917_v23  ;;  %v5960_v23 = vpack.c.bf16 %v2231_v22, %v2230_v21  ;;  %v2132_v21 = vld [vmem:[#allocation12 + $0xd8] sm:$0xff] }
 0x586   : > { %5920 = vmatpush1.bf16.msra.mxu1 %v5919_v29  ;;  %v2235_v29 = vld [vmem:[#allocation12 + $0x1a8] sm:$0xff] }
 0x587   : > { %5922 = vmatprep.subr.bf16.mxu1 %v5921_v30  ;;  %v5966_v30 = vpack.c.bf16 %v2235_v29, %v2234_v28  ;;  %v2463_v28 = vld [vmem:[#allocation12 + $0x1d0] sm:$0xff]  ;;  %v2464_v29 = vld [vmem:[#allocation12 + $0x1d8] sm:$0xff] }
 0x58a   : > { %5924 = vmatpush1.bf16.msra.mxu1 %v5923_v35 }
 0x58b   : > { %5926 = vmatprep.subr.bf16.mxu1 %v5925_v36 }
 0x58e   : > { %5928 = vmatpush1.bf16.msra.mxu1 %v5927_v39 }
 0x591   : > { %1998 = vmatmul.mubr.f32.vlgmr.msra.gmra.mrb[4].mxu1 %v7928_v46  ;;  %v2210_v46 = vld [vmem:[#allocation12 + $0xe0] sm:$0xff] }
 0x592   : > { %2632 = vmatprep.mubr.f32.mxu1 %v7258_v26  ;;  %v5930_v53 = vpack.c.bf16 %v2211_v51, %v2210_v46  ;;  %v2111_v46 = vld [vmem:[#allocation12 + $0x30] sm:$0xff]  ;;  %v2112_v51 = vld [vmem:[#allocation12 + $0x38] sm:$0xff] }
 0x664   : > { %v1999_v50 = vpop.f32.mrb[4].mxu1 }
 0x665   : > { %v2018_v42 = vadd.f32 %v2011_v40, %v1999_v50  ;;  %v2001_v43 = vpop.f32.mrb[5].mxu1  ;;  %v2108_v50 = vld [vmem:[#allocation12 + $0x18] sm:$0xff] }
 0x666   : > { %v2019_v44 = vadd.f32 %v2015_v41, %v2001_v43  ;;  %v2107_v41 = vld [vmem:[#allocation12 + $0x10] sm:$0xff]  ;;  %v2109_v43 = vld [vmem:[#allocation12 + $0x20] sm:$0xff] }
 0x667   : > { %v7943_v48 = vmax.f32 %v2018_v42, 0.0  ;;  %v5975_v42 = vpack.c.bf16 %v2108_v50, %v2107_v41  ;;  %v2473_v50 = vld [vmem:[#allocation12 + $0x220] sm:$0xff] }
 0x668   : > { %v7941_v47 = vmax.f32 %v2019_v44, 0.0  ;;  %v2110_v44 = vld [vmem:[#allocation12 + $0x28] sm:$0xff] }
 0x66a   : > { %5499 = vmatprep.subr.msk.mxu0 %vm2027_vm8, %v7941_v47  ;;  %5511 = vmatprep.subr.msk.mxu1 %vm2027_vm8, %v7941_v47 }
 0x66b   : > { %5500 = vmatpush1.msk.msra.mxu0 %vm2027_vm8, %v7943_v48  ;;  %5512 = vmatpush1.msk.msra.mxu1 %vm2027_vm8, %v7943_v48 }
 0x66c   : > { %5501 = vmatmul.mubr.msk.f32.vlgmr.msra.gmra.mrb[12].mxu0 %vm2023_vm9, %v2022_v49  ;;  %5502 = vmatprep.subr.msk.mxu0 %vm2027_vm8, %v7941_v47  ;;  %v5978_v49 = vpack.c.bf16 %v2110_v44, %v2109_v43  ;;  %v2475_v44 = vld [vmem:[#allocation12 + $0x230] sm:$0xff] }
 0x66d   : > { %5503 = vmatpush1.msk.msra.mxu0 %vm2027_vm8, %v7943_v48  ;;  %2202 = vmatprep.mubr.f32.mxu0 %v7258_v26 }
 0x66e   : > { %5929 = vmatprep.subr.bf16.mxu0 %v7259_v54  ;;  %6055 = vmatprep.subr.bf16.mxu1 %v7259_v54 }
 0x66f   : > { %5513 = vmatmul.mubr.msk.f32.vlgmr.msra.gmra.mrb[6].mxu1 %vm2023_vm9, %v2564_v34  ;;  %v2467_v34 = vld [vmem:[#allocation12 + $0x1f0] sm:$0xff] }
 0x670   : > { %5504 = vmatmul.mubr.msk.f32.vlgmr.msra.gmra.mrb[14].mxu0 %vm2023_vm9, %v2134_v52  ;;  %v5981_v52 = vpack.c.bf16 %v2112_v51, %v2111_v46  ;;  %v2640_v46 = vld [vmem:[#allocation12 + $0x2a0] sm:$0xff]  ;;  %v2641_v51 = vld [vmem:[#allocation12 + $0x2a8] sm:$0xff] }
 0x671   : > { %5931 = vmatpush1.bf16.msra.mxu0 %v5930_v53  ;;  %v2113_v53 = vld [vmem:[#allocation12 + $0x40] sm:$0xff] }
 0x672   : > { %5932 = vmatprep.subr.bf16.mxu0 %v7259_v54  ;;  %v5984_v56 = vpack.c.bf16 %v2114_v55, %v2113_v53  ;;  %v6056_v55 = vpack.c.bf16 %v2641_v51, %v2640_v46  ;;  %v2666_v46 = vld [vmem:[#allocation12 + $0x370] sm:$0xff]  ;;  %v2667_v51 = vld [vmem:[#allocation12 + $0x378] sm:$0xff] }
 0x674   : > { %6057 = vmatpush1.bf16.msra.mxu1 %v6056_v55 }
 0x675   : > { %5934 = vmatpush1.bf16.msra.mxu0 %v5933_v57  ;;  %v2115_v57 = vld [vmem:[#allocation12 + $0x50] sm:$0xff]  ;;  %6058 = vmatprep.subr.bf16.mxu1 %v7259_v54 }
 0x676   : > { %5935 = vmatprep.subr.bf16.mxu0 %v7259_v54  ;;  %v5987_v61 = vpack.c.bf16 %v2116_v59, %v2115_v57  ;;  %v2477_v57 = vld [vmem:[#allocation12 + $0x240] sm:$0xff]  ;;  %v2478_v59 = vld [vmem:[#allocation12 + $0x248] sm:$0xff] }
 0x679   : > { %5937 = vmatpush1.bf16.msra.mxu0 %v5936_v62  ;;  %v2117_v62 = vld [vmem:[#allocation12 + $0x60] sm:$0xff] }
 0x67a   : > { %5938 = vmatprep.subr.bf16.mxu0 %v7259_v54  ;;  %v5990_v0 = vpack.c.bf16 %v2118_v63, %v2117_v62  ;;  %v2644_v62 = vld [vmem:[#allocation12 + $0x2c0] sm:$0xff]  ;;  %v2645_v63 = vld [vmem:[#allocation12 + $0x2c8] sm:$0xff] }
 0x67d   : > { %5940 = vmatpush1.bf16.msra.mxu0 %v5939_v1  ;;  %v2119_v1 = vld [vmem:[#allocation12 + $0x70] sm:$0xff] }
 0x67e   : > { %5941 = vmatprep.subr.bf16.mxu0 %v7259_v54  ;;  %v5993_v3 = vpack.c.bf16 %v2120_v2, %v2119_v1  ;;  %v2479_v1 = vld [vmem:[#allocation12 + $0x250] sm:$0xff]  ;;  %v2480_v2 = vld [vmem:[#allocation12 + $0x258] sm:$0xff] }
 0x681   : > { %5943 = vmatpush1.bf16.msra.mxu0 %v5942_v4  ;;  %v2121_v4 = vld [vmem:[#allocation12 + $0x80] sm:$0xff] }
 0x682   : > { %5944 = vmatprep.subr.bf16.mxu0 %v7259_v54  ;;  %v5996_v6 = vpack.c.bf16 %v2122_v5, %v2121_v4  ;;  %v2646_v4 = vld [vmem:[#allocation12 + $0x2d0] sm:$0xff]  ;;  %v2647_v5 = vld [vmem:[#allocation12 + $0x2d8] sm:$0xff] }
 0x685   : > { %5946 = vmatpush1.bf16.msra.mxu0 %v5945_v7  ;;  %v2123_v7 = vld [vmem:[#allocation12 + $0x90] sm:$0xff] }
 0x686   : > { %5947 = vmatprep.subr.bf16.mxu0 %v7259_v54  ;;  %v5999_v9 = vpack.c.bf16 %v2124_v8, %v2123_v7  ;;  %v2481_v7 = vld [vmem:[#allocation12 + $0x260] sm:$0xff]  ;;  %v2482_v8 = vld [vmem:[#allocation12 + $0x268] sm:$0xff] }
 0x689   : > { %5949 = vmatpush1.bf16.msra.mxu0 %v5948_v10  ;;  %v2125_v10 = vld [vmem:[#allocation12 + $0xa0] sm:$0xff] }
 0x68a   : > { %5950 = vmatprep.subr.bf16.mxu0 %v7259_v54  ;;  %v6002_v13 = vpack.c.bf16 %v2126_v11, %v2125_v10  ;;  %v2648_v10 = vld [vmem:[#allocation12 + $0x2e0] sm:$0xff]  ;;  %v2649_v11 = vld [vmem:[#allocation12 + $0x2e8] sm:$0xff] }
 0x68d   : > { %5952 = vmatpush1.bf16.msra.mxu0 %v5951_v14  ;;  %v2127_v14 = vld [vmem:[#allocation12 + $0xb0] sm:$0xff] }
 0x68e   : > { %5953 = vmatprep.subr.bf16.mxu0 %v7259_v54  ;;  %v6005_v16 = vpack.c.bf16 %v2128_v15, %v2127_v14  ;;  %v2483_v14 = vld [vmem:[#allocation12 + $0x270] sm:$0xff]  ;;  %v2484_v15 = vld [vmem:[#allocation12 + $0x278] sm:$0xff] }
 0x691   : > { %5955 = vmatpush1.bf16.msra.mxu0 %v5954_v17  ;;  %v2129_v17 = vld [vmem:[#allocation12 + $0xc0] sm:$0xff] }
 0x692   : > { %5956 = vmatprep.subr.bf16.mxu0 %v7259_v54  ;;  %v6008_v19 = vpack.c.bf16 %v2130_v18, %v2129_v17  ;;  %v2650_v17 = vld [vmem:[#allocation12 + $0x2f0] sm:$0xff]  ;;  %v2651_v18 = vld [vmem:[#allocation12 + $0x2f8] sm:$0xff] }
 0x695   : > { %5958 = vmatpush1.bf16.msra.mxu0 %v5957_v20  ;;  %v2131_v20 = vld [vmem:[#allocation12 + $0xd0] sm:$0xff] }
 0x696   : > { %5959 = vmatprep.subr.bf16.mxu0 %v7259_v54  ;;  %v6011_v22 = vpack.c.bf16 %v2132_v21, %v2131_v20  ;;  %v2485_v20 = vld [vmem:[#allocation12 + $0x280] sm:$0xff]  ;;  %v2486_v21 = vld [vmem:[#allocation12 + $0x288] sm:$0xff] }
 0x699   : > { %5961 = vmatpush1.bf16.msra.mxu0 %v5960_v23  ;;  %v2461_v23 = vld [vmem:[#allocation12 + $0x1c0] sm:$0xff] }
 0x69a   : > { %5962 = vmatprep.subr.bf16.mxu0 %v7259_v54 }
 0x69d   : > { %5964 = vmatpush1.bf16.msra.mxu0 %v5963_v27  ;;  %v6014_v27 = vpack.c.bf16 %v2462_v24, %v2461_v23  ;;  %v2652_v23 = vld [vmem:[#allocation12 + $0x300] sm:$0xff]  ;;  %v2653_v24 = vld [vmem:[#allocation12 + $0x308] sm:$0xff] }
 0x69e   : > { %5965 = vmatprep.subr.bf16.mxu0 %v7259_v54 }
 0x6a1   : > { %5967 = vmatpush1.bf16.msra.mxu0 %v5966_v30  ;;  %v6017_v30 = vpack.c.bf16 %v2464_v29, %v2463_v28  ;;  %v2488_v28 = vld [vmem:[#allocation12 + $0x298] sm:$0xff]  ;;  %v6074_v29 = vpack.c.bf16 %v2653_v24, %v2652_v23  ;;  %v2833_v23 = vld [vmem:[#allocation12 + $0x3f0] sm:$0xff] }
 0x6a2   : > { %5968 = vmatprep.subr.bf16.mxu0 %v7259_v54  ;;  %v2834_v24 = vld [vmem:[#allocation12 + $0x3f8] sm:$0xff] }
 0x6a5   : > { %5970 = vmatpush1.bf16.msra.mxu0 %v5969_v33  ;;  %v6020_v33 = vpack.c.bf16 %v2466_v32, %v2465_v31  ;;  %v2655_v31 = vld [vmem:[#allocation12 + $0x318] sm:$0xff] }
 0x6a6   : > { %5971 = vmatprep.subr.bf16.mxu0 %v7259_v54 }
 0x73f   : > { %v7977_v35 = vpop.f32.mrb[12].mxu0 }
 0x740   : > { %v2102_v36 = vpop.f32.mrb[13].mxu0 }
 0x743   : > { %v2204_v39 = vpop.f32.mrb[14].mxu0 }
 0x744   : > { %v2206_v40 = vpop.f32.mrb[15].mxu0 }
 0x745   : > { %5505 = vmatprep.mubr.msk.f32.mxu0 %vm1648_vm7, %v2206_v40  ;;  %v2472_v40 = vld [vmem:[#allocation12 + $0x218] sm:$0xff] }
 0x746   : > { %2306 = vmatmul.mubr.f32.vlgmr.msra.gmra.mrb[16].mxu0 %v2204_v39  ;;  %v6026_v39 = vpack.c.bf16 %v2470_v38, %v2469_v37  ;;  %v2658_v37 = vld [vmem:[#allocation12 + $0x330] sm:$0xff]  ;;  %v2659_v38 = vld [vmem:[#allocation12 + $0x338] sm:$0xff] }
 0x747   : > { %5973 = vmatpush1.bf16.msra.mxu0 %v5972_v45  ;;  %5506 = vmatprep.mubr.msk.f32.mxu0 %vm1648_vm7, %v2102_v36  ;;  %v2471_v45 = vld [vmem:[#allocation12 + $0x210] sm:$0xff] }
 0x748   : > { %5974 = vmatprep.subr.bf16.mxu0 %v7259_v54  ;;  %v6029_v41 = vpack.c.bf16 %v2472_v40, %v2471_v45  ;;  %v2660_v45 = vld [vmem:[#allocation12 + $0x340] sm:$0xff]  ;;  %v2661_v40 = vld [vmem:[#allocation12 + $0x348] sm:$0xff] }
 0x74b   : > { %5976 = vmatpush1.bf16.msra.mxu0 %v5975_v42  ;;  %v2474_v42 = vld [vmem:[#allocation12 + $0x228] sm:$0xff] }
 0x74c   : > { %5977 = vmatprep.subr.bf16.mxu0 %v7259_v54  ;;  %v6032_v43 = vpack.c.bf16 %v2474_v42, %v2473_v50  ;;  %v2662_v50 = vld [vmem:[#allocation12 + $0x350] sm:$0xff]  ;;  %v2663_v42 = vld [vmem:[#allocation12 + $0x358] sm:$0xff] }
 0x74f   : > { %5979 = vmatpush1.bf16.msra.mxu0 %v5978_v49  ;;  %v2476_v49 = vld [vmem:[#allocation12 + $0x238] sm:$0xff] }
 0x750   : > { %5980 = vmatprep.subr.bf16.mxu0 %v7259_v54  ;;  %v6035_v53 = vpack.c.bf16 %v2476_v49, %v2475_v44  ;;  %v2665_v44 = vld [vmem:[#allocation12 + $0x368] sm:$0xff] }
 0x753   : > { %5982 = vmatpush1.bf16.msra.mxu0 %v5981_v52  ;;  %v2642_v52 = vld [vmem:[#allocation12 + $0x2b0] sm:$0xff] }
 0x754   : > { %5983 = vmatprep.subr.bf16.mxu0 %v7259_v54 }
 0x757   : > { %5985 = vmatpush1.bf16.msra.mxu0 %v5984_v56  ;;  %v2643_v56 = vld [vmem:[#allocation12 + $0x2b8] sm:$0xff] }
 0x758   : > { %5986 = vmatprep.subr.bf16.mxu0 %v7259_v54 }
 0x75b   : > { %5988 = vmatpush1.bf16.msra.mxu0 %v5987_v61  ;;  %v6059_v61 = vpack.c.bf16 %v2643_v56, %v2642_v52  ;;  %v6095_v52 = vpack.c.bf16 %v2667_v51, %v2666_v46  ;;  %v2931_v46 = vld [vmem:[#allocation16 + $0x8] sm:$0xff] }
 0x75c   : > { %5989 = vmatprep.subr.bf16.mxu0 %v7259_v54 }
 0x75d   : > { %6060 = vmatpush1.bf16.msra.mxu1 %v6059_v61 }
 0x75e   : > { %6061 = vmatprep.subr.bf16.mxu1 %v7259_v54 }
 0x75f   : > { %5991 = vmatpush1.bf16.msra.mxu0 %v5990_v0  ;;  %v6038_v0 = vpack.c.bf16 %v2478_v59, %v2477_v57 }
 0x760   : > { %5992 = vmatprep.subr.bf16.mxu0 %v7259_v54 }
 0x763   : > { %5994 = vmatpush1.bf16.msra.mxu0 %v5993_v3  ;;  %v6062_v3 = vpack.c.bf16 %v2645_v63, %v2644_v62 }
 0x764   : > { %5995 = vmatprep.subr.bf16.mxu0 %v7259_v54 }
 0x765   : > { %6063 = vmatpush1.bf16.msra.mxu1 %v6062_v3  ;;  %v2743_v3 = vld [vmem:[#allocation10 + $0x8] sm:$0x3] }
 0x766   : > { %6064 = vmatprep.subr.bf16.mxu1 %v7259_v54 }
 0x767   : > { %5997 = vmatpush1.bf16.msra.mxu0 %v5996_v6  ;;  %v6041_v6 = vpack.c.bf16 %v2480_v2, %v2479_v1  ;;  %v2819_v1 = vld [vmem:[#allocation12 + $0x380] sm:$0xff]  ;;  %v2820_v2 = vld [vmem:[#allocation12 + $0x388] sm:$0xff] }
 0x768   : > { %5998 = vmatprep.subr.bf16.mxu0 %v7259_v54 }
 0x76b   : > { %6000 = vmatpush1.bf16.msra.mxu0 %v5999_v9  ;;  %v6065_v9 = vpack.c.bf16 %v2647_v5, %v2646_v4  ;;  %v6098_v4 = vpack.c.bf16 %v2820_v2, %v2819_v1  ;;  %v2821_v5 = vld [vmem:[#allocation12 + $0x390] sm:$0xff]  ;;  %v2936_v1 = vld [vmem:[#allocation16 + $0x30] sm:$0xff] }
 0x76c   : > { %6001 = vmatprep.subr.bf16.mxu0 %v7259_v54 }
 0x76d   : > { %6066 = vmatpush1.bf16.msra.mxu1 %v6065_v9  ;;  %v2824_v9 = vld [vmem:[#allocation12 + $0x3a8] sm:$0xff] }
 0x76e   : > { %6067 = vmatprep.subr.bf16.mxu1 %v7259_v54 }
 0x76f   : > { %6003 = vmatpush1.bf16.msra.mxu0 %v6002_v13  ;;  %v6044_v13 = vpack.c.bf16 %v2482_v8, %v2481_v7  ;;  %v2823_v8 = vld [vmem:[#allocation12 + $0x3a0] sm:$0xff] }
 0x770   : > { %6004 = vmatprep.subr.bf16.mxu0 %v7259_v54 }
 0x773   : > { %6006 = vmatpush1.bf16.msra.mxu0 %v6005_v16  ;;  %v6068_v16 = vpack.c.bf16 %v2649_v11, %v2648_v10  ;;  %v6104_v10 = vpack.c.bf16 %v2824_v9, %v2823_v8  ;;  %v2826_v11 = vld [vmem:[#allocation12 + $0x3b8] sm:$0xff] }
 0x774   : > { %6007 = vmatprep.subr.bf16.mxu0 %v7259_v54  ;;  %v2943_v9 = vld [vmem:[#allocation16 + $0x68] sm:$0xff] }
 0x775   : > { %6069 = vmatpush1.bf16.msra.mxu1 %v6068_v16 }
 0x776   : > { %6070 = vmatprep.subr.bf16.mxu1 %v7259_v54 }
 0x777   : > { %6009 = vmatpush1.bf16.msra.mxu0 %v6008_v19  ;;  %v6047_v19 = vpack.c.bf16 %v2484_v15, %v2483_v14  ;;  %v2827_v14 = vld [vmem:[#allocation12 + $0x3c0] sm:$0xff]  ;;  %v2828_v15 = vld [vmem:[#allocation12 + $0x3c8] sm:$0xff] }
 0x778   : > { %6010 = vmatprep.subr.bf16.mxu0 %v7259_v54  ;;  %v6110_v16 = vpack.c.bf16 %v2828_v15, %v2827_v14  ;;  %v2947_v15 = vld [vmem:[#allocation16 + $0x88] sm:$0xff] }
 0x77b   : > { %6012 = vmatpush1.bf16.msra.mxu0 %v6011_v22  ;;  %v6071_v22 = vpack.c.bf16 %v2651_v18, %v2650_v17  ;;  %v2829_v17 = vld [vmem:[#allocation12 + $0x3d0] sm:$0xff]  ;;  %v2830_v18 = vld [vmem:[#allocation12 + $0x3d8] sm:$0xff] }
 0x77c   : > { %5507 = vmatprep.subr.msk.mxu0 %vm2027_vm8, %v7941_v47 }
 0x77d   : > { %6072 = vmatpush1.bf16.msra.mxu1 %v6071_v22 }
 0x77e   : > { %2379 = vmatmul.mubr.f32.vlgmr.msra.gmra.mrb[18].mxu0 %v7977_v35  ;;  %v2468_v35 = vld [vmem:[#allocation12 + $0x1f8] sm:$0xff]  ;;  %6073 = vmatprep.subr.bf16.mxu1 %v7259_v54 }
 0x77f   : > { %5508 = vmatpush1.msk.msra.mxu0 %vm2027_vm8, %v7943_v48  ;;  %2453 = vmatprep.mubr.f32.mxu0 %v7258_v26  ;;  %v6023_v36 = vpack.c.bf16 %v2468_v35, %v2467_v34  ;;  %v2656_v34 = vld [vmem:[#allocation12 + $0x320] sm:$0xff]  ;;  %v2657_v35 = vld [vmem:[#allocation12 + $0x328] sm:$0xff] }
 0x780   : > { %6013 = vmatprep.subr.bf16.mxu0 %v7259_v54 }
 0x781   : > { %6075 = vmatpush1.bf16.msra.mxu1 %v6074_v29 }
 0x782   : > { %5509 = vmatmul.mubr.msk.f32.vlgmr.msra.gmra.mrb[20].mxu0 %vm2023_vm9, %v2385_v25  ;;  %v6050_v25 = vpack.c.bf16 %v2486_v21, %v2485_v20  ;;  %6076 = vmatprep.subr.bf16.mxu1 %v7259_v54  ;;  %v2831_v20 = vld [vmem:[#allocation12 + $0x3e0] sm:$0xff]  ;;  %v2832_v21 = vld [vmem:[#allocation12 + $0x3e8] sm:$0xff] }
 0x783   : > { %6015 = vmatpush1.bf16.msra.mxu0 %v6014_v27  ;;  %v2487_v27 = vld [vmem:[#allocation12 + $0x290] sm:$0xff]  ;;  %v6116_v22 = vpack.c.bf16 %v2832_v21, %v2831_v20 }
 0x784   : > { %6016 = vmatprep.subr.bf16.mxu0 %v7259_v54  ;;  %v6053_v32 = vpack.c.bf16 %v2488_v28, %v2487_v27  ;;  %v2835_v27 = vld [vmem:[#allocation12 + $0x400] sm:$0xff]  ;;  %v2836_v28 = vld [vmem:[#allocation12 + $0x408] sm:$0xff]  ;;  %v2951_v21 = vld [vmem:[#allocation16 + $0xa8] sm:$0xff] }
 0x785   : > { %v6122_v29 = vpack.c.bf16 %v2836_v28, %v2835_v27  ;;  %v2955_v28 = vld [vmem:[#allocation16 + $0xc8] sm:$0xff] }
 0x787   : > { %6018 = vmatpush1.bf16.msra.mxu0 %v6017_v30  ;;  %v2654_v30 = vld [vmem:[#allocation12 + $0x310] sm:$0xff] }
 0x788   : > { %6019 = vmatprep.subr.bf16.mxu0 %v7259_v54 }
 0x78b   : > { %6021 = vmatpush1.bf16.msra.mxu0 %v6020_v33  ;;  %v6077_v33 = vpack.c.bf16 %v2655_v31, %v2654_v30  ;;  %v2837_v30 = vld [vmem:[#allocation12 + $0x410] sm:$0xff]  ;;  %v2838_v31 = vld [vmem:[#allocation12 + $0x418] sm:$0xff] }
 0x78c   : > { %6022 = vmatprep.subr.bf16.mxu0 %v7259_v54 }
 0x78d   : > { %6078 = vmatpush1.bf16.msra.mxu1 %v6077_v33  ;;  %v2839_v33 = vld [vmem:[#allocation12 + $0x420] sm:$0xff] }
 0x78e   : > { %6079 = vmatprep.subr.bf16.mxu1 %v7259_v54 }
 0x78f   : > { %6024 = vmatpush1.bf16.msra.mxu0 %v6023_v36  ;;  %v6080_v36 = vpack.c.bf16 %v2657_v35, %v2656_v34  ;;  %v2840_v34 = vld [vmem:[#allocation12 + $0x428] sm:$0xff] }
 0x790   : > { %6025 = vmatprep.subr.bf16.mxu0 %v7259_v54  ;;  %v6128_v35 = vpack.c.bf16 %v2840_v34, %v2839_v33  ;;  %v3035_v34 = vld [vmem:[#allocation16 + $0x100] sm:$0xff] }
 0x791   : > { %6081 = vmatpush1.bf16.msra.mxu1 %v6080_v36  ;;  %v2841_v36 = vld [vmem:[#allocation12 + $0x430] sm:$0xff] }
 0x792   : > { %6082 = vmatprep.subr.bf16.mxu1 %v7259_v54 }
 0x793   : > { %6027 = vmatpush1.bf16.msra.mxu0 %v6026_v39  ;;  %v6083_v39 = vpack.c.bf16 %v2659_v38, %v2658_v37  ;;  %v2842_v37 = vld [vmem:[#allocation12 + $0x438] sm:$0xff] }
 0x794   : > { %6028 = vmatprep.subr.bf16.mxu0 %v7259_v54  ;;  %v6131_v38 = vpack.c.bf16 %v2842_v37, %v2841_v36  ;;  %v3040_v36 = vld [vmem:[#allocation16 + $0x128] sm:$0xff]  ;;  %v3042_v37 = vld [vmem:[#allocation16 + $0x138] sm:$0xff] }
 0x795   : > { %6084 = vmatpush1.bf16.msra.mxu1 %v6083_v39  ;;  %v2843_v39 = vld [vmem:[#allocation12 + $0x440] sm:$0xff] }
 0x796   : > { %6085 = vmatprep.subr.bf16.mxu1 %v7259_v54 }
 0x797   : > { %6030 = vmatpush1.bf16.msra.mxu0 %v6029_v41  ;;  %v6086_v41 = vpack.c.bf16 %v2661_v40, %v2660_v45  ;;  %v2844_v45 = vld [vmem:[#allocation12 + $0x448] sm:$0xff] }
 0x798   : > { %6031 = vmatprep.subr.bf16.mxu0 %v7259_v54  ;;  %v6134_v40 = vpack.c.bf16 %v2844_v45, %v2843_v39 }
 0x799   : > { %6087 = vmatpush1.bf16.msra.mxu1 %v6086_v41  ;;  %v2845_v41 = vld [vmem:[#allocation12 + $0x450] sm:$0xff] }
 0x79a   : > { %6088 = vmatprep.subr.bf16.mxu1 %v7259_v54 }
 0x79b   : > { %6033 = vmatpush1.bf16.msra.mxu0 %v6032_v43  ;;  %v2664_v43 = vld [vmem:[#allocation12 + $0x360] sm:$0xff] }
 0x79c   : > { %6034 = vmatprep.subr.bf16.mxu0 %v7259_v54  ;;  %v6092_v49 = vpack.c.bf16 %v2665_v44, %v2664_v43  ;;  %v3036_v44 = vld [vmem:[#allocation16 + $0x108] sm:$0xff] }
 0x79f   : > { %6036 = vmatpush1.bf16.msra.mxu0 %v6035_v53  ;;  %v2634_v53 = vpop.f32.mrb[6].mxu1 }
 0x7a0   : > { %6037 = vmatprep.subr.bf16.mxu0 %v7259_v54  ;;  %v2636_v55 = vpop.f32.mrb[7].mxu1 }
 0x7a1   : > { %5514 = vmatprep.mubr.msk.f32.mxu1 %vm1648_vm7, %v2636_v55  ;;  %v2930_v55 = vld [vmem:[#allocation16] sm:$0xff] }
 0x7a3   : > { %6039 = vmatpush1.bf16.msra.mxu0 %v6038_v0 }
 0x7a4   : > { %6040 = vmatprep.subr.bf16.mxu0 %v7259_v54 }
 0x7a7   : > { %6042 = vmatpush1.bf16.msra.mxu0 %v6041_v6  ;;  %v2822_v6 = vld [vmem:[#allocation12 + $0x398] sm:$0xff] }
 0x7a8   : > { %6043 = vmatprep.subr.bf16.mxu0 %v7259_v54  ;;  %v6101_v7 = vpack.c.bf16 %v2822_v6, %v2821_v5  ;;  %v2938_v6 = vld [vmem:[#allocation16 + $0x40] sm:$0xff] }
 0x7ab   : > { %6045 = vmatpush1.bf16.msra.mxu0 %v6044_v13 }
 0x7ac   : > { %6046 = vmatprep.subr.bf16.mxu0 %v7259_v54 }
 0x7af   : > { %6048 = vmatpush1.bf16.msra.mxu0 %v6047_v19  ;;  %v6113_v19 = vpack.c.bf16 %v2830_v18, %v2829_v17  ;;  %v2946_v18 = vld [vmem:[#allocation16 + $0x80] sm:$0xff] }
 0x7b0   : > { %6049 = vmatprep.subr.bf16.mxu0 %v7259_v54 }
 0x7b3   : > { %6051 = vmatpush1.bf16.msra.mxu0 %v6050_v25  ;;  %v6119_v25 = vpack.c.bf16 %v2834_v24, %v2833_v23  ;;  %v2950_v24 = vld [vmem:[#allocation16 + $0xa0] sm:$0xff] }
 0x7b4   : > { %6052 = vmatprep.subr.bf16.mxu0 %v7259_v54 }
 0x7b7   : > { %6054 = vmatpush1.bf16.msra.mxu0 %v6053_v32  ;;  %v6125_v32 = vpack.c.bf16 %v2838_v31, %v2837_v30 }
 0x7b8   : > { %5515 = vmatprep.subr.msk.mxu0 %vm2027_vm8, %v7941_v47  ;;  %v6089_v47 = vpack.c.bf16 %v2663_v42, %v2662_v50  ;;  %v2846_v50 = vld [vmem:[#allocation12 + $0x458] sm:$0xff] }
 0x7ba   : > { %6090 = vmatpush1.bf16.msra.mxu1 %v6089_v47  ;;  %v6137_v47 = vpack.c.bf16 %v2846_v50, %v2845_v41  ;;  %v6175_v41 = vpack.c.bf16 %v3042_v37, %v3040_v36  ;;  %v3039_v50 = vld [vmem:[#allocation16 + $0x120] sm:$0xff]  ;;  %v5519_v36 = vld [vmem:[#allocation13] ss:$0 sm:$0xff] }
 0x7bb   : > { %6091 = vmatprep.subr.bf16.mxu1 %v7259_v54 }
 0x7be   : > { %6093 = vmatpush1.bf16.msra.mxu1 %v6092_v49  ;;  %v3038_v49 = vld [vmem:[#allocation16 + $0x118] sm:$0xff] }
 0x7bf   : > { %6094 = vmatprep.subr.bf16.mxu1 %v7259_v54  ;;  %v6171_v51 = vpack.c.bf16 %v3038_v49, %v3036_v44  ;;  %v3046_v44 = vld [vmem:[#allocation16 + $0x158] sm:$0xff] }
 0x7c2   : > { %6096 = vmatpush1.bf16.msra.mxu1 %v6095_v52  ;;  %v2933_v52 = vld [vmem:[#allocation16 + $0x18] sm:$0xff] }
 0x7c5   : > { %2736 = vmatmul.mubr.f32.vlgmr.msra.gmra.mrb[8].mxu1 %v2634_v53  ;;  %v6139_v53 = vpack.c.bf16 %v2933_v52, %v2931_v46  ;;  %v3043_v46 = vld [vmem:[#allocation16 + $0x140] sm:$0xff]  ;;  %v3050_v52 = vld [vmem:[#allocation16 + $0x178] sm:$0xff] }
 0x7c6   : > { %3026 = vmatprep.mubr.f32.mxu1 %v7258_v26 }
 0x7c7   : > { %6140 = vmatprep.subr.bf16.mxu1 %v6139_v53 }
 0x819   : > { %v2307_v56 = vpop.f32.mrb[16].mxu0 }
 0x81a   : > { %v2309_v57 = vpop.f32.mrb[17].mxu0 }
 0x851   : > { %v2380_v59 = vpop.f32.mrb[18].mxu0 }
 0x852   : > { %v8032_v61 = vadd.f32 %v2380_v59, %v2307_v56  ;;  %v2382_v62 = vpop.f32.mrb[19].mxu0  ;;  %v2932_v56 = vld [vmem:[#allocation16 + $0x10] sm:$0xff]  ;;  %v2935_v59 = vld [vmem:[#allocation16 + $0x28] sm:$0xff] }
 0x853   : > { %v6141_v57 = vpack.c.bf16 %v2932_v56, %v2930_v55  ;;  %v2937_v62 = vld [vmem:[#allocation16 + $0x38] sm:$0xff]  ;;  %v3047_v56 = vld [vmem:[#allocation16 + $0x160] sm:$0xff] }
 0x855   : > { %v2455_v63 = vpop.f32.mrb[20].mxu0  ;;  %6142 = vmatpush1.bf16.msra.mxu1 %v6141_v57  ;;  %v3049_v57 = vld [vmem:[#allocation16 + $0x170] sm:$0xff] }
 0x856   : > { %v2457_v0 = vpop.f32.mrb[21].mxu0 }
 0x857   : > { %5510 = vmatprep.mubr.msk.f32.mxu0 %vm1648_vm7, %v2457_v0  ;;  %v2934_v0 = vld [vmem:[#allocation16 + $0x20] sm:$0xff] }
 0x858   : > { %2557 = vmatmul.mubr.f32.vlgmr.msra.gmra.mrb[22].mxu0 %v2455_v63  ;;  %v6143_v63 = vpack.c.bf16 %v2937_v62, %v2935_v59  ;;  %v6145_v2 = vpack.c.bf16 %v2936_v1, %v2934_v0  ;;  %v3052_v59 = vld [vmem:[#allocation16 + $0x188] sm:$0xff]  ;;  %v3054_v62 = vld [vmem:[#allocation16 + $0x198] sm:$0xff]  ;;  %v3051_v1 = vld [vmem:[#allocation16 + $0x180] sm:$0xff] }
 0x859   : > { %5516 = vmatpush1.msk.msra.mxu0 %vm2027_vm8, %v7943_v48  ;;  %2811 = vmatprep.mubr.f32.mxu0 %v7258_v26  ;;  %v2825_v48 = vld [vmem:[#allocation12 + $0x3b0] sm:$0xff]  ;;  %v6187_v0 = vpack.c.bf16 %v3054_v62, %v3052_v59 }
 0x85a   : > { %6097 = vmatprep.subr.bf16.mxu0 %v7259_v54  ;;  %v6107_v13 = vpack.c.bf16 %v2826_v11, %v2825_v48  ;;  %6144 = vmatprep.subr.bf16.mxu1 %v6143_v63  ;;  %v2942_v11 = vld [vmem:[#allocation16 + $0x60] sm:$0xff]  ;;  %v6185_v63 = vpack.c.bf16 %v3049_v57, %v3047_v56  ;;  %v3504_v56 = vld [vmem:[#allocation16 + $0x368] sm:$0xff]  ;;  %v3506_v57 = vld [vmem:[#allocation16 + $0x378] sm:$0xff] }
 0x85b   : > { %6146 = vmatpush1.bf16.msra.mxu1 %v6145_v2  ;;  %v3053_v2 = vld [vmem:[#allocation16 + $0x190] sm:$0xff]  ;;  %v6247_v62 = vpack.c.bf16 %v3506_v57, %v3504_v56  ;;  %v3315_v56 = vld [vmem:[#allocation16 + $0x260] sm:$0xff] }
 0x85c   : > { %5517 = vmatmul.mubr.msk.f32.vlgmr.msra.gmra.mrb[24].mxu0 %vm2023_vm9, %v2743_v3  ;;  %v2939_v3 = vld [vmem:[#allocation16 + $0x48] sm:$0xff]  ;;  %v3317_v57 = vld [vmem:[#allocation16 + $0x270] sm:$0xff] }
 0x85d   : > { %6099 = vmatpush1.bf16.msra.mxu0 %v6098_v4  ;;  %v2941_v4 = vld [vmem:[#allocation16 + $0x58] sm:$0xff] }
 0x85e   : > { %6100 = vmatprep.subr.bf16.mxu0 %v7259_v54  ;;  %v6147_v5 = vpack.c.bf16 %v2941_v4, %v2939_v3  ;;  %v3056_v3 = vld [vmem:[#allocation16 + $0x1a8] sm:$0xff]  ;;  %v3058_v4 = vld [vmem:[#allocation16 + $0x1b8] sm:$0xff] }
 0x860   : > { %6148 = vmatprep.subr.bf16.mxu1 %v6147_v5  ;;  %v6189_v5 = vpack.c.bf16 %v3053_v2, %v3051_v1  ;;  %v3508_v1 = vld [vmem:[#allocation16 + $0x388] sm:$0xff]  ;;  %v3510_v2 = vld [vmem:[#allocation16 + $0x398] sm:$0xff] }
 0x861   : > { %6102 = vmatpush1.bf16.msra.mxu0 %v6101_v7  ;;  %v2940_v7 = vld [vmem:[#allocation16 + $0x50] sm:$0xff] }
 0x862   : > { %6103 = vmatprep.subr.bf16.mxu0 %v7259_v54  ;;  %v6149_v8 = vpack.c.bf16 %v2940_v7, %v2938_v6  ;;  %v6191_v6 = vpack.c.bf16 %v3058_v4, %v3056_v3  ;;  %v3055_v7 = vld [vmem:[#allocation16 + $0x1a0] sm:$0xff]  ;;  %v6251_v4 = vpack.c.bf16 %v3510_v2, %v3508_v1  ;;  %v3321_v2 = vld [vmem:[#allocation16 + $0x290] sm:$0xff] }
 0x863   : > { %v3319_v1 = vld [vmem:[#allocation16 + $0x280] sm:$0xff] }
 0x864   : > { %6150 = vmatpush1.bf16.msra.mxu1 %v6149_v8  ;;  %v3057_v8 = vld [vmem:[#allocation16 + $0x1b0] sm:$0xff] }
 0x865   : > { %6105 = vmatpush1.bf16.msra.mxu0 %v6104_v10  ;;  %v2945_v10 = vld [vmem:[#allocation16 + $0x78] sm:$0xff] }
 0x866   : > { %6106 = vmatprep.subr.bf16.mxu0 %v7259_v54  ;;  %v6151_v48 = vpack.c.bf16 %v2945_v10, %v2943_v9  ;;  %v3060_v9 = vld [vmem:[#allocation16 + $0x1c8] sm:$0xff]  ;;  %v3062_v10 = vld [vmem:[#allocation16 + $0x1d8] sm:$0xff] }
 0x868   : > { %6152 = vmatprep.subr.bf16.mxu1 %v6151_v48  ;;  %v6193_v48 = vpack.c.bf16 %v3057_v8, %v3055_v7  ;;  %v3512_v7 = vld [vmem:[#allocation16 + $0x3a8] sm:$0xff]  ;;  %v3514_v8 = vld [vmem:[#allocation16 + $0x3b8] sm:$0xff] }
 0x869   : > { %6108 = vmatpush1.bf16.msra.mxu0 %v6107_v13  ;;  %v2944_v13 = vld [vmem:[#allocation16 + $0x70] sm:$0xff] }
 0x86a   : > { %6109 = vmatprep.subr.bf16.mxu0 %v7259_v54  ;;  %v6153_v14 = vpack.c.bf16 %v2944_v13, %v2942_v11  ;;  %v6195_v11 = vpack.c.bf16 %v3062_v10, %v3060_v9  ;;  %v3059_v13 = vld [vmem:[#allocation16 + $0x1c0] sm:$0xff]  ;;  %v6255_v10 = vpack.c.bf16 %v3514_v8, %v3512_v7  ;;  %v3325_v8 = vld [vmem:[#allocation16 + $0x2b0] sm:$0xff] }
 0x86b   : > { %v3323_v7 = vld [vmem:[#allocation16 + $0x2a0] sm:$0xff] }
 0x86c   : > { %6154 = vmatpush1.bf16.msra.mxu1 %v6153_v14  ;;  %v3061_v14 = vld [vmem:[#allocation16 + $0x1d0] sm:$0xff] }
 0x86d   : > { %6111 = vmatpush1.bf16.msra.mxu0 %v6110_v16  ;;  %v2949_v16 = vld [vmem:[#allocation16 + $0x98] sm:$0xff] }
 0x86e   : > { %6112 = vmatprep.subr.bf16.mxu0 %v7259_v54  ;;  %v6155_v17 = vpack.c.bf16 %v2949_v16, %v2947_v15  ;;  %v6197_v15 = vpack.c.bf16 %v3061_v14, %v3059_v13  ;;  %v2954_v16 = vld [vmem:[#allocation16 + $0xc0] sm:$0xff]  ;;  %v3516_v13 = vld [vmem:[#allocation16 + $0x3c8] sm:$0xff]  ;;  %v3518_v14 = vld [vmem:[#allocation16 + $0x3d8] sm:$0xff] }
 0x870   : > { %6156 = vmatprep.subr.bf16.mxu1 %v6155_v17  ;;  %v2956_v17 = vld [vmem:[#allocation16 + $0xd0] sm:$0xff] }
 0x871   : > { %6114 = vmatpush1.bf16.msra.mxu0 %v6113_v19  ;;  %v2948_v19 = vld [vmem:[#allocation16 + $0x90] sm:$0xff] }
 0x872   : > { %6115 = vmatprep.subr.bf16.mxu0 %v7259_v54  ;;  %v6157_v20 = vpack.c.bf16 %v2948_v19, %v2946_v18  ;;  %v6165_v18 = vpack.c.bf16 %v2956_v17, %v2954_v16  ;;  %v3064_v19 = vld [vmem:[#allocation16 + $0x1e8] sm:$0xff]  ;;  %v6259_v16 = vpack.c.bf16 %v3518_v14, %v3516_v13  ;;  %v3515_v17 = vld [vmem:[#allocation16 + $0x3c0] sm:$0xff]  ;;  %v3329_v14 = vld [vmem:[#allocation16 + $0x2d0] sm:$0xff] }
 0x873   : > { %v3327_v13 = vld [vmem:[#allocation16 + $0x2c0] sm:$0xff] }
 0x874   : > { %6158 = vmatpush1.bf16.msra.mxu1 %v6157_v20  ;;  %v3066_v20 = vld [vmem:[#allocation16 + $0x1f8] sm:$0xff] }
 0x875   : > { %6117 = vmatpush1.bf16.msra.mxu0 %v6116_v22  ;;  %v2953_v22 = vld [vmem:[#allocation16 + $0xb8] sm:$0xff] }
 0x876   : > { %6118 = vmatprep.subr.bf16.mxu0 %v7259_v54  ;;  %v6159_v23 = vpack.c.bf16 %v2953_v22, %v2951_v21  ;;  %v6199_v21 = vpack.c.bf16 %v3066_v20, %v3064_v19  ;;  %v2959_v22 = vld [vmem:[#allocation16 + $0xe8] sm:$0xff]  ;;  %v3522_v20 = vld [vmem:[#allocation16 + $0x3f8] sm:$0xff] }
 0x877   : > { %v3520_v19 = vld [vmem:[#allocation16 + $0x3e8] sm:$0xff] }
 0x878   : > { %6160 = vmatprep.subr.bf16.mxu1 %v6159_v23  ;;  %v2961_v23 = vld [vmem:[#allocation16 + $0xf8] sm:$0xff] }
 0x879   : > { %6120 = vmatpush1.bf16.msra.mxu0 %v6119_v25  ;;  %v2952_v25 = vld [vmem:[#allocation16 + $0xb0] sm:$0xff] }
 0x87a   : > { %6121 = vmatprep.subr.bf16.mxu0 %v7259_v54  ;;  %v6161_v27 = vpack.c.bf16 %v2952_v25, %v2950_v24  ;;  %v6167_v24 = vpack.c.bf16 %v2961_v23, %v2959_v22  ;;  %v3063_v25 = vld [vmem:[#allocation16 + $0x1e0] sm:$0xff]  ;;  %v6263_v22 = vpack.c.bf16 %v3522_v20, %v3520_v19  ;;  %v6229_v19 = vpack.c.bf16 %v3329_v14, %v3327_v13 }
 0x87b   : > { %v3519_v23 = vld [vmem:[#allocation16 + $0x3e0] sm:$0xff] }
 0x87c   : > { %6162 = vmatpush1.bf16.msra.mxu1 %v6161_v27  ;;  %v3065_v27 = vld [vmem:[#allocation16 + $0x1f0] sm:$0xff] }
 0x87d   : > { %6123 = vmatpush1.bf16.msra.mxu0 %v6122_v29  ;;  %v2957_v29 = vld [vmem:[#allocation16 + $0xd8] sm:$0xff] }
 0x87e   : > { %6124 = vmatprep.subr.bf16.mxu0 %v7259_v54  ;;  %v6163_v30 = vpack.c.bf16 %v2957_v29, %v2955_v28  ;;  %v2958_v28 = vld [vmem:[#allocation16 + $0xe0] sm:$0xff]  ;;  %v6201_v29 = vpack.c.bf16 %v3065_v27, %v3063_v25  ;;  %v3304_v27 = vld [vmem:[#allocation16 + $0x208] sm:$0xff] }
 0x880   : > { %6164 = vmatprep.subr.bf16.mxu1 %v6163_v30  ;;  %v2960_v30 = vld [vmem:[#allocation16 + $0xf0] sm:$0xff] }
 0x881   : > { %6126 = vmatpush1.bf16.msra.mxu0 %v6125_v32  ;;  %6166 = vmatpush1.bf16.msra.mxu1 %v6165_v18  ;;  %v3517_v18 = vld [vmem:[#allocation16 + $0x3d0] sm:$0xff] }
 0x882   : > { %6127 = vmatprep.subr.bf16.mxu0 %v7259_v54  ;;  %6168 = vmatprep.subr.bf16.mxu1 %v6167_v24  ;;  %v3521_v24 = vld [vmem:[#allocation16 + $0x3f0] sm:$0xff] }
 0x883   : > { %v6265_v25 = vpack.c.bf16 %v3521_v24, %v3519_v23  ;;  %v3680_v24 = vld [vmem:[#allocation16 + $0x408] sm:$0xff] }
 0x885   : > { %6129 = vmatpush1.bf16.msra.mxu0 %v6128_v35  ;;  %v3037_v35 = vld [vmem:[#allocation16 + $0x110] sm:$0xff] }
 0x886   : > { %6130 = vmatprep.subr.bf16.mxu0 %v7259_v54  ;;  %v6173_v45 = vpack.c.bf16 %v3037_v35, %v3035_v34 }
 0x889   : > { %6132 = vmatpush1.bf16.msra.mxu0 %v6131_v38 }
 0x88a   : > { %6133 = vmatprep.subr.bf16.mxu0 %v7259_v54 }
 0x88d   : > { %6135 = vmatpush1.bf16.msra.mxu0 %v6134_v40 }
 0x88e   : > { %6136 = vmatprep.subr.bf16.mxu0 %v7259_v54 }
 0x891   : > { %6138 = vmatpush1.bf16.msra.mxu0 %v6137_v47  ;;  %v3041_v47 = vld [vmem:[#allocation16 + $0x130] sm:$0xff] }
 0x892   : > { %6172 = vmatprep.subr.bf16.mxu0 %v6171_v51  ;;  %v3048_v51 = vld [vmem:[#allocation16 + $0x168] sm:$0xff] }
 0x893   : > { %v6183_v55 = vpack.c.bf16 %v3050_v52, %v3048_v51  ;;  %v3502_v51 = vld [vmem:[#allocation16 + $0x358] sm:$0xff] }
 0x898   : > { %v8053_v42 = vpop.f32.mrb[8].mxu1 }
 0x899   : > { %v2739_v43 = vpop.f32.mrb[9].mxu1 }
 0x89a   : > { %v3044_v43 = vld [vmem:[#allocation16 + $0x148] sm:$0xff] }
 0x89b   : > { %v6179_v49 = vpack.c.bf16 %v3046_v44, %v3044_v43 }
 0x92b   : > { %v2558_v31 = vpop.f32.mrb[22].mxu0 }
 0x92c   : > { %v2562_v32 = vadd.f32 %v2558_v31, %v8032_v61  ;;  %v2560_v33 = vpop.f32.mrb[23].mxu0  ;;  %v6177_v61 = vpack.c.bf16 %v3041_v47, %v3039_v50  ;;  %v6169_v31 = vpack.c.bf16 %v2960_v30, %v2958_v28  ;;  %v3498_v50 = vld [vmem:[#allocation16 + $0x338] sm:$0xff] }
 0x92d   : > { %v3494_v33 = vld [vmem:[#allocation16 + $0x318] sm:$0xff] }
 0x92e   : > { %v8057_v38 = vadd.f32 %v8053_v42, %v2562_v32  ;;  %v3045_v42 = vld [vmem:[#allocation16 + $0x150] sm:$0xff]  ;;  %v3492_v32 = vld [vmem:[#allocation16 + $0x308] sm:$0xff]  ;;  %6170 = vmatpush1.bf16.msra.mxu1 %v6169_v31  ;;  %v3306_v28 = vld [vmem:[#allocation16 + $0x218] sm:$0xff] }
 0x92f   : > { %v2813_v39 = vpop.f32.mrb[24].mxu0  ;;  %v6181_v53 = vpack.c.bf16 %v3045_v42, %v3043_v46  ;;  %v6235_v34 = vpack.c.bf16 %v3494_v33, %v3492_v32  ;;  %v3497_v46 = vld [vmem:[#allocation16 + $0x330] sm:$0xff]  ;;  %v3500_v42 = vld [vmem:[#allocation16 + $0x348] sm:$0xff]  ;;  %v3139_v33 = vld [vmem:[#allocation15 + $0x8] sm:$0x7f] }
 0x930   : > { %v2815_v40 = vpop.f32.mrb[25].mxu0  ;;  %v6243_v52 = vpack.c.bf16 %v3502_v51, %v3500_v42  ;;  %v3311_v42 = vld [vmem:[#allocation16 + $0x240] sm:$0xff]  ;;  %v3313_v51 = vld [vmem:[#allocation16 + $0x250] sm:$0xff] }
 0x931   : > { %5518 = vmatprep.mubr.msk.f32.mxu0 %vm1648_vm7, %v2815_v40  ;;  %v3493_v40 = vld [vmem:[#allocation16 + $0x310] sm:$0xff] }
 0x932   : > { %2915 = vmatmul.mubr.f32.vlgmr.msra.gmra.mrb[26].mxu0 %v2813_v39 }
 0x933   : > { %6174 = vmatpush1.bf16.msra.mxu0 %v6173_v45  ;;  %3131 = vmatprep.mubr.f32.mxu0 %v7258_v26  ;;  %v3491_v45 = vld [vmem:[#allocation16 + $0x300] sm:$0xff] }
 0x934   : > { %6176 = vmatprep.subr.bf16.mxu0 %v6175_v41  ;;  %v3496_v41 = vld [vmem:[#allocation16 + $0x328] sm:$0xff]  ;;  %v6237_v43 = vpack.c.bf16 %v3493_v40, %v3491_v45  ;;  %v3033_v45 = vld [vmem:[#allocation15] sm:$0x7f] }
 0x937   : > { %6178 = vmatpush1.bf16.msra.mxu0 %v6177_v61  ;;  %v6239_v61 = vpack.c.bf16 %v3498_v50, %v3496_v41  ;;  %v3307_v50 = vld [vmem:[#allocation16 + $0x220] sm:$0xff] }
 0x938   : > { %6180 = vmatprep.subr.bf16.mxu0 %v6179_v49  ;;  %v3495_v49 = vld [vmem:[#allocation16 + $0x320] sm:$0xff] }
 0x93b   : > { %6182 = vmatpush1.bf16.msra.mxu0 %v6181_v53  ;;  %v3499_v53 = vld [vmem:[#allocation16 + $0x340] sm:$0xff] }
 0x93c   : > { %6184 = vmatprep.subr.bf16.mxu0 %v6183_v55  ;;  %v3501_v55 = vld [vmem:[#allocation16 + $0x350] sm:$0xff] }
 0x93d   : > { %v6245_v59 = vpack.c.bf16 %v3501_v55, %v3499_v53  ;;  %v6213_v53 = vpack.c.bf16 %v3313_v51, %v3311_v42 }
 0x93f   : > { %6186 = vmatpush1.bf16.msra.mxu0 %v6185_v63  ;;  %v3503_v63 = vld [vmem:[#allocation16 + $0x360] sm:$0xff] }
 0x940   : > { %6188 = vmatprep.subr.bf16.mxu0 %v6187_v0  ;;  %v3505_v0 = vld [vmem:[#allocation16 + $0x370] sm:$0xff] }
 0x941   : > { %v6249_v3 = vpack.c.bf16 %v3505_v0, %v3503_v63  ;;  %v6217_v63 = vpack.c.bf16 %v3317_v57, %v3315_v56 }
 0x943   : > { %6190 = vmatpush1.bf16.msra.mxu0 %v6189_v5  ;;  %v3507_v5 = vld [vmem:[#allocation16 + $0x380] sm:$0xff] }
 0x944   : > { %6192 = vmatprep.subr.bf16.mxu0 %v6191_v6  ;;  %v3509_v6 = vld [vmem:[#allocation16 + $0x390] sm:$0xff] }
 0x945   : > { %v6253_v9 = vpack.c.bf16 %v3509_v6, %v3507_v5  ;;  %v6221_v5 = vpack.c.bf16 %v3321_v2, %v3319_v1 }
 0x947   : > { %6194 = vmatpush1.bf16.msra.mxu0 %v6193_v48  ;;  %v3511_v48 = vld [vmem:[#allocation16 + $0x3a0] sm:$0xff] }
 0x948   : > { %6196 = vmatprep.subr.bf16.mxu0 %v6195_v11  ;;  %v3513_v11 = vld [vmem:[#allocation16 + $0x3b0] sm:$0xff] }
 0x94b   : > { %6198 = vmatpush1.bf16.msra.mxu0 %v6197_v15  ;;  %v6257_v15 = vpack.c.bf16 %v3513_v11, %v3511_v48  ;;  %v6225_v48 = vpack.c.bf16 %v3325_v8, %v3323_v7 }
 0x94c   : > { %6200 = vmatprep.subr.bf16.mxu0 %v6199_v21  ;;  %v6261_v21 = vpack.c.bf16 %v3517_v18, %v3515_v17 }
 0x94f   : > { %6202 = vmatpush1.bf16.msra.mxu0 %v6201_v29 }
 0x950   : > { %6236 = vmatprep.subr.bf16.mxu0 %v6235_v34  ;;  %v6203_v34 = vpack.c.bf16 %v3306_v28, %v3304_v27 }
 0xa05   : > { %v2916_v35 = vpop.f32.mrb[26].mxu0 }
 0xa06   : > { %v2920_v37 = vadd.f32 %v2916_v35, %v8057_v38  ;;  %v2918_v39 = vpop.f32.mrb[27].mxu0  ;;  %v6241_v38 = vpack.c.bf16 %v3497_v46, %v3495_v49  ;;  %v3303_v35 = vld [vmem:[#allocation16 + $0x200] sm:$0xff] }
 0xa07   : > { %v3310_v39 = vld [vmem:[#allocation16 + $0x238] sm:$0xff] }
 0xa08   : > { %v2928_v47 = vadd.f32 %v5519_v36, %v2920_v37  ;;  %v3305_v36 = vld [vmem:[#allocation16 + $0x210] sm:$0xff]  ;;  %v3308_v37 = vld [vmem:[#allocation16 + $0x228] sm:$0xff] }
 0xa09   : > { %v6205_v40 = vpack.c.bf16 %v3305_v36, %v3303_v35  ;;  %v6207_v41 = vpack.c.bf16 %v3310_v39, %v3308_v37  ;;  %v3595_v35 = vld [vmem:[#allocation15 + $0x18] sm:$0x7f]  ;;  %v3683_v39 = vld [vmem:[#allocation16 + $0x420] sm:$0xff] }
 0xa0a   : > { %v8062_v44 = vmax.f32 %v2928_v47, 0.0  ;;  %v3309_v47 = vld [vmem:[#allocation16 + $0x230] sm:$0xff] }
 0xa0b   : > { %v6209_v49 = vpack.c.bf16 %v3309_v47, %v3307_v50 }
 0xa0c   : > { %3027 = vmatmul.mubr.f32.vlgmr.msra.gmra.mrb[10].mxu1 %v8062_v44  ;;  %3132 = vmatmul.mubr.f32.vlgmr.msra.gmra.mrb[28].mxu0 %v8062_v44 }
 0xa0d   : > { %6238 = vmatpush1.bf16.msra.mxu0 %v6237_v43  ;;  %3587 = vmatprep.mubr.f32.mxu0 %v7258_v26  ;;  %v3312_v43 = vld [vmem:[#allocation16 + $0x248] sm:$0xff] }
 0xa0e   : > { %6240 = vmatprep.subr.bf16.mxu0 %v6239_v61  ;;  %3215 = vmatprep.mubr.f32.mxu1 %v7258_v26  ;;  %v3314_v61 = vld [vmem:[#allocation16 + $0x258] sm:$0xff] }
 0xa0f   : > { %v6211_v46 = vpack.c.bf16 %v3314_v61, %v3312_v43  ;;  %v3687_v43 = vld [vmem:[#allocation16 + $0x440] sm:$0xff]  ;;  %v3689_v61 = vld [vmem:[#allocation16 + $0x450] sm:$0xff] }
 0xa10   : > { %v6277_v42 = vpack.c.bf16 %v3689_v61, %v3687_v43  ;;  %v3898_v61 = vld [vmem:[#allocation21 + $0x80] sm:$0xff] }
 0xa11   : > { %6242 = vmatpush1.bf16.msra.mxu0 %v6241_v38  ;;  %v3316_v38 = vld [vmem:[#allocation16 + $0x268] sm:$0xff] }
 0xa12   : > { %6244 = vmatprep.subr.bf16.mxu0 %v6243_v52  ;;  %v3318_v52 = vld [vmem:[#allocation16 + $0x278] sm:$0xff] }
 0xa13   : > { %v6215_v55 = vpack.c.bf16 %v3318_v52, %v3316_v38  ;;  %v3691_v38 = vld [vmem:[#allocation16 + $0x460] sm:$0xff]  ;;  %v3693_v52 = vld [vmem:[#allocation16 + $0x470] sm:$0xff] }
 0xa14   : > { %v6281_v56 = vpack.c.bf16 %v3693_v52, %v3691_v38  ;;  %v3902_v52 = vld [vmem:[#allocation21 + $0xa0] sm:$0xff] }
 0xa15   : > { %6246 = vmatpush1.bf16.msra.mxu0 %v6245_v59  ;;  %v3320_v59 = vld [vmem:[#allocation16 + $0x288] sm:$0xff] }
 0xa16   : > { %6248 = vmatprep.subr.bf16.mxu0 %v6247_v62  ;;  %v3322_v62 = vld [vmem:[#allocation16 + $0x298] sm:$0xff] }
 0xa17   : > { %v6219_v0 = vpack.c.bf16 %v3322_v62, %v3320_v59  ;;  %v3695_v59 = vld [vmem:[#allocation16 + $0x480] sm:$0xff]  ;;  %v3697_v62 = vld [vmem:[#allocation16 + $0x490] sm:$0xff] }
 0xa18   : > { %v6285_v1 = vpack.c.bf16 %v3697_v62, %v3695_v59  ;;  %v3906_v62 = vld [vmem:[#allocation21 + $0xc0] sm:$0xff] }
 0xa19   : > { %6250 = vmatpush1.bf16.msra.mxu0 %v6249_v3  ;;  %v3324_v3 = vld [vmem:[#allocation16 + $0x2a8] sm:$0xff] }
 0xa1a   : > { %6252 = vmatprep.subr.bf16.mxu0 %v6251_v4  ;;  %v3326_v4 = vld [vmem:[#allocation16 + $0x2b8] sm:$0xff] }
 0xa1b   : > { %v6223_v6 = vpack.c.bf16 %v3326_v4, %v3324_v3  ;;  %v3699_v3 = vld [vmem:[#allocation16 + $0x4a0] sm:$0xff]  ;;  %v3701_v4 = vld [vmem:[#allocation16 + $0x4b0] sm:$0xff] }
 0xa1c   : > { %v6289_v7 = vpack.c.bf16 %v3701_v4, %v3699_v3  ;;  %v3910_v4 = vld [vmem:[#allocation21 + $0xe0] sm:$0xff] }
 0xa1d   : > { %6254 = vmatpush1.bf16.msra.mxu0 %v6253_v9  ;;  %v3328_v9 = vld [vmem:[#allocation16 + $0x2c8] sm:$0xff] }
 0xa1e   : > { %6256 = vmatprep.subr.bf16.mxu0 %v6255_v10  ;;  %v3330_v10 = vld [vmem:[#allocation16 + $0x2d8] sm:$0xff] }
 0xa1f   : > { %v6227_v11 = vpack.c.bf16 %v3330_v10, %v3328_v9  ;;  %v3703_v9 = vld [vmem:[#allocation16 + $0x4c0] sm:$0xff]  ;;  %v3705_v10 = vld [vmem:[#allocation16 + $0x4d0] sm:$0xff] }
 0xa20   : > { %v6293_v13 = vpack.c.bf16 %v3705_v10, %v3703_v9  ;;  %v3914_v10 = vld [vmem:[#allocation21 + $0x100] sm:$0xff] }
 0xa21   : > { %6258 = vmatpush1.bf16.msra.mxu0 %v6257_v15  ;;  %v3332_v15 = vld [vmem:[#allocation16 + $0x2e8] sm:$0xff] }
 0xa22   : > { %6260 = vmatprep.subr.bf16.mxu0 %v6259_v16  ;;  %v3334_v16 = vld [vmem:[#allocation16 + $0x2f8] sm:$0xff] }
 0xa23   : > { %v6231_v20 = vpack.c.bf16 %v3334_v16, %v3332_v15  ;;  %v3707_v15 = vld [vmem:[#allocation16 + $0x4e0] sm:$0xff]  ;;  %v3709_v16 = vld [vmem:[#allocation16 + $0x4f0] sm:$0xff] }
 0xa25   : > { %6262 = vmatpush1.bf16.msra.mxu0 %v6261_v21  ;;  %v3331_v21 = vld [vmem:[#allocation16 + $0x2e0] sm:$0xff] }
 0xa26   : > { %6264 = vmatprep.subr.bf16.mxu0 %v6263_v22  ;;  %v3333_v22 = vld [vmem:[#allocation16 + $0x2f0] sm:$0xff] }
 0xa27   : > { %v6233_v23 = vpack.c.bf16 %v3333_v22, %v3331_v21  ;;  %v3882_v21 = vld [vmem:[#allocation21] sm:$0xff]  ;;  %v3884_v22 = vld [vmem:[#allocation21 + $0x10] sm:$0xff] }
 0xa29   : > { %6266 = vmatpush1.bf16.msra.mxu0 %v6265_v25  ;;  %v3682_v25 = vld [vmem:[#allocation16 + $0x418] sm:$0xff] }
 0xa2c   : > { %3588 = vmatmul.mubr.f32.vlgmr.msra.gmra.mrb[30].mxu0 %v8062_v44 }
 0xadf   : > { %v3028_v29 = vpop.f32.mrb[10].mxu1  ;;  %v3133_v30 = vpop.f32.mrb[28].mxu0 }
 0xae0   : > { %v3030_v31 = vpop.f32.mrb[11].mxu1  ;;  %v3135_v32 = vpop.f32.mrb[29].mxu0 }
 0xae1   : > { %5520 = vmatprep.subr.msk.mxu1 %vm3144_vm10, %v3135_v32  ;;  %v3681_v32 = vld [vmem:[#allocation16 + $0x410] sm:$0xff] }
 0xae2   : > { %5521 = vmatpush1.msk.msra.mxu1 %vm3144_vm10, %v3133_v30  ;;  %v6267_v30 = vpack.c.bf16 %v3682_v25, %v3680_v24  ;;  %v3887_v24 = vld [vmem:[#allocation21 + $0x28] sm:$0xff]  ;;  %v3889_v25 = vld [vmem:[#allocation21 + $0x38] sm:$0xff] }
 0xae3   : > { %5522 = vmatmul.mubr.msk.f32.vlgmr.msra.gmra.mrb[12].mxu1 %vm3140_vm11, %v3139_v33  ;;  %5523 = vmatprep.subr.msk.mxu1 %vm3144_vm10, %v3030_v31  ;;  %v3679_v31 = vld [vmem:[#allocation16 + $0x400] sm:$0xff]  ;;  %v3684_v33 = vld [vmem:[#allocation16 + $0x428] sm:$0xff] }
 0xae4   : > { %5524 = vmatpush1.msk.msra.mxu1 %vm3144_vm10, %v3028_v29  ;;  %3295 = vmatprep.mubr.f32.mxu1 %v7258_v26  ;;  %v3407_v29 = vld [vmem:[#allocation15 + $0x10] sm:$0x7f]  ;;  %v6269_v36 = vpack.c.bf16 %v3681_v32, %v3679_v31  ;;  %v3891_v31 = vld [vmem:[#allocation21 + $0x48] sm:$0xff] }
 0xae5   : > { %6204 = vmatprep.subr.bf16.mxu1 %v6203_v34  ;;  %v3686_v34 = vld [vmem:[#allocation16 + $0x438] sm:$0xff]  ;;  %v3893_v32 = vld [vmem:[#allocation21 + $0x58] sm:$0xff] }
 0xae6   : > { %v6271_v37 = vpack.c.bf16 %v3686_v34, %v3684_v33  ;;  %v3890_v33 = vld [vmem:[#allocation21 + $0x40] sm:$0xff]  ;;  %v3892_v34 = vld [vmem:[#allocation21 + $0x50] sm:$0xff] }
 0xaeb   : > { %5525 = vmatmul.mubr.msk.f32.vlgmr.msra.gmra.mrb[12].mxu1 %vm3140_vm11, %v3033_v45  ;;  %v3685_v45 = vld [vmem:[#allocation16 + $0x430] sm:$0xff] }
 0xaec   : > { %6206 = vmatpush1.bf16.msra.mxu1 %v6205_v40  ;;  %3399 = vmatprep.mubr.f32.mxu1 %v7258_v26  ;;  %v3688_v40 = vld [vmem:[#allocation16 + $0x448] sm:$0xff]  ;;  %v6273_v50 = vpack.c.bf16 %v3685_v45, %v3683_v39  ;;  %v3894_v45 = vld [vmem:[#allocation21 + $0x60] sm:$0xff] }
 0xaed   : > { %6208 = vmatprep.subr.bf16.mxu1 %v6207_v41  ;;  %v3690_v41 = vld [vmem:[#allocation16 + $0x458] sm:$0xff] }
 0xaee   : > { %v6275_v47 = vpack.c.bf16 %v3690_v41, %v3688_v40  ;;  %v3896_v40 = vld [vmem:[#allocation21 + $0x70] sm:$0xff] }
 0xaef   : > { %v6313_v41 = vpack.c.bf16 %v3896_v40, %v3894_v45  ;;  %v4022_v45 = vld [vmem:[#allocation21 + $0x1f8] sm:$0xff] }
 0xaf0   : > { %6210 = vmatpush1.bf16.msra.mxu1 %v6209_v49  ;;  %v3692_v49 = vld [vmem:[#allocation16 + $0x468] sm:$0xff] }
 0xaf1   : > { %6212 = vmatprep.subr.bf16.mxu1 %v6211_v46  ;;  %v3694_v46 = vld [vmem:[#allocation16 + $0x478] sm:$0xff] }
 0xaf2   : > { %v6279_v51 = vpack.c.bf16 %v3694_v46, %v3692_v49  ;;  %v3900_v49 = vld [vmem:[#allocation21 + $0x90] sm:$0xff] }
 0xaf3   : > { %v6317_v46 = vpack.c.bf16 %v3900_v49, %v3898_v61  ;;  %v4019_v49 = vld [vmem:[#allocation21 + $0x1e0] sm:$0xff] }
 0xaf4   : > { %6214 = vmatpush1.bf16.msra.mxu1 %v6213_v53  ;;  %v3696_v53 = vld [vmem:[#allocation16 + $0x488] sm:$0xff] }
 0xaf5   : > { %6216 = vmatprep.subr.bf16.mxu1 %v6215_v55  ;;  %v3698_v55 = vld [vmem:[#allocation16 + $0x498] sm:$0xff] }
 0xaf6   : > { %v6283_v57 = vpack.c.bf16 %v3698_v55, %v3696_v53  ;;  %v3904_v53 = vld [vmem:[#allocation21 + $0xb0] sm:$0xff] }
 0xaf7   : > { %v6321_v55 = vpack.c.bf16 %v3904_v53, %v3902_v52  ;;  %v4023_v53 = vld [vmem:[#allocation21 + $0x200] sm:$0xff] }
 0xaf8   : > { %6218 = vmatpush1.bf16.msra.mxu1 %v6217_v63  ;;  %v3700_v63 = vld [vmem:[#allocation16 + $0x4a8] sm:$0xff] }
 0xaf9   : > { %6220 = vmatprep.subr.bf16.mxu1 %v6219_v0  ;;  %v3702_v0 = vld [vmem:[#allocation16 + $0x4b8] sm:$0xff] }
 0xafa   : > { %v6287_v2 = vpack.c.bf16 %v3702_v0, %v3700_v63  ;;  %v3908_v63 = vld [vmem:[#allocation21 + $0xd0] sm:$0xff] }
 0xafb   : > { %v6325_v0 = vpack.c.bf16 %v3908_v63, %v3906_v62  ;;  %v4027_v63 = vld [vmem:[#allocation21 + $0x220] sm:$0xff] }
 0xafc   : > { %6222 = vmatpush1.bf16.msra.mxu1 %v6221_v5  ;;  %v3704_v5 = vld [vmem:[#allocation16 + $0x4c8] sm:$0xff] }
 0xafd   : > { %6224 = vmatprep.subr.bf16.mxu1 %v6223_v6  ;;  %v3706_v6 = vld [vmem:[#allocation16 + $0x4d8] sm:$0xff] }
 0xafe   : > { %v6291_v8 = vpack.c.bf16 %v3706_v6, %v3704_v5  ;;  %v3912_v5 = vld [vmem:[#allocation21 + $0xf0] sm:$0xff] }
 0xaff   : > { %v3589_v17 = vpop.f32.mrb[30].mxu0  ;;  %v6329_v6 = vpack.c.bf16 %v3912_v5, %v3910_v4  ;;  %v4031_v5 = vld [vmem:[#allocation21 + $0x240] sm:$0xff] }
 0xb00   : > { %6226 = vmatpush1.bf16.msra.mxu1 %v6225_v48  ;;  %v3591_v18 = vpop.f32.mrb[31].mxu0  ;;  %v3708_v48 = vld [vmem:[#allocation16 + $0x4e8] sm:$0xff] }
 0xb01   : > { %6228 = vmatprep.subr.bf16.mxu1 %v6227_v11  ;;  %v3710_v11 = vld [vmem:[#allocation16 + $0x4f8] sm:$0xff] }
 0xb02   : > { %v6295_v14 = vpack.c.bf16 %v3710_v11, %v3708_v48  ;;  %v3916_v48 = vld [vmem:[#allocation21 + $0x110] sm:$0xff] }
 0xb03   : > { %v6333_v11 = vpack.c.bf16 %v3916_v48, %v3914_v10  ;;  %v4035_v48 = vld [vmem:[#allocation21 + $0x260] sm:$0xff] }
 0xb04   : > { %6230 = vmatpush1.bf16.msra.mxu1 %v6229_v19  ;;  %v3885_v19 = vld [vmem:[#allocation21 + $0x18] sm:$0xff] }
 0xb05   : > { %6232 = vmatprep.subr.bf16.mxu1 %v6231_v20 }
 0xb08   : > { %6234 = vmatpush1.bf16.msra.mxu1 %v6233_v23  ;;  %v6301_v23 = vpack.c.bf16 %v3884_v22, %v3882_v21  ;;  %v3922_v22 = vld [vmem:[#allocation21 + $0x140] sm:$0xff] }
 0xb0b   : > { %3400 = vmatmul.mubr.f32.vlgmr.msra.gmra.mrb[14].mxu1 %v8062_v44 }
 0xb0c   : > { %3481 = vmatprep.mubr.f32.mxu1 %v7258_v26 }
 0xbde   : > { %v3401_v27 = vpop.f32.mrb[14].mxu1 }
 0xbdf   : > { %v3403_v28 = vpop.f32.mrb[15].mxu1 }
 0xbe0   : > { %5526 = vmatprep.subr.msk.mxu1 %vm3144_vm10, %v3403_v28  ;;  %v3886_v28 = vld [vmem:[#allocation21 + $0x20] sm:$0xff] }
 0xbe1   : > { %5527 = vmatpush1.msk.msra.mxu1 %vm3144_vm10, %v3401_v27  ;;  %v6303_v27 = vpack.c.bf16 %v3889_v25, %v3887_v24  ;;  %v3927_v25 = vld [vmem:[#allocation21 + $0x168] sm:$0xff] }
 0xbe2   : > { %5528 = vmatmul.mubr.msk.f32.vlgmr.msra.gmra.mrb[12].mxu1 %vm3140_vm11, %v3407_v29  ;;  %5529 = vmatprep.subr.msk.mxu1 %vm3144_vm10, %v3591_v18  ;;  %v3883_v18 = vld [vmem:[#allocation21 + $0x8] sm:$0xff]  ;;  %v3888_v29 = vld [vmem:[#allocation21 + $0x30] sm:$0xff] }
 0xbe3   : > { %5530 = vmatpush1.msk.msra.mxu1 %vm3144_vm10, %v3589_v17  ;;  %3669 = vmatprep.mubr.f32.mxu1 %v7258_v26  ;;  %v6297_v17 = vpack.c.bf16 %v3709_v16, %v3707_v15  ;;  %v6299_v20 = vpack.c.bf16 %v3885_v19, %v3883_v18  ;;  %v3918_v16 = vld [vmem:[#allocation21 + $0x120] sm:$0xff]  ;;  %v3923_v19 = vld [vmem:[#allocation21 + $0x148] sm:$0xff] }
 0xbe4   : > { %6268 = vmatprep.subr.bf16.mxu1 %v6267_v30  ;;  %v6305_v30 = vpack.c.bf16 %v3888_v29, %v3886_v28  ;;  %v3926_v29 = vld [vmem:[#allocation21 + $0x160] sm:$0xff] }
 0xbe5   : > { %6300 = vmatprep.subr.bf16.mxu0 %v6299_v20  ;;  %v3925_v20 = vld [vmem:[#allocation21 + $0x158] sm:$0xff] }
 0xbe6   : > { %6302 = vmatpush1.bf16.msra.mxu0 %v6301_v23  ;;  %v6339_v21 = vpack.c.bf16 %v3925_v20, %v3923_v19  ;;  %v3924_v23 = vld [vmem:[#allocation21 + $0x150] sm:$0xff]  ;;  %v4044_v19 = vld [vmem:[#allocation21 + $0x2a8] sm:$0xff]  ;;  %v4046_v20 = vld [vmem:[#allocation21 + $0x2b8] sm:$0xff] }
 0xbe7   : > { %6304 = vmatprep.subr.bf16.mxu0 %v6303_v27  ;;  %v6341_v24 = vpack.c.bf16 %v3924_v23, %v3922_v22  ;;  %v3929_v27 = vld [vmem:[#allocation21 + $0x178] sm:$0xff]  ;;  %v6383_v22 = vpack.c.bf16 %v4046_v20, %v4044_v19  ;;  %v4043_v23 = vld [vmem:[#allocation21 + $0x2a0] sm:$0xff] }
 0xbe8   : > { %v6343_v28 = vpack.c.bf16 %v3929_v27, %v3927_v25  ;;  %v4048_v25 = vld [vmem:[#allocation21 + $0x2c8] sm:$0xff]  ;;  %v4050_v27 = vld [vmem:[#allocation21 + $0x2d8] sm:$0xff] }
 0xbea   : > { %5531 = vmatmul.mubr.msk.f32.vlgmr.msra.gmra.mrb[12].mxu1 %vm3140_vm11, %v3595_v35  ;;  %6306 = vmatpush1.bf16.msra.mxu0 %v6305_v30  ;;  %v6309_v35 = vpack.c.bf16 %v3892_v34, %v3890_v33  ;;  %v3928_v30 = vld [vmem:[#allocation21 + $0x170] sm:$0xff]  ;;  %v4016_v34 = vld [vmem:[#allocation21 + $0x1c8] sm:$0xff] }
 0xbeb   : > { %6270 = vmatpush1.bf16.msra.mxu1 %v6269_v36  ;;  %3775 = vmatprep.mubr.f32.mxu1 %v7258_v26  ;;  %v3895_v36 = vld [vmem:[#allocation21 + $0x68] sm:$0xff] }
 0xbec   : > { %6272 = vmatprep.subr.bf16.mxu1 %v6271_v37  ;;  %v3897_v37 = vld [vmem:[#allocation21 + $0x78] sm:$0xff] }
 0xbed   : > { %v6311_v39 = vpack.c.bf16 %v3897_v37, %v3895_v36  ;;  %v4015_v36 = vld [vmem:[#allocation21 + $0x1c0] sm:$0xff]  ;;  %v4017_v37 = vld [vmem:[#allocation21 + $0x1d0] sm:$0xff] }
 0xbef   : > { %6274 = vmatpush1.bf16.msra.mxu1 %v6273_v50  ;;  %v3899_v50 = vld [vmem:[#allocation21 + $0x88] sm:$0xff] }
 0xbf0   : > { %6276 = vmatprep.subr.bf16.mxu1 %v6275_v47  ;;  %v3901_v47 = vld [vmem:[#allocation21 + $0x98] sm:$0xff] }
 0xbf1   : > { %v6315_v43 = vpack.c.bf16 %v3901_v47, %v3899_v50  ;;  %v3783_v47 = vld [vmem:[#allocation15 + $0x20] sm:$0x7f] }
 0xbf3   : > { %6278 = vmatpush1.bf16.msra.mxu1 %v6277_v42  ;;  %v3903_v42 = vld [vmem:[#allocation21 + $0xa8] sm:$0xff] }
 0xbf4   : > { %6280 = vmatprep.subr.bf16.mxu1 %v6279_v51  ;;  %v3905_v51 = vld [vmem:[#allocation21 + $0xb8] sm:$0xff] }
 0xbf5   : > { %v6319_v38 = vpack.c.bf16 %v3905_v51, %v3903_v42  ;;  %v4024_v42 = vld [vmem:[#allocation21 + $0x208] sm:$0xff]  ;;  %v4026_v51 = vld [vmem:[#allocation21 + $0x218] sm:$0xff] }
 0xbf6   : > { %v6363_v52 = vpack.c.bf16 %v4026_v51, %v4024_v42  ;;  %v4061_v42 = vld [vmem:[#allocation21 + $0x330] sm:$0xff]  ;;  %v4064_v51 = vld [vmem:[#allocation21 + $0x348] sm:$0xff] }
 0xbf7   : > { %6282 = vmatpush1.bf16.msra.mxu1 %v6281_v56  ;;  %v3907_v56 = vld [vmem:[#allocation21 + $0xc8] sm:$0xff] }
 0xbf8   : > { %6284 = vmatprep.subr.bf16.mxu1 %v6283_v57  ;;  %v3909_v57 = vld [vmem:[#allocation21 + $0xd8] sm:$0xff] }
 0xbf9   : > { %v6323_v59 = vpack.c.bf16 %v3909_v57, %v3907_v56  ;;  %v4028_v56 = vld [vmem:[#allocation21 + $0x228] sm:$0xff]  ;;  %v4030_v57 = vld [vmem:[#allocation21 + $0x238] sm:$0xff] }
 0xbfa   : > { %v6367_v62 = vpack.c.bf16 %v4030_v57, %v4028_v56  ;;  %v3932_v56 = vld [vmem:[#allocation21 + $0x190] sm:$0xff]  ;;  %v4063_v57 = vld [vmem:[#allocation21 + $0x340] sm:$0xff] }
 0xbfb   : > { %6286 = vmatpush1.bf16.msra.mxu1 %v6285_v1  ;;  %v3911_v1 = vld [vmem:[#allocation21 + $0xe8] sm:$0xff] }
 0xbfc   : > { %6288 = vmatprep.subr.bf16.mxu1 %v6287_v2  ;;  %v3913_v2 = vld [vmem:[#allocation21 + $0xf8] sm:$0xff] }
 0xbfd   : > { %v6327_v3 = vpack.c.bf16 %v3913_v2, %v3911_v1  ;;  %v4032_v1 = vld [vmem:[#allocation21 + $0x248] sm:$0xff]  ;;  %v4034_v2 = vld [vmem:[#allocation21 + $0x258] sm:$0xff] }
 0xbfe   : > { %v6371_v4 = vpack.c.bf16 %v4034_v2, %v4032_v1  ;;  %v3937_v1 = vld [vmem:[#allocation21 + $0x1b8] sm:$0xff]  ;;  %v4068_v2 = vld [vmem:[#allocation21 + $0x368] sm:$0xff] }
 0xbff   : > { %6290 = vmatpush1.bf16.msra.mxu1 %v6289_v7  ;;  %v3915_v7 = vld [vmem:[#allocation21 + $0x108] sm:$0xff] }
 0xc00   : > { %6292 = vmatprep.subr.bf16.mxu1 %v6291_v8  ;;  %v3917_v8 = vld [vmem:[#allocation21 + $0x118] sm:$0xff] }
 0xc01   : > { %v6331_v9 = vpack.c.bf16 %v3917_v8, %v3915_v7  ;;  %v4036_v7 = vld [vmem:[#allocation21 + $0x268] sm:$0xff]  ;;  %v4038_v8 = vld [vmem:[#allocation21 + $0x278] sm:$0xff] }
 0xc02   : > { %v6375_v10 = vpack.c.bf16 %v4038_v8, %v4036_v7 }
 0xc03   : > { %6294 = vmatpush1.bf16.msra.mxu1 %v6293_v13  ;;  %v3919_v13 = vld [vmem:[#allocation21 + $0x128] sm:$0xff] }
 0xc04   : > { %6296 = vmatprep.subr.bf16.mxu1 %v6295_v14  ;;  %v3921_v14 = vld [vmem:[#allocation21 + $0x138] sm:$0xff] }
 0xc05   : > { %v6335_v15 = vpack.c.bf16 %v3921_v14, %v3919_v13  ;;  %v4040_v13 = vld [vmem:[#allocation21 + $0x288] sm:$0xff]  ;;  %v4042_v14 = vld [vmem:[#allocation21 + $0x298] sm:$0xff] }
 0xc07   : > { %6298 = vmatpush1.bf16.msra.mxu1 %v6297_v17  ;;  %v3920_v17 = vld [vmem:[#allocation21 + $0x130] sm:$0xff] }
 0xc08   : > { %v6337_v18 = vpack.c.bf16 %v3920_v17, %v3918_v16  ;;  %v6379_v16 = vpack.c.bf16 %v4042_v14, %v4040_v13  ;;  %v4039_v17 = vld [vmem:[#allocation21 + $0x280] sm:$0xff] }
 0xc0a   : > { %3776 = vmatmul.mubr.f32.vlgmr.msra.gmra.mrb[16].mxu1 %v8062_v44  ;;  %v6307_v44 = vpack.c.bf16 %v3893_v32, %v3891_v31  ;;  %v6345_v31 = vpack.c.bf16 %v3928_v30, %v3926_v29  ;;  %v3931_v32 = vld [vmem:[#allocation21 + $0x188] sm:$0xff]  ;;  %v6387_v29 = vpack.c.bf16 %v4050_v27, %v4048_v25  ;;  %v4047_v30 = vld [vmem:[#allocation21 + $0x2c0] sm:$0xff] }
 0xc0b   : > { %3857 = vmatprep.mubr.f32.mxu1 %v7258_v26 }
 0xc0c   : > { %6308 = vmatprep.subr.bf16.mxu0 %v6307_v44  ;;  %v3933_v44 = vld [vmem:[#allocation21 + $0x198] sm:$0xff] }
 0xc0d   : > { %6310 = vmatpush1.bf16.msra.mxu0 %v6309_v35  ;;  %v6347_v33 = vpack.c.bf16 %v3933_v44, %v3931_v32  ;;  %v4018_v35 = vld [vmem:[#allocation21 + $0x1d8] sm:$0xff]  ;;  %v4052_v32 = vld [vmem:[#allocation21 + $0x2e8] sm:$0xff] }
 0xc0e   : > { %6312 = vmatprep.subr.bf16.mxu0 %v6311_v39  ;;  %v4020_v39 = vld [vmem:[#allocation21 + $0x1e8] sm:$0xff]  ;;  %v4054_v44 = vld [vmem:[#allocation21 + $0x2f8] sm:$0xff] }
 0xc0f   : > { %v6359_v61 = vpack.c.bf16 %v4022_v45, %v4020_v39  ;;  %v4058_v39 = vld [vmem:[#allocation21 + $0x318] sm:$0xff] }
 0xc11   : > { %6314 = vmatpush1.bf16.msra.mxu0 %v6313_v41  ;;  %v6355_v41 = vpack.c.bf16 %v4018_v35, %v4016_v34  ;;  %v6391_v34 = vpack.c.bf16 %v4054_v44, %v4052_v32  ;;  %v4051_v35 = vld [vmem:[#allocation21 + $0x2e0] sm:$0xff]  ;;  %v4326_v32 = vld [vmem:[#allocation21 + $0x390] sm:$0xff]  ;;  %v4329_v44 = vld [vmem:[#allocation21 + $0x3a8] sm:$0xff] }
 0xc12   : > { %6316 = vmatprep.subr.bf16.mxu0 %v6315_v43  ;;  %v6357_v43 = vpack.c.bf16 %v4017_v37, %v4015_v36  ;;  %v4053_v36 = vld [vmem:[#allocation21 + $0x2f0] sm:$0xff]  ;;  %v4056_v37 = vld [vmem:[#allocation21 + $0x308] sm:$0xff] }
 0xc13   : > { %v6393_v45 = vpack.c.bf16 %v4053_v36, %v4051_v35 }
 0xc15   : > { %6318 = vmatpush1.bf16.msra.mxu0 %v6317_v46  ;;  %v4021_v46 = vld [vmem:[#allocation21 + $0x1f0] sm:$0xff] }
 0xc16   : > { %6320 = vmatprep.subr.bf16.mxu0 %v6319_v38  ;;  %v6361_v38 = vpack.c.bf16 %v4021_v46, %v4019_v49  ;;  %v4059_v46 = vld [vmem:[#allocation21 + $0x320] sm:$0xff] }
 0xc19   : > { %6322 = vmatpush1.bf16.msra.mxu0 %v6321_v55  ;;  %v4025_v55 = vld [vmem:[#allocation21 + $0x210] sm:$0xff] }
 0xc1a   : > { %6324 = vmatprep.subr.bf16.mxu0 %v6323_v59  ;;  %v6365_v59 = vpack.c.bf16 %v4025_v55, %v4023_v53  ;;  %v3930_v55 = vld [vmem:[#allocation21 + $0x180] sm:$0xff] }
 0xc1d   : > { %6326 = vmatpush1.bf16.msra.mxu0 %v6325_v0  ;;  %v4029_v0 = vld [vmem:[#allocation21 + $0x230] sm:$0xff] }
 0xc1e   : > { %6328 = vmatprep.subr.bf16.mxu0 %v6327_v3  ;;  %v6369_v3 = vpack.c.bf16 %v4029_v0, %v4027_v63  ;;  %v3935_v0 = vld [vmem:[#allocation21 + $0x1a8] sm:$0xff] }
 0xc21   : > { %6330 = vmatpush1.bf16.msra.mxu0 %v6329_v6  ;;  %v4033_v6 = vld [vmem:[#allocation21 + $0x250] sm:$0xff] }
 0xc22   : > { %6332 = vmatprep.subr.bf16.mxu0 %v6331_v9  ;;  %v6373_v9 = vpack.c.bf16 %v4033_v6, %v4031_v5  ;;  %v3934_v5 = vld [vmem:[#allocation21 + $0x1a0] sm:$0xff]  ;;  %v3936_v6 = vld [vmem:[#allocation21 + $0x1b0] sm:$0xff] }
 0xc23   : > { %v6353_v8 = vpack.c.bf16 %v3936_v6, %v3934_v5  ;;  %v4349_v5 = vld [vmem:[#allocation21 + $0x448] sm:$0xff]  ;;  %v4351_v6 = vld [vmem:[#allocation21 + $0x458] sm:$0xff] }
 0xc25   : > { %6334 = vmatpush1.bf16.msra.mxu0 %v6333_v11  ;;  %v4037_v11 = vld [vmem:[#allocation21 + $0x270] sm:$0xff] }
 0xc26   : > { %6336 = vmatprep.subr.bf16.mxu0 %v6335_v15  ;;  %v6377_v15 = vpack.c.bf16 %v4037_v11, %v4035_v48  ;;  %v3866_v11 = vld [vmem:[#allocation18] sm:$0x3] }
 0xc27   : > { %v3871_v13 = vrot.slane %v3866_v11, %v7898_v58  ;;  %v3875_v14 = vrot.slane %v3866_v11, %v7900_v60  ;;  %v4355_v11 = vld [vmem:[#allocation21 + $0x478] sm:$0xff] }
 0xc29   : > { %6338 = vmatpush1.bf16.msra.mxu0 %v6337_v18  ;;  %v4041_v18 = vld [vmem:[#allocation21 + $0x290] sm:$0xff] }
 0xc2a   : > { %6340 = vmatprep.subr.bf16.mxu0 %v6339_v21  ;;  %v6381_v21 = vpack.c.bf16 %v4041_v18, %v4039_v17 }
 0xc2d   : > { %6342 = vmatpush1.bf16.msra.mxu0 %v6341_v24  ;;  %v4045_v24 = vld [vmem:[#allocation21 + $0x2b0] sm:$0xff] }
 0xc2e   : > { %6344 = vmatprep.subr.bf16.mxu0 %v6343_v28  ;;  %v6385_v28 = vpack.c.bf16 %v4045_v24, %v4043_v23 }
 0xc31   : > { %6346 = vmatpush1.bf16.msra.mxu0 %v6345_v31  ;;  %v4049_v31 = vld [vmem:[#allocation21 + $0x2d0] sm:$0xff] }
 0xc32   : > { %6348 = vmatprep.subr.bf16.mxu0 %v6347_v33  ;;  %v6389_v33 = vpack.c.bf16 %v4049_v31, %v4047_v30  ;;  %v4144_v30 = vld [vmem:[#allocation19 + $0x18] sm:$0x3f]  ;;  %v4324_v31 = vld [vmem:[#allocation21 + $0x380] sm:$0xff] }
 0xc33   : > { %v6413_v35 = vpack.c.bf16 %v4326_v32, %v4324_v31  ;;  %v4365_v31 = vld [vmem:[#allocation21 + $0x4c8] sm:$0xff]  ;;  %v4367_v32 = vld [vmem:[#allocation21 + $0x4d8] sm:$0xff] }
 0xcdd   : > { %v3777_v40 = vpop.f32.mrb[16].mxu1 }
 0xcde   : > { %v3779_v50 = vpop.f32.mrb[17].mxu1 }
 0xcdf   : > { %5532 = vmatprep.subr.msk.mxu1 %vm3144_vm10, %v3779_v50  ;;  %v4057_v50 = vld [vmem:[#allocation21 + $0x310] sm:$0xff] }
 0xce0   : > { %5533 = vmatpush1.msk.msra.mxu1 %vm3144_vm10, %v3777_v40  ;;  %v6395_v40 = vpack.c.bf16 %v4058_v39, %v4056_v37  ;;  %v4328_v37 = vld [vmem:[#allocation21 + $0x3a0] sm:$0xff]  ;;  %v4330_v39 = vld [vmem:[#allocation21 + $0x3b0] sm:$0xff] }
 0xce1   : > { %5534 = vmatmul.mubr.msk.f32.vlgmr.msra.gmra.mrb[12].mxu1 %vm3140_vm11, %v3783_v47  ;;  %6356 = vmatprep.subr.bf16.mxu1 %v6355_v41  ;;  %v4055_v41 = vld [vmem:[#allocation21 + $0x300] sm:$0xff]  ;;  %v4060_v47 = vld [vmem:[#allocation21 + $0x328] sm:$0xff] }
 0xce2   : > { %6358 = vmatpush1.bf16.msra.mxu1 %v6357_v43  ;;  %v4062_v43 = vld [vmem:[#allocation21 + $0x338] sm:$0xff] }
 0xce3   : > { %6360 = vmatprep.subr.bf16.mxu1 %v6359_v61  ;;  %v6397_v61 = vpack.c.bf16 %v4057_v50, %v4055_v41  ;;  %v6399_v49 = vpack.c.bf16 %v4062_v43, %v4060_v47  ;;  %v4013_v41 = vld [vmem:[#allocation19 + $0x8] sm:$0x3f]  ;;  %v6417_v50 = vpack.c.bf16 %v4330_v39, %v4328_v37  ;;  %v4332_v43 = vld [vmem:[#allocation21 + $0x3c0] sm:$0xff] }
 0xce4   : > { %v4371_v37 = vld [vmem:[#allocation21 + $0x4f8] sm:$0xff] }
 0xce6   : > { %6362 = vmatpush1.bf16.msra.mxu1 %v6361_v38  ;;  %v4066_v38 = vld [vmem:[#allocation21 + $0x358] sm:$0xff] }
 0xce7   : > { %6364 = vmatprep.subr.bf16.mxu1 %v6363_v52  ;;  %v6401_v52 = vpack.c.bf16 %v4061_v42, %v4059_v46  ;;  %v6403_v53 = vpack.c.bf16 %v4066_v38, %v4064_v51  ;;  %v4339_v46 = vld [vmem:[#allocation21 + $0x3f8] sm:$0xff]  ;;  %v4336_v38 = vld [vmem:[#allocation21 + $0x3e0] sm:$0xff] }
 0xcea   : > { %6366 = vmatpush1.bf16.msra.mxu1 %v6365_v59  ;;  %v6349_v59 = vpack.c.bf16 %v3932_v56, %v3930_v55  ;;  %v4343_v55 = vld [vmem:[#allocation21 + $0x418] sm:$0xff] }
 0xceb   : > { %6368 = vmatprep.subr.bf16.mxu1 %v6367_v62  ;;  %v4065_v62 = vld [vmem:[#allocation21 + $0x350] sm:$0xff] }
 0xcec   : > { %v6405_v63 = vpack.c.bf16 %v4065_v62, %v4063_v57  ;;  %6350 = vmatpush1.bf16.msra.mxu0 %v6349_v59  ;;  %v4340_v59 = vld [vmem:[#allocation21 + $0x400] sm:$0xff]  ;;  %v4342_v62 = vld [vmem:[#allocation21 + $0x410] sm:$0xff] }
 0xcee   : > { %6370 = vmatpush1.bf16.msra.mxu1 %v6369_v3  ;;  %v6351_v3 = vpack.c.bf16 %v3937_v1, %v3935_v0  ;;  %v4347_v0 = vld [vmem:[#allocation21 + $0x438] sm:$0xff]  ;;  %v6429_v1 = vpack.c.bf16 %v4342_v62, %v4340_v59  ;;  %v4568_v59 = vld [vmem:[#allocation22 + $0x8] sm:$0xff] }
 0xcef   : > { %6372 = vmatprep.subr.bf16.mxu1 %v6371_v4  ;;  %v4070_v4 = vld [vmem:[#allocation21 + $0x378] sm:$0xff] }
 0xcf0   : > { %v6407_v7 = vpack.c.bf16 %v4070_v4, %v4068_v2  ;;  %6352 = vmatprep.subr.bf16.mxu0 %v6351_v3  ;;  %v4344_v3 = vld [vmem:[#allocation21 + $0x420] sm:$0xff]  ;;  %v4346_v4 = vld [vmem:[#allocation21 + $0x430] sm:$0xff] }
 0xcf1   : > { %6354 = vmatpush1.bf16.msra.mxu0 %v6353_v8  ;;  %v6435_v8 = vpack.c.bf16 %v4351_v6, %v4349_v5  ;;  %v4573_v5 = vld [vmem:[#allocation22 + $0x30] sm:$0xff]  ;;  %v4574_v6 = vld [vmem:[#allocation22 + $0x38] sm:$0xff] }
 0xcf2   : > { %6374 = vmatpush1.bf16.msra.mxu1 %v6373_v9  ;;  %v4067_v9 = vld [vmem:[#allocation21 + $0x360] sm:$0xff] }
 0xcf3   : > { %6376 = vmatprep.subr.bf16.mxu1 %v6375_v10  ;;  %v4069_v10 = vld [vmem:[#allocation21 + $0x370] sm:$0xff] }
 0xcf4   : > { %v6409_v48 = vpack.c.bf16 %v4069_v10, %v4067_v9  ;;  %v4348_v9 = vld [vmem:[#allocation21 + $0x440] sm:$0xff]  ;;  %v4350_v10 = vld [vmem:[#allocation21 + $0x450] sm:$0xff] }
 0xcf6   : > { %6378 = vmatpush1.bf16.msra.mxu1 %v6377_v15 }
 0xcf7   : > { %6380 = vmatprep.subr.bf16.mxu1 %v6379_v16 }
 0xcfa   : > { %6382 = vmatpush1.bf16.msra.mxu1 %v6381_v21  ;;  %v4325_v21 = vld [vmem:[#allocation21 + $0x388] sm:$0xff] }
 0xcfb   : > { %6384 = vmatprep.subr.bf16.mxu1 %v6383_v22  ;;  %v4327_v22 = vld [vmem:[#allocation21 + $0x398] sm:$0xff] }
 0xcfe   : > { %6386 = vmatpush1.bf16.msra.mxu1 %v6385_v28  ;;  %v4143_v28 = vld [vmem:[#allocation19 + $0x10] sm:$0xff] }
 0xcff   : > { %6388 = vmatprep.subr.bf16.mxu1 %v6387_v29  ;;  %v6411_v29 = vpack.c.bf16 %v4327_v22, %v4325_v21  ;;  %v4356_v22 = vld [vmem:[#allocation21 + $0x480] sm:$0xff] }
 0xd02   : > { %6390 = vmatpush1.bf16.msra.mxu1 %v6389_v33  ;;  %v4331_v33 = vld [vmem:[#allocation21 + $0x3b8] sm:$0xff] }
 0xd03   : > { %6392 = vmatprep.subr.bf16.mxu1 %v6391_v34  ;;  %v4012_v34 = vld [vmem:[#allocation19] sm:$0xff]  ;;  %v6415_v36 = vpack.c.bf16 %v4331_v33, %v4329_v44  ;;  %v6451_v33 = vpack.c.bf16 %v4367_v32, %v4365_v31  ;;  %v4590_v31 = vld [vmem:[#allocation22 + $0xb8] sm:$0xff] }
 0xd06   : > { %6394 = vmatpush1.bf16.msra.mxu1 %v6393_v45  ;;  %v4333_v45 = vld [vmem:[#allocation21 + $0x3c8] sm:$0xff] }
 0xd07   : > { %6396 = vmatprep.subr.bf16.mxu1 %v6395_v40  ;;  %v4335_v40 = vld [vmem:[#allocation21 + $0x3d8] sm:$0xff] }
 0xd08   : > { %v6419_v47 = vpack.c.bf16 %v4335_v40, %v4333_v45  ;;  %v4368_v40 = vld [vmem:[#allocation21 + $0x4e0] sm:$0xff] }
 0xd0a   : > { %6398 = vmatpush1.bf16.msra.mxu1 %v6397_v61  ;;  %v4334_v61 = vld [vmem:[#allocation21 + $0x3d0] sm:$0xff] }
 0xd0b   : > { %6400 = vmatprep.subr.bf16.mxu1 %v6399_v49  ;;  %v4337_v49 = vld [vmem:[#allocation21 + $0x3e8] sm:$0xff]  ;;  %v6421_v42 = vpack.c.bf16 %v4334_v61, %v4332_v43 }
 0xd0c   : > { %v6423_v51 = vpack.c.bf16 %v4339_v46, %v4337_v49  ;;  %v4372_v49 = vld [vmem:[#allocation21 + $0x500] sm:$0xff]  ;;  %v4374_v46 = vld [vmem:[#allocation21 + $0x510] sm:$0xff] }
 0xd0e   : > { %6402 = vmatpush1.bf16.msra.mxu1 %v6401_v52  ;;  %v4338_v52 = vld [vmem:[#allocation21 + $0x3f0] sm:$0xff] }
 0xd0f   : > { %6404 = vmatprep.subr.bf16.mxu1 %v6403_v53  ;;  %v4341_v53 = vld [vmem:[#allocation21 + $0x408] sm:$0xff]  ;;  %v6425_v56 = vpack.c.bf16 %v4338_v52, %v4336_v38  ;;  %v6461_v38 = vpack.c.bf16 %v4374_v46, %v4372_v49  ;;  %v4688_v49 = vld [vmem:[#allocation22 + $0x118] sm:$0xff] }
 0xd10   : > { %v6427_v57 = vpack.c.bf16 %v4343_v55, %v4341_v53  ;;  %v4376_v53 = vld [vmem:[#allocation21 + $0x520] sm:$0xff]  ;;  %v4378_v55 = vld [vmem:[#allocation21 + $0x530] sm:$0xff] }
 0xd12   : > { %6406 = vmatpush1.bf16.msra.mxu1 %v6405_v63  ;;  %v4345_v63 = vld [vmem:[#allocation21 + $0x428] sm:$0xff] }
 0xd13   : > { %6408 = vmatprep.subr.bf16.mxu1 %v6407_v7  ;;  %v6431_v2 = vpack.c.bf16 %v4347_v0, %v4345_v63  ;;  %v6433_v7 = vpack.c.bf16 %v4346_v4, %v4344_v3  ;;  %v4569_v63 = vld [vmem:[#allocation22 + $0x10] sm:$0xff]  ;;  %v4570_v0 = vld [vmem:[#allocation22 + $0x18] sm:$0xff]  ;;  %v4572_v3 = vld [vmem:[#allocation22 + $0x28] sm:$0xff] }
 0xd16   : > { %6410 = vmatpush1.bf16.msra.mxu1 %v6409_v48  ;;  %v4353_v48 = vld [vmem:[#allocation21 + $0x468] sm:$0xff] }
 0xd17   : > { %6467 = vmatprep.subr.bf16.mxu1 %v7259_v54 }
 0xdb4   : > { %v3859_v15 = vpop.f32.mrb[12].mxu1 }
 0xdb5   : > { %v3878_v16 = vadd.f32 %v3871_v13, %v3859_v15  ;;  %v3861_v17 = vpop.f32.mrb[13].mxu1  ;;  %v6437_v13 = vpack.c.bf16 %v4350_v10, %v4348_v9  ;;  %v4352_v15 = vld [vmem:[#allocation21 + $0x460] sm:$0xff]  ;;  %v4577_v10 = vld [vmem:[#allocation22 + $0x50] sm:$0xff] }
 0xdb6   : > { %v3879_v18 = vadd.f32 %v3875_v14, %v3861_v17  ;;  %v6439_v14 = vpack.c.bf16 %v4355_v11, %v4353_v48  ;;  %v4357_v17 = vld [vmem:[#allocation21 + $0x488] sm:$0xff]  ;;  %v4578_v48 = vld [vmem:[#allocation22 + $0x58] sm:$0xff] }
 0xdb7   : > { %v8095_v20 = vmax.f32 %v3878_v16, 0.0  ;;  %v4354_v16 = vld [vmem:[#allocation21 + $0x470] sm:$0xff]  ;;  %v6483_v11 = vpack.c.bf16 %v4578_v48, %v4577_v10  ;;  %v4591_v48 = vld [vmem:[#allocation22 + $0xc0] sm:$0xff] }
 0xdb8   : > { %v3881_v19 = vmax.f32 %v3879_v18, 0.0  ;;  %v4359_v18 = vld [vmem:[#allocation21 + $0x498] sm:$0xff] }
 0xdb9   : > { %v6443_v21 = vpack.c.bf16 %v4359_v18, %v4357_v17  ;;  %v4582_v17 = vld [vmem:[#allocation22 + $0x78] sm:$0xff] }
 0xdba   : > { %5535 = vmatprep.mubr.msk.f32.mxu0 %vm1648_vm7, %v3881_v19  ;;  %5536 = vmatprep.mubr.msk.f32.mxu1 %vm1648_vm7, %v3881_v19 }
 0xdbb   : > { %4006 = vmatmul.mubr.f32.vlgmr.msra.gmra.mrb[32].mxu0 %v8095_v20  ;;  %4136 = vmatmul.mubr.f32.vlgmr.msra.gmra.mrb[18].mxu1 %v8095_v20 }
 0xdbc   : > { %4221 = vmatprep.mubr.f32.mxu0 %v7258_v26 }
 0xe8e   : > { %v4007_v23 = vpop.f32.mrb[32].mxu0  ;;  %v4137_v24 = vpop.f32.mrb[18].mxu1 }
 0xe8f   : > { %v4009_v25 = vpop.f32.mrb[33].mxu0  ;;  %v4139_v27 = vpop.f32.mrb[19].mxu1 }
 0xe90   : > { %5537 = vmatprep.subr.msk.mxu0 %vm2027_vm8, %v4139_v27 }
 0xe91   : > { %5538 = vmatpush1.msk.msra.mxu0 %vm2027_vm8, %v4137_v24  ;;  %v4361_v24 = vld [vmem:[#allocation21 + $0x4a8] sm:$0xff] }
 0xe92   : > { %5539 = vmatmul.mubr.msk.f32.vlgmr.msra.gmra.mrb[34].mxu0 %vm2023_vm9, %v4143_v28  ;;  %5541 = vmatprep.subr.msk.mxu0 %vm2027_vm8, %v4009_v25  ;;  %v4363_v25 = vld [vmem:[#allocation21 + $0x4b8] sm:$0xff] }
 0xe93   : > { %5542 = vmatpush1.msk.msra.mxu0 %vm2027_vm8, %v4007_v23  ;;  %4227 = vmatprep.mubr.f32.mxu0 %v7258_v26  ;;  %v4358_v23 = vld [vmem:[#allocation21 + $0x490] sm:$0xff]  ;;  %v6447_v28 = vpack.c.bf16 %v4363_v25, %v4361_v24  ;;  %v4586_v24 = vld [vmem:[#allocation22 + $0x98] sm:$0xff] }
 0xe94   : > { %6412 = vmatprep.subr.bf16.mxu0 %v6411_v29  ;;  %v6445_v27 = vpack.c.bf16 %v4358_v23, %v4356_v22  ;;  %v4360_v29 = vld [vmem:[#allocation21 + $0x4a0] sm:$0xff]  ;;  %v4585_v23 = vld [vmem:[#allocation22 + $0x90] sm:$0xff] }
 0xe95   : > { %v6495_v25 = vpack.c.bf16 %v4586_v24, %v4585_v23  ;;  %v4547_v24 = vld [vmem:[%s8277_s15] sm:$0x3] }
 0xe96   : > { %5540 = vmatmul.mubr.msk.f32.gmra.mrb[36].mxu0 %vm2023_vm9, %v4144_v30  ;;  %v4362_v30 = vld [vmem:[#allocation21 + $0x4b0] sm:$0xff] }
 0xe97   : > { %4310 = vmatprep.mubr.f32.mxu0 %v7258_v26  ;;  %v6449_v44 = vpack.c.bf16 %v4362_v30, %v4360_v29  ;;  %v4589_v30 = vld [vmem:[#allocation22 + $0xb0] sm:$0xff] }
 0xe98   : > { %v6501_v32 = vpack.c.bf16 %v4590_v31, %v4589_v30 }
 0xe9a   : > { %5543 = vmatmul.mubr.msk.f32.vlgmr.msra.gmra.mrb[34].mxu0 %vm2023_vm9, %v4012_v34  ;;  %v4364_v34 = vld [vmem:[#allocation21 + $0x4c0] sm:$0xff] }
 0xe9b   : > { %6414 = vmatpush1.bf16.msra.mxu0 %v6413_v35  ;;  %4316 = vmatprep.mubr.f32.mxu0 %v7258_v26  ;;  %v4366_v35 = vld [vmem:[#allocation21 + $0x4d0] sm:$0xff] }
 0xe9c   : > { %6416 = vmatprep.subr.bf16.mxu0 %v6415_v36  ;;  %v4369_v36 = vld [vmem:[#allocation21 + $0x4e8] sm:$0xff]  ;;  %v6453_v39 = vpack.c.bf16 %v4366_v35, %v4364_v34 }
 0xe9d   : > { %v6455_v45 = vpack.c.bf16 %v4371_v37, %v4369_v36  ;;  %v4452_v36 = vld [vmem:[#allocation19 + $0x20] sm:$0xff] }
 0xe9e   : > { %5544 = vmatmul.mubr.msk.f32.gmra.mrb[36].mxu0 %vm2023_vm9, %v4013_v41  ;;  %v4370_v41 = vld [vmem:[#allocation21 + $0x4f0] sm:$0xff] }
 0xe9f   : > { %6418 = vmatpush1.bf16.msra.mxu0 %v6417_v50  ;;  %5545 = vmatprep.mubr.msk.f32.mxu0 %vm1648_vm7, %v3881_v19  ;;  %v6441_v19 = vpack.c.bf16 %v4354_v16, %v4352_v15  ;;  %v4373_v50 = vld [vmem:[#allocation21 + $0x508] sm:$0xff]  ;;  %v6457_v43 = vpack.c.bf16 %v4370_v41, %v4368_v40  ;;  %v4581_v16 = vld [vmem:[#allocation22 + $0x70] sm:$0xff]  ;;  %v4453_v40 = vld [vmem:[#allocation19 + $0x28] sm:$0x3f] }
 0xea0   : > { %6420 = vmatprep.subr.bf16.mxu0 %v6419_v47  ;;  %v4375_v47 = vld [vmem:[#allocation21 + $0x518] sm:$0xff]  ;;  %v6489_v18 = vpack.c.bf16 %v4582_v17, %v4581_v16  ;;  %v4593_v17 = vld [vmem:[#allocation22 + $0xd0] sm:$0xff] }
 0xea1   : > { %v6459_v61 = vpack.c.bf16 %v4375_v47, %v4373_v50  ;;  %v4685_v50 = vld [vmem:[#allocation22 + $0x100] sm:$0xff]  ;;  %v4686_v47 = vld [vmem:[#allocation22 + $0x108] sm:$0xff] }
 0xea3   : > { %6422 = vmatpush1.bf16.msra.mxu0 %v6421_v42  ;;  %v4377_v42 = vld [vmem:[#allocation21 + $0x528] sm:$0xff] }
 0xea4   : > { %6424 = vmatprep.subr.bf16.mxu0 %v6423_v51  ;;  %v4379_v51 = vld [vmem:[#allocation21 + $0x538] sm:$0xff] }
 0xea5   : > { %v6463_v52 = vpack.c.bf16 %v4379_v51, %v4377_v42  ;;  %v4690_v42 = vld [vmem:[#allocation22 + $0x128] sm:$0xff] }
 0xea7   : > { %6426 = vmatpush1.bf16.msra.mxu0 %v6425_v56  ;;  %v6465_v56 = vpack.c.bf16 %v4378_v55, %v4376_v53  ;;  %v4693_v55 = vld [vmem:[#allocation22 + $0x140] sm:$0xff] }
 0xea8   : > { %6428 = vmatprep.subr.bf16.mxu0 %v6427_v57  ;;  %v4567_v57 = vld [vmem:[#allocation22] sm:$0xff] }
 0xea9   : > { %v6468_v62 = vpack.c.bf16 %v4568_v59, %v4567_v57  ;;  %v4695_v59 = vld [vmem:[#allocation22 + $0x150] sm:$0xff] }
 0xeab   : > { %6430 = vmatpush1.bf16.msra.mxu0 %v6429_v1  ;;  %6469 = vmatpush1.bf16.msra.mxu1 %v6468_v62  ;;  %v6471_v1 = vpack.c.bf16 %v4570_v0, %v4569_v63  ;;  %v4696_v62 = vld [vmem:[#allocation22 + $0x158] sm:$0xff]  ;;  %v4697_v0 = vld [vmem:[#allocation22 + $0x160] sm:$0xff] }
 0xeac   : > { %6432 = vmatprep.subr.bf16.mxu0 %v6431_v2  ;;  %6470 = vmatprep.subr.bf16.mxu1 %v7259_v54  ;;  %v4571_v2 = vld [vmem:[#allocation22 + $0x20] sm:$0xff]  ;;  %v6531_v63 = vpack.c.bf16 %v4696_v62, %v4695_v59  ;;  %v4992_v59 = vld [vmem:[#allocation22 + $0x1d0] sm:$0xff]  ;;  %v4993_v62 = vld [vmem:[#allocation22 + $0x1d8] sm:$0xff] }
 0xead   : > { %v6474_v4 = vpack.c.bf16 %v4572_v3, %v4571_v2  ;;  %v4699_v3 = vld [vmem:[#allocation22 + $0x170] sm:$0xff] }
 0xeaf   : > { %6434 = vmatpush1.bf16.msra.mxu0 %v6433_v7  ;;  %6472 = vmatpush1.bf16.msra.mxu1 %v6471_v1  ;;  %v4575_v7 = vld [vmem:[#allocation22 + $0x40] sm:$0xff]  ;;  %v4698_v1 = vld [vmem:[#allocation22 + $0x168] sm:$0xff] }
 0xeb0   : > { %6436 = vmatprep.subr.bf16.mxu0 %v6435_v8  ;;  %6473 = vmatprep.subr.bf16.mxu1 %v7259_v54  ;;  %v4576_v8 = vld [vmem:[#allocation22 + $0x48] sm:$0xff]  ;;  %v6534_v2 = vpack.c.bf16 %v4698_v1, %v4697_v0  ;;  %v6567_v0 = vpack.c.bf16 %v4993_v62, %v4992_v59  ;;  %v4994_v1 = vld [vmem:[#allocation22 + $0x1e0] sm:$0xff] }
 0xeb1   : > { %v6480_v9 = vpack.c.bf16 %v4576_v8, %v4575_v7  ;;  %v4703_v8 = vld [vmem:[#allocation22 + $0x190] sm:$0xff] }
 0xeb3   : > { %6438 = vmatpush1.bf16.msra.mxu0 %v6437_v13  ;;  %6475 = vmatpush1.bf16.msra.mxu1 %v6474_v4  ;;  %v4579_v13 = vld [vmem:[#allocation22 + $0x60] sm:$0xff]  ;;  %v4700_v4 = vld [vmem:[#allocation22 + $0x178] sm:$0xff] }
 0xeb4   : > { %6440 = vmatprep.subr.bf16.mxu0 %v6439_v14  ;;  %6476 = vmatprep.subr.bf16.mxu1 %v7259_v54  ;;  %v4580_v14 = vld [vmem:[#allocation22 + $0x68] sm:$0xff] }
 0xeb5   : > { %v6486_v15 = vpack.c.bf16 %v4580_v14, %v4579_v13  ;;  %v4705_v13 = vld [vmem:[#allocation22 + $0x1a0] sm:$0xff] }
 0xeb7   : > { %6442 = vmatpush1.bf16.msra.mxu0 %v6441_v19  ;;  %v4583_v19 = vld [vmem:[#allocation22 + $0x80] sm:$0xff] }
 0xeb8   : > { %6444 = vmatprep.subr.bf16.mxu0 %v6443_v21  ;;  %v4584_v21 = vld [vmem:[#allocation22 + $0x88] sm:$0xff] }
 0xeb9   : > { %v6492_v22 = vpack.c.bf16 %v4584_v21, %v4583_v19  ;;  %v4707_v19 = vld [vmem:[#allocation22 + $0x1b0] sm:$0xff] }
 0xebb   : > { %6446 = vmatpush1.bf16.msra.mxu0 %v6445_v27  ;;  %v4587_v27 = vld [vmem:[#allocation22 + $0xa0] sm:$0xff] }
 0xebc   : > { %6448 = vmatprep.subr.bf16.mxu0 %v6447_v28  ;;  %v4588_v28 = vld [vmem:[#allocation22 + $0xa8] sm:$0xff] }
 0xebd   : > { %v6498_v29 = vpack.c.bf16 %v4588_v28, %v4587_v27  ;;  %v4556_v27 = vrot.slane %v4547_v24, %v7900_v60 }
 0xebf   : > { %6450 = vmatpush1.bf16.msra.mxu0 %v6449_v44  ;;  %v4681_v44 = vld [vmem:[#allocation22 + $0xe0] sm:$0xff] }
 0xec0   : > { %6452 = vmatprep.subr.bf16.mxu0 %v6451_v33  ;;  %v4682_v33 = vld [vmem:[#allocation22 + $0xe8] sm:$0xff] }
 0xec1   : > { %v6510_v37 = vpack.c.bf16 %v4682_v33, %v4681_v44 }
 0xec3   : > { %6454 = vmatpush1.bf16.msra.mxu0 %v6453_v39  ;;  %v4683_v39 = vld [vmem:[#allocation22 + $0xf0] sm:$0xff] }
 0xec4   : > { %6456 = vmatprep.subr.bf16.mxu0 %v6455_v45  ;;  %v4684_v45 = vld [vmem:[#allocation22 + $0xf8] sm:$0xff] }
 0xec5   : > { %v6513_v41 = vpack.c.bf16 %v4684_v45, %v4683_v39 }
 0xec7   : > { %6458 = vmatpush1.bf16.msra.mxu0 %v6457_v43  ;;  %v6516_v43 = vpack.c.bf16 %v4686_v47, %v4685_v50 }
 0xec8   : > { %6460 = vmatprep.subr.bf16.mxu0 %v6459_v61  ;;  %v4687_v61 = vld [vmem:[#allocation22 + $0x110] sm:$0xff] }
 0xec9   : > { %v6519_v46 = vpack.c.bf16 %v4688_v49, %v4687_v61 }
 0xecb   : > { %6462 = vmatpush1.bf16.msra.mxu0 %v6461_v38  ;;  %v4691_v38 = vld [vmem:[#allocation22 + $0x130] sm:$0xff] }
 0xecc   : > { %6464 = vmatprep.subr.bf16.mxu0 %v6463_v52  ;;  %v4692_v52 = vld [vmem:[#allocation22 + $0x138] sm:$0xff] }
 0xecd   : > { %v6525_v53 = vpack.c.bf16 %v4692_v52, %v4691_v38  ;;  %v4676_v38 = vld [vmem:[%s8278_s16] sm:$0xff]  ;;  %v4990_v52 = vld [vmem:[#allocation22 + $0x1c0] sm:$0xff] }
 0xecf   : > { %6466 = vmatpush1.bf16.msra.mxu0 %v6465_v56  ;;  %v4694_v56 = vld [vmem:[#allocation22 + $0x148] sm:$0xff] }
 0xed0   : > { %v6528_v57 = vpack.c.bf16 %v4694_v56, %v4693_v55  ;;  %v4677_v55 = vld [vmem:[%s8278_s16 + $0x8] sm:$0xff] }
 0xed2   : > { %4445 = vmatmul.mubr.f32.vlgmr.msra.gmra.mrb[38].mxu0 %v8095_v20  ;;  %v6477_v20 = vpack.c.bf16 %v4574_v6, %v4573_v5  ;;  %v6537_v5 = vpack.c.bf16 %v4700_v4, %v4699_v3  ;;  %v4701_v6 = vld [vmem:[#allocation22 + $0x180] sm:$0xff]  ;;  %v4996_v4 = vld [vmem:[#allocation22 + $0x1f0] sm:$0xff] }
 0xed3   : > { %4530 = vmatprep.mubr.f32.mxu0 %v7258_v26 }
 0xed4   : > { %6478 = vmatpush1.bf16.msra.mxu1 %v6477_v20  ;;  %v4702_v20 = vld [vmem:[#allocation22 + $0x188] sm:$0xff] }
 0xed5   : > { %6479 = vmatprep.subr.bf16.mxu1 %v7259_v54  ;;  %v6540_v7 = vpack.c.bf16 %v4702_v20, %v4701_v6  ;;  %v4998_v20 = vld [vmem:[#allocation22 + $0x200] sm:$0xff] }
 0xed8   : > { %6481 = vmatpush1.bf16.msra.mxu1 %v6480_v9  ;;  %v4704_v9 = vld [vmem:[#allocation22 + $0x198] sm:$0xff] }
 0xed9   : > { %6482 = vmatprep.subr.bf16.mxu1 %v7259_v54  ;;  %v6543_v10 = vpack.c.bf16 %v4704_v9, %v4703_v8  ;;  %v5000_v9 = vld [vmem:[#allocation22 + $0x210] sm:$0xff] }
 0xedc   : > { %6484 = vmatpush1.bf16.msra.mxu1 %v6483_v11  ;;  %v4592_v11 = vld [vmem:[#allocation22 + $0xc8] sm:$0xff] }
 0xedd   : > { %6485 = vmatprep.subr.bf16.mxu1 %v7259_v54  ;;  %v6504_v14 = vpack.c.bf16 %v4592_v11, %v4591_v48  ;;  %v5002_v11 = vld [vmem:[#allocation22 + $0x220] sm:$0xff] }
 0xee0   : > { %6487 = vmatpush1.bf16.msra.mxu1 %v6486_v15  ;;  %v4706_v15 = vld [vmem:[#allocation22 + $0x1a8] sm:$0xff] }
 0xee1   : > { %6488 = vmatprep.subr.bf16.mxu1 %v7259_v54  ;;  %v6546_v16 = vpack.c.bf16 %v4706_v15, %v4705_v13  ;;  %v5003_v13 = vld [vmem:[#allocation22 + $0x228] sm:$0xff]  ;;  %v5004_v15 = vld [vmem:[#allocation22 + $0x230] sm:$0xff] }
 0xee4   : > { %6490 = vmatpush1.bf16.msra.mxu1 %v6489_v18  ;;  %v4594_v18 = vld [vmem:[#allocation22 + $0xd8] sm:$0xff] }
 0xee5   : > { %6491 = vmatprep.subr.bf16.mxu1 %v7259_v54  ;;  %v6507_v21 = vpack.c.bf16 %v4594_v18, %v4593_v17  ;;  %v5006_v18 = vld [vmem:[#allocation22 + $0x240] sm:$0xff] }
 0xee8   : > { %6493 = vmatpush1.bf16.msra.mxu1 %v6492_v22  ;;  %v4708_v22 = vld [vmem:[#allocation22 + $0x1b8] sm:$0xff] }
 0xee9   : > { %6494 = vmatprep.subr.bf16.mxu1 %v7259_v54  ;;  %v6549_v23 = vpack.c.bf16 %v4708_v22, %v4707_v19  ;;  %v5007_v19 = vld [vmem:[#allocation22 + $0x248] sm:$0xff]  ;;  %v5008_v22 = vld [vmem:[#allocation22 + $0x250] sm:$0xff] }
 0xeec   : > { %6496 = vmatpush1.bf16.msra.mxu1 %v6495_v25  ;;  %v4552_v25 = vrot.slane %v4547_v24, %v7898_v58 }
 0xeed   : > { %6497 = vmatprep.subr.bf16.mxu1 %v7259_v54 }
 0xef0   : > { %6499 = vmatpush1.bf16.msra.mxu1 %v6498_v29 }
 0xef1   : > { %6500 = vmatprep.subr.bf16.mxu1 %v7259_v54 }
 0xef4   : > { %6502 = vmatpush1.bf16.msra.mxu1 %v6501_v32 }
 0xef5   : > { %6503 = vmatprep.subr.bf16.mxu1 %v7259_v54 }
 0xef8   : > { %6505 = vmatpush1.bf16.msra.mxu1 %v6504_v14  ;;  %v6582_v14 = vpack.c.bf16 %v5003_v13, %v5002_v11 }
 0xef9   : > { %6506 = vmatprep.subr.bf16.mxu1 %v7259_v54 }
 0xefc   : > { %6508 = vmatpush1.bf16.msra.mxu1 %v6507_v21  ;;  %v6588_v21 = vpack.c.bf16 %v5007_v19, %v5006_v18 }
 0xfa5   : > { %v4446_v34 = vpop.f32.mrb[38].mxu0 }
 0xfa6   : > { %v4448_v35 = vpop.f32.mrb[39].mxu0 }
 0xfa7   : > { %5546 = vmatprep.subr.msk.mxu0 %vm2027_vm8, %v4448_v35 }
 0xfa8   : > { %5547 = vmatpush1.msk.msra.mxu0 %vm2027_vm8, %v4446_v34 }
 0xfa9   : > { %5548 = vmatmul.mubr.msk.f32.vlgmr.msra.gmra.mrb[34].mxu0 %vm2023_vm9, %v4452_v36  ;;  %6509 = vmatprep.subr.bf16.mxu0 %v7259_v54 }
 0xfaa   : > { %4536 = vmatprep.mubr.f32.mxu0 %v7258_v26  ;;  %6511 = vmatpush1.bf16.msra.mxu0 %v6510_v37  ;;  %v4689_v26 = vld [vmem:[#allocation22 + $0x120] sm:$0xff]  ;;  %v5554_v37 = vld [vmem:[%s8278_s16 + $0x20] sm:$0xff] }
 0xfab   : > { %6512 = vmatprep.subr.bf16.mxu0 %v7259_v54  ;;  %v6522_v51 = vpack.c.bf16 %v4690_v42, %v4689_v26  ;;  %v5555_v26 = vld [vmem:[%s8278_s16 + $0x28] sm:$0xff]  ;;  %v5556_v42 = vld [vmem:[%s8278_s16 + $0x30] sm:$0xff] }
 0xfad   : > { %5549 = vmatmul.mubr.msk.f32.gmra.mrb[36].mxu0 %vm2023_vm9, %v4453_v40 }
 0xfae   : > { %6514 = vmatpush1.bf16.msra.mxu0 %v6513_v41 }
 0xfaf   : > { %6515 = vmatprep.subr.bf16.mxu0 %v7259_v54 }
 0xfb2   : > { %6517 = vmatpush1.bf16.msra.mxu0 %v6516_v43 }
 0xfb3   : > { %6518 = vmatprep.subr.bf16.mxu0 %v7259_v54 }
 0xfb6   : > { %6520 = vmatpush1.bf16.msra.mxu0 %v6519_v46 }
 0xfb7   : > { %6521 = vmatprep.subr.bf16.mxu0 %v7259_v54 }
 0xfba   : > { %6523 = vmatpush1.bf16.msra.mxu0 %v6522_v51  ;;  %v5557_v51 = vld [vmem:[%s8278_s16 + $0x38] sm:$0xf] }
 0xfbb   : > { %6524 = vmatprep.subr.bf16.mxu0 %v7259_v54 }
 0xfbe   : > { %6526 = vmatpush1.bf16.msra.mxu0 %v6525_v53  ;;  %v4991_v53 = vld [vmem:[#allocation22 + $0x1c8] sm:$0xff] }
 0xfbf   : > { %6527 = vmatprep.subr.bf16.mxu0 %v7259_v54  ;;  %v6564_v56 = vpack.c.bf16 %v4991_v53, %v4990_v52 }
 0xfc2   : > { %6529 = vmatpush1.bf16.msra.mxu0 %v6528_v57  ;;  %v4678_v57 = vld [vmem:[%s8278_s16 + $0x10] sm:$0xff] }
 0xfc3   : > { %6530 = vmatprep.subr.bf16.mxu0 %v7259_v54 }
 0xfc6   : > { %6532 = vmatpush1.bf16.msra.mxu0 %v6531_v63  ;;  %v4679_v63 = vld [vmem:[%s8278_s16 + $0x18] sm:$0xf] }
 0xfc7   : > { %6533 = vmatprep.subr.bf16.mxu0 %v7259_v54 }
 0xfca   : > { %6535 = vmatpush1.bf16.msra.mxu0 %v6534_v2  ;;  %v4995_v2 = vld [vmem:[#allocation22 + $0x1e8] sm:$0xff] }
 0xfcb   : > { %6536 = vmatprep.subr.bf16.mxu0 %v7259_v54  ;;  %v6570_v3 = vpack.c.bf16 %v4995_v2, %v4994_v1 }
 0xfce   : > { %6538 = vmatpush1.bf16.msra.mxu0 %v6537_v5  ;;  %v4997_v5 = vld [vmem:[#allocation22 + $0x1f8] sm:$0xff] }
 0xfcf   : > { %6539 = vmatprep.subr.bf16.mxu0 %v7259_v54  ;;  %v6573_v6 = vpack.c.bf16 %v4997_v5, %v4996_v4 }
 0xfd2   : > { %6541 = vmatpush1.bf16.msra.mxu0 %v6540_v7  ;;  %v4999_v7 = vld [vmem:[#allocation22 + $0x208] sm:$0xff] }
 0xfd3   : > { %6542 = vmatprep.subr.bf16.mxu0 %v7259_v54  ;;  %v6576_v8 = vpack.c.bf16 %v4999_v7, %v4998_v20 }
 0xfd6   : > { %6544 = vmatpush1.bf16.msra.mxu0 %v6543_v10  ;;  %v5001_v10 = vld [vmem:[#allocation22 + $0x218] sm:$0xff] }
 0xfd7   : > { %6545 = vmatprep.subr.bf16.mxu0 %v7259_v54  ;;  %v6579_v48 = vpack.c.bf16 %v5001_v10, %v5000_v9 }
 0xfda   : > { %6547 = vmatpush1.bf16.msra.mxu0 %v6546_v16  ;;  %v5005_v16 = vld [vmem:[#allocation22 + $0x238] sm:$0xff] }
 0xfdb   : > { %6548 = vmatprep.subr.bf16.mxu0 %v7259_v54  ;;  %v6585_v17 = vpack.c.bf16 %v5005_v16, %v5004_v15 }
 0xfde   : > { %6550 = vmatpush1.bf16.msra.mxu0 %v6549_v23  ;;  %v5009_v23 = vld [vmem:[#allocation22 + $0x258] sm:$0xff] }
 0xfdf   : > { %v6591_v24 = vpack.c.bf16 %v5009_v23, %v5008_v22 }
0x107c   : > { %v4532_v28 = vpop.f32.mrb[34].mxu0 }
0x107d   : > { %v4559_v29 = vadd.f32 %v4552_v25, %v4532_v28  ;;  %v4534_v30 = vpop.f32.mrb[35].mxu0 }
0x107e   : > { %v4560_v31 = vadd.f32 %v4556_v27, %v4534_v30  ;;  %v5013_v30 = vld [vmem:[#allocation22 + $0x278] sm:$0xff] }
0x107f   : > { %v8153_v33 = vmax.f32 %v4559_v29, 0.0  ;;  %v5012_v29 = vld [vmem:[#allocation22 + $0x270] sm:$0xff] }
0x1080   : > { %v4564_v32 = vmax.f32 %v4560_v31, 0.0  ;;  %v4538_v44 = vpop.f32.mrb[36].mxu0  ;;  %v6597_v31 = vpack.c.bf16 %v5013_v30, %v5012_v29 }
0x1081   : > { %v4561_v34 = vadd.f32 %v4552_v25, %v4538_v44  ;;  %v4540_v35 = vpop.f32.mrb[37].mxu0  ;;  %v5010_v25 = vld [vmem:[#allocation22 + $0x260] sm:$0xff]  ;;  %v5015_v44 = vld [vmem:[#allocation22 + $0x288] sm:$0xff] }
0x1082   : > { %v4562_v36 = vadd.f32 %v4556_v27, %v4540_v35  ;;  %5550 = vmatprep.mubr.msk.f32.mxu1 %vm1648_vm7, %v4564_v32  ;;  %5552 = vmatprep.mubr.msk.f32.mxu0 %vm1648_vm7, %v4564_v32  ;;  %v5011_v27 = vld [vmem:[#allocation22 + $0x268] sm:$0xff]  ;;  %v5016_v35 = vld [vmem:[#allocation22 + $0x290] sm:$0xff] }
0x1083   : > { %4666 = vmatmul.mubr.f32.vlgmr.msra.gmra.mrb[20].mxu1 %v8153_v33  ;;  %4774 = vmatmul.mubr.f32.vlgmr.msra.gmra.mrb[40].mxu0 %v8153_v33  ;;  %v8161_v60 = vmax.f32 %v4561_v34, 0.0  ;;  %v6594_v28 = vpack.c.bf16 %v5011_v27, %v5010_v25 }
0x1084   : > { %v8159_v58 = vmax.f32 %v4562_v36, 0.0  ;;  %v5017_v36 = vld [vmem:[#allocation22 + $0x298] sm:$0xff] }
0x1086   : > { %5551 = vmatprep.mubr.msk.f32.mxu1 %vm1648_vm7, %v8159_v58  ;;  %5553 = vmatprep.mubr.msk.f32.mxu0 %vm1648_vm7, %v8159_v58 }
0x1087   : > { %4671 = vmatmul.mubr.f32.gmra.mrb[22].mxu1 %v8161_v60  ;;  %4779 = vmatmul.mubr.f32.gmra.mrb[42].mxu0 %v8161_v60 }
0x1088   : > { %5657 = vmatprep.mubr.msk.f32.mxu1 %vm1377_vm6, %v5554_v37  ;;  %v6603_v37 = vpack.c.bf16 %v5017_v36, %v5016_v35 }
0x1156   : > { %v4667_v39 = vpop.f32.mrb[20].mxu1  ;;  %v4775_v45 = vpop.f32.mrb[40].mxu0 }
0x1157   : > { %v4669_v40 = vpop.f32.mrb[21].mxu1  ;;  %v4777_v41 = vpop.f32.mrb[41].mxu0 }
0x115a   : > { %v4672_v50 = vpop.f32.mrb[22].mxu1  ;;  %v4780_v47 = vpop.f32.mrb[42].mxu0 }
0x115b   : > { %v6557_v43 = vpack.c.bf16 %v4672_v50, %v4667_v39  ;;  %v6551_v61 = vpack.c.bf16 %v4780_v47, %v4775_v45  ;;  %v4674_v49 = vpop.f32.mrb[23].mxu1  ;;  %v4782_v46 = vpop.f32.mrb[43].mxu0  ;;  %v5570_v39 = vld [vmem:[%s8278_s16 + $0x40] sm:$0xff] }
0x115d   : > { %6553 = vmatprep.subr.msk.bf16.mxu1 %vm7905_vm5, %v6551_v61 }
0x115e   : > { %6556 = vmatpush3.bf16.msk.msra.mxu1 %vm7905_vm5, %v6551_v61 }
0x115f   : > { %6559 = vmatprep.subr.msk.bf16.mxu1 %vm7905_vm5, %v6557_v43 }
0x1161   : > { %5658 = vmatmul.mubr.msk.f32.vlgmr.msra.gmra.mrb[24].mxu1 %vm1377_vm6, %v5555_v26 }
0x1162   : > { %6562 = vmatpush3.bf16.msk.msra.mxu1 %vm7905_vm5, %v6557_v43  ;;  %5660 = vmatprep.mubr.msk.f32.mxu1 %vm1377_vm6, %v5556_v42 }
0x1163   : > { %6563 = vmatprep.subr.bf16.mxu1 %v7259_v54 }
0x1165   : > { %5661 = vmatmul.mubr.msk.f32.gmra.mrb[26].mxu1 %vm1377_vm6, %v5557_v51 }
0x1166   : > { %5667 = vmatprep.mubr.msk.f32.mxu1 %vm1377_vm6, %v4676_v38 }
0x1169   : > { %5668 = vmatmul.mubr.msk.f32.vlgmr.msra.gmra.mrb[24].mxu1 %vm1377_vm6, %v4677_v55 }
0x116a   : > { %6565 = vmatpush1.bf16.msra.mxu1 %v6564_v56  ;;  %5670 = vmatprep.mubr.msk.f32.mxu1 %vm1377_vm6, %v4678_v57 }
0x116b   : > { %6566 = vmatprep.subr.bf16.mxu1 %v7259_v54 }
0x116d   : > { %5671 = vmatmul.mubr.msk.f32.gmra.mrb[26].mxu1 %vm1377_vm6, %v4679_v63 }
0x116e   : > { %6568 = vmatpush1.bf16.msra.mxu1 %v6567_v0  ;;  %5568 = vmatprep.mubr.msk.f32.mxu1 %vm1648_vm7, %v4564_v32  ;;  %v5014_v32 = vld [vmem:[#allocation22 + $0x280] sm:$0xff] }
0x116f   : > { %6569 = vmatprep.subr.bf16.mxu1 %v7259_v54  ;;  %v6600_v34 = vpack.c.bf16 %v5015_v44, %v5014_v32 }
0x1172   : > { %6571 = vmatpush1.bf16.msra.mxu1 %v6570_v3 }
0x1173   : > { %6572 = vmatprep.subr.bf16.mxu1 %v7259_v54 }
0x1176   : > { %6574 = vmatpush1.bf16.msra.mxu1 %v6573_v6 }
0x1177   : > { %6575 = vmatprep.subr.bf16.mxu1 %v7259_v54 }
0x117a   : > { %6577 = vmatpush1.bf16.msra.mxu1 %v6576_v8 }
0x117b   : > { %6578 = vmatprep.subr.bf16.mxu1 %v7259_v54 }
0x117e   : > { %6580 = vmatpush1.bf16.msra.mxu1 %v6579_v48 }
0x117f   : > { %6581 = vmatprep.subr.bf16.mxu1 %v7259_v54 }
0x1182   : > { %6583 = vmatpush1.bf16.msra.mxu1 %v6582_v14 }
0x1183   : > { %6584 = vmatprep.subr.bf16.mxu1 %v7259_v54 }
0x1186   : > { %6586 = vmatpush1.bf16.msra.mxu1 %v6585_v17 }
0x1187   : > { %6587 = vmatprep.subr.bf16.mxu1 %v7259_v54 }
0x118a   : > { %6589 = vmatpush1.bf16.msra.mxu1 %v6588_v21 }
0x118b   : > { %6590 = vmatprep.subr.bf16.mxu1 %v7259_v54 }
0x118e   : > { %6592 = vmatpush1.bf16.msra.mxu1 %v6591_v24 }
0x118f   : > { %6593 = vmatprep.subr.bf16.mxu1 %v7259_v54 }
0x1192   : > { %6595 = vmatpush1.bf16.msra.mxu1 %v6594_v28 }
0x1193   : > { %6596 = vmatprep.subr.bf16.mxu1 %v7259_v54 }
0x1196   : > { %6598 = vmatpush1.bf16.msra.mxu1 %v6597_v31 }
0x1197   : > { %6599 = vmatprep.subr.bf16.mxu1 %v7259_v54 }
0x119a   : > { %6601 = vmatpush1.bf16.msra.mxu1 %v6600_v34 }
0x119b   : > { %6602 = vmatprep.subr.bf16.mxu1 %v7259_v54 }
0x119e   : > { %6604 = vmatpush1.bf16.msra.mxu1 %v6603_v37 }
0x11a1   : > { %5083 = vmatmul.mubr.f32.vlgmr.msra.gmra.mrb[28].mxu1 %v8153_v33  ;;  %v5571_v33 = vld [vmem:[%s8278_s16 + $0x48] sm:$0xff] }
0x11a2   : > { %5569 = vmatprep.mubr.msk.f32.mxu1 %vm1648_vm7, %v8159_v58  ;;  %v5572_v58 = vld [vmem:[%s8278_s16 + $0x50] sm:$0xff] }
0x11a5   : > { %5088 = vmatmul.mubr.f32.gmra.mrb[30].mxu1 %v8161_v60  ;;  %v5573_v60 = vld [vmem:[%s8278_s16 + $0x58] sm:$0xf] }
0x11a6   : > { %5677 = vmatprep.mubr.msk.f32.mxu1 %vm1377_vm6, %v5570_v39 }
0x1274   : > { %v5084_v45 = vpop.f32.mrb[28].mxu1 }
0x1275   : > { %v5086_v40 = vpop.f32.mrb[29].mxu1 }
0x1278   : > { %v5089_v41 = vpop.f32.mrb[30].mxu1 }
0x1279   : > { %v6605_v50 = vpack.c.bf16 %v5089_v41, %v5084_v45  ;;  %v5091_v54 = vpop.f32.mrb[31].mxu1 }
0x127b   : > { %6607 = vmatprep.subr.msk.bf16.mxu1 %vm7905_vm5, %v6605_v50 }
0x127c   : > { %6610 = vmatpush3.bf16.msk.msra.mxu1 %vm7905_vm5, %v6605_v50 }
0x127f   : > { %5678 = vmatmul.mubr.msk.f32.vlgmr.msra.gmra.mrb[24].mxu1 %vm1377_vm6, %v5571_v33 }
0x1280   : > { %5680 = vmatprep.mubr.msk.f32.mxu1 %vm1377_vm6, %v5572_v58 }
0x1283   : > { %5681 = vmatmul.mubr.msk.f32.gmra.mrb[26].mxu1 %vm1377_vm6, %v5573_v60 }
0x1352   : > { %v5679_v47 = vpop.f32.mrb[24].mxu1 }
0x1353   : > { %v5210_v43 = vadd.f32 %v5679_v47, %v5579_v12  ;;  %v5179_v61 = vpop.f32.mrb[25].mxu1 }
0x1354   : > { %v5209_v49 = vadd.f32 %v5579_v12, %v5179_v61 }
0x1355   : > { %v5214_v46 = vmax.f32 %v5210_v43, 0.0 }
0x1356   : > { %v5213_v26 = vmax.f32 %v5209_v49, 0.0  ;;  %v5682_v42 = vpop.f32.mrb[26].mxu1 }
0x1357   : > { %5218 = vst.msk [vmem:[%s798_s7 + $0x8] sm:$0xff] %vm805_vm1, %v5214_v46  ;;  %v5212_v51 = vadd.f32 %v5682_v42, %v5579_v12  ;;  %v5189_v38 = vpop.f32.mrb[27].mxu1 }
0x1358   : > { %5217 = vst.msk [vmem:[%s798_s7] sm:$0xff] %vm805_vm1, %v5213_v26  ;;  %v5211_v52 = vadd.f32 %v5579_v12, %v5189_v38 }
0x1359   : > { %v5216_v53 = vmax.f32 %v5212_v51, 0.0 }
0x135a   : > { %v5215_v55 = vmax.f32 %v5211_v52, 0.0 }
0x135b   : > { %5221 = vst.msk [vmem:[%s798_s7 + $0x18] sm:$0xf] %vm5220_vm12, %v5216_v53 }
0x135c   : > { %5219 = vst.msk [vmem:[%s798_s7 + $0x10] sm:$0xff] %vm805_vm1, %v5215_v55 }
0x135d PF: > { %s8340_s21 = sld [smem:[#allocation32_spill]] }
0x1363   : > { %s37_s0 = sadd.s32 1, %s8340_s21  }
0x1364   : > { %p34_p2 = scmp.ge.s32.totalorder %s37_s0, 4  }
0x1366   :  { %36 = sbr.rel (!%p34_p2) target bundleno = 19 (0x13), region = 215 }
0x136d   :  { %5243 = vsyncpa [#allocation3], 1 }
0x136e   :  { %5245 = vsyncpa [#allocation3 + $0x1], 1 }
0x136f   :  { %5246 = vsyncpa [#allocation5], 1 }
0x1370   :  { %5247 = vsyncpa [#allocation8], 1 }
0x1371   :  { %5248 = vsyncpa [#allocation11], 1 }
0x1372   :  { %5249 = vsyncpa [#allocation14], 1 }
0x1373   :  { %5250 = vsyncpa [#allocation17], 1 }
0x1374   :  { %5251 = vsyncpa [#allocation20], 1 }
0x1375   :  { %5252 = vsyncpa [#allocation23], 1 }

</bundles_post_ra>
